<compile_context>
chip_gen: v7x
topology: tpu7x:2x2x1
jax: 0.10.0
libtpu: 0.0.40
codegen_flags: <defaults>
</compile_context>

<pallas_src>
import functools

import jax
import jax.numpy as jnp
from jax.experimental import pallas as pl
from jax.experimental.pallas import tpu as pltpu

LEAKY_SLOPE = 0.2
BN_EPS = 1e-5


# ---------------------------------------------------------------------------
# Fused kernel: the whole autoencoder forward in one invocation.
#   refs = (x_ref, <per-layer param refs...>, out_ref)
#   layer_cfg : static tuple of (activation, has_bn) per Linear layer
#   n_valid   : real (unpadded) batch size, used for masked BN statistics
# ---------------------------------------------------------------------------
def _fused_autoencoder_kernel(*refs, layer_cfg, n_valid):
    x_ref = refs[0]
    out_ref = refs[-1]
    param_refs = refs[1:-1]

    h = x_ref[...]                                  # (Bp, K) f32
    bp = h.shape[0]

    # Row-validity mask: padded rows must not contribute to batch statistics.
    row = jax.lax.broadcasted_iota(jnp.int32, (bp, 1), 0)
    valid = (row < n_valid).astype(jnp.float32)     # (Bp, 1)
    inv_n = 1.0 / float(n_valid)

    idx = 0
    for act, has_bn in layer_cfg:
        w = param_refs[idx][...]                    # (K, N) bf16
        b = param_refs[idx + 1][...]                # (1, N) f32
        idx += 2

        # MXU matmul: bf16 operands, f32 accumulation.
        y = jnp.dot(h.astype(jnp.bfloat16), w,
                    preferred_element_type=jnp.float32) + b

        if act == "leaky_relu":
            y = jnp.where(y >= 0.0, y, LEAKY_SLOPE * y)
        elif act == "sigmoid":
            # exp on the EUP, exact reciprocal (keeps output strictly in [0, 1]).
            y = pl.reciprocal(1.0 + jnp.exp(-y))

        if has_bn:
            gamma = param_refs[idx][...]            # (1, N) f32
            beta = param_refs[idx + 1][...]         # (1, N) f32
            idx += 2
            # Training-mode BatchNorm1d over the *real* batch rows only
            # (batch mean, biased batch variance), all in f32.
            mean = jnp.sum(y * valid, axis=0, keepdims=True) * inv_n
            cen = y - mean
            var = jnp.sum((cen * cen) * valid, axis=0, keepdims=True) * inv_n
            y = cen * jax.lax.rsqrt(var + BN_EPS) * gamma + beta

        h = y

    out_ref[...] = h.astype(out_ref.dtype)


# ---------------------------------------------------------------------------
# Wrapper: flatten NCHW input, pad batch to a sublane multiple, run one call.
# ---------------------------------------------------------------------------
def autoencoder_forward(params, x, layer_acts):
    B = x.shape[0]
    h = x.reshape(B, -1).astype(jnp.float32)        # == x.view(B, -1)
    K_in = h.shape[1]
    K_out = params[-1]["w"].shape[1]

    # Pad batch to a multiple of 8 (f32 sublane height); BN stats stay masked.
    B_pad = max(8, -(-B // 8) * 8)
    if B_pad != B:
        h = jnp.pad(h, ((0, B_pad - B), (0, 0)))

    vmem = pl.BlockSpec(memory_space=pltpu.MemorySpace.VMEM)

    flat_args = [h]
    in_specs = [vmem]
    for p, (_, has_bn) in zip(params, layer_acts):
        flat_args.append(p["w"].astype(jnp.bfloat16))           # (K, N) bf16
        flat_args.append(p["b"].reshape(1, -1).astype(jnp.float32))
        in_specs += [vmem, vmem]
        if has_bn:
            flat_args.append(p["gamma"].reshape(1, -1).astype(jnp.float32))
            flat_args.append(p["beta"].reshape(1, -1).astype(jnp.float32))
            in_specs += [vmem, vmem]

    # Advisory cost estimate for XLA scheduling around this small custom call.
    flops = 2 * B_pad * sum(p["w"].shape[0] * p["w"].shape[1] for p in params)
    transcendentals = B_pad * (K_out + sum(p["w"].shape[1] for p in params))
    bytes_accessed = (sum(int(a.size) * a.dtype.itemsize for a in flat_args)
                      + B_pad * K_out * 4)

    kernel = functools.partial(
        _fused_autoencoder_kernel, layer_cfg=tuple(layer_acts), n_valid=B)

    out = pl.pallas_call(
        kernel,
        out_shape=jax.ShapeDtypeStruct((B_pad, K_out), jnp.float32),
        in_specs=in_specs,
        out_specs=vmem,
        compiler_params=pltpu.CompilerParams(
            vmem_limit_bytes=32 * 1024 * 1024),
        cost_estimate=pl.CostEstimate(
            flops=flops,
            transcendentals=transcendentals,
            bytes_accessed=bytes_accessed),
    )(*flat_args)

    return out[:B]


# ---------------------------------------------------------------------------
# Layer configuration & parameter init (PyTorch-default-like, deterministic)
# ---------------------------------------------------------------------------
def layer_specs(input_size):
    # (in, out, activation, has_bn) for each of the 10 Linear layers
    return [
        # encoder
        (input_size, 512, "leaky_relu", True),
        (512, 256, "leaky_relu", True),
        (256, 128, "leaky_relu", True),
        (128, 64, "leaky_relu", False),
        (64, 3, "none", False),
        # decoder
        (3, 64, "leaky_relu", False),
        (64, 128, "leaky_relu", True),
        (128, 256, "leaky_relu", True),
        (256, 512, "leaky_relu", False),
        (512, input_size, "sigmoid", False),
    ]


def init_params(key, input_size):
    specs = layer_specs(input_size)
    keys = jax.random.split(key, len(specs))
    params = []
    for k, (fi, fo, _, has_bn) in zip(keys, specs):
        kw, kb = jax.random.split(k)
        bound = 1.0 / float(fi) ** 0.5
        # stored as (in, out) == PyTorch weight.T
        w = jax.random.uniform(kw, (fi, fo), jnp.float32, -bound, bound)
        b = jax.random.uniform(kb, (fo,), jnp.float32, -bound, bound)
        if has_bn:
            gamma = jnp.ones((fo,), jnp.float32)    # PyTorch BN defaults
            beta = jnp.zeros((fo,), jnp.float32)
        else:
            gamma = beta = None
        params.append(dict(w=w, b=b, gamma=gamma, beta=beta))
    return params


# ---------------------------------------------------------------------------
if __name__ == "__main__":
    key = jax.random.PRNGKey(0)
    k_x, k_p = jax.random.split(key)

    B, C, H, W = 2, 4, 16, 16               # NCHW, like the PyTorch module input
    input_size = C * H * W                  # 1024

    x = jax.random.normal(k_x, (B, C, H, W), jnp.float32)
    params = init_params(k_p, input_size)
    acts = tuple((a, bn) for _, _, a, bn in layer_specs(input_size))

    fwd = jax.jit(lambda p, xx: autoencoder_forward(p, xx, acts))
    y = jax.block_until_ready(fwd(params, x))

    assert y.shape == (B, input_size), y.shape
    assert bool(jnp.all(jnp.isfinite(y)))
    assert bool(jnp.all((y >= 0.0) & (y <= 1.0)))   # sigmoid output range

    print("KERNEL_OK")
</pallas_src>

<mosaic_0001>
module attributes {stable_mosaic.version = 11 : i64} {
  func.func @_fused_autoencoder_kernel(%arg0: memref<8x1024xf32, #tpu.memory_space<vmem>>, %arg1: memref<1024x512xbf16, #tpu.memory_space<vmem>>, %arg2: memref<1x512xf32, #tpu.memory_space<vmem>>, %arg3: memref<1x512xf32, #tpu.memory_space<vmem>>, %arg4: memref<1x512xf32, #tpu.memory_space<vmem>>, %arg5: memref<512x256xbf16, #tpu.memory_space<vmem>>, %arg6: memref<1x256xf32, #tpu.memory_space<vmem>>, %arg7: memref<1x256xf32, #tpu.memory_space<vmem>>, %arg8: memref<1x256xf32, #tpu.memory_space<vmem>>, %arg9: memref<256x128xbf16, #tpu.memory_space<vmem>>, %arg10: memref<1x128xf32, #tpu.memory_space<vmem>>, %arg11: memref<1x128xf32, #tpu.memory_space<vmem>>, %arg12: memref<1x128xf32, #tpu.memory_space<vmem>>, %arg13: memref<128x64xbf16, #tpu.memory_space<vmem>>, %arg14: memref<1x64xf32, #tpu.memory_space<vmem>>, %arg15: memref<64x3xbf16, #tpu.memory_space<vmem>>, %arg16: memref<1x3xf32, #tpu.memory_space<vmem>>, %arg17: memref<3x64xbf16, #tpu.memory_space<vmem>>, %arg18: memref<1x64xf32, #tpu.memory_space<vmem>>, %arg19: memref<64x128xbf16, #tpu.memory_space<vmem>>, %arg20: memref<1x128xf32, #tpu.memory_space<vmem>>, %arg21: memref<1x128xf32, #tpu.memory_space<vmem>>, %arg22: memref<1x128xf32, #tpu.memory_space<vmem>>, %arg23: memref<128x256xbf16, #tpu.memory_space<vmem>>, %arg24: memref<1x256xf32, #tpu.memory_space<vmem>>, %arg25: memref<1x256xf32, #tpu.memory_space<vmem>>, %arg26: memref<1x256xf32, #tpu.memory_space<vmem>>, %arg27: memref<256x512xbf16, #tpu.memory_space<vmem>>, %arg28: memref<1x512xf32, #tpu.memory_space<vmem>>, %arg29: memref<512x1024xbf16, #tpu.memory_space<vmem>>, %arg30: memref<1x1024xf32, #tpu.memory_space<vmem>>, %arg31: memref<8x1024xf32, #tpu.memory_space<vmem>>) attributes {dimension_semantics = [], scalar_prefetch = 0 : i64, scratch_operands = 0 : i64, tpu.core_type = #tpu.core_type<tc>} {
    %c0 = arith.constant 0 : index
    %c0_0 = arith.constant 0 : index
    %0 = vector.load %arg0[%c0, %c0_0] : memref<8x1024xf32, #tpu.memory_space<vmem>>, vector<8x1024xf32>
    %1 = tpu.iota {dimensions = array<i32: 0>} : vector<8x1xi32>
    %c2_i32 = arith.constant 2 : i32
    %2 = vector.broadcast %c2_i32 : i32 to vector<8x1xi32>
    %3 = arith.cmpi slt, %1, %2 : vector<8x1xi32>
    %4 = arith.extui %3 : vector<8x1xi1> to vector<8x1xi32>
    %5 = arith.sitofp %4 : vector<8x1xi32> to vector<8x1xf32>
    %c0_1 = arith.constant 0 : index
    %c0_2 = arith.constant 0 : index
    %6 = vector.load %arg1[%c0_1, %c0_2] : memref<1024x512xbf16, #tpu.memory_space<vmem>>, vector<1024x512xbf16>
    %c0_3 = arith.constant 0 : index
    %c0_4 = arith.constant 0 : index
    %7 = vector.load %arg2[%c0_3, %c0_4] : memref<1x512xf32, #tpu.memory_space<vmem>>, vector<1x512xf32>
    %8 = arith.truncf %0 : vector<8x1024xf32> to vector<8x1024xbf16>
    %cst = arith.constant dense<0.000000e+00> : vector<8x512xf32>
    %9 = tpu.matmul %8, %6, %cst {dimension_numbers = #tpu.dot_dimension_numbers<[1], [0], [0], [1], [0, 0, 1, 1], [], []>} : vector<8x1024xbf16>, vector<1024x512xbf16>, vector<8x512xf32> -> vector<8x512xf32>
    %10 = vector.broadcast %7 : vector<1x512xf32> to vector<8x512xf32>
    %11 = arith.addf %9, %10 : vector<8x512xf32>
    %cst_5 = arith.constant 0.000000e+00 : f32
    %12 = vector.broadcast %cst_5 : f32 to vector<8x512xf32>
    %13 = arith.cmpf oge, %11, %12 : vector<8x512xf32>
    %cst_6 = arith.constant 2.000000e-01 : f32
    %14 = vector.broadcast %cst_6 : f32 to vector<8x512xf32>
    %15 = arith.mulf %14, %11 : vector<8x512xf32>
    %16 = arith.select %13, %11, %15 : vector<8x512xi1>, vector<8x512xf32>
    %c0_7 = arith.constant 0 : index
    %c0_8 = arith.constant 0 : index
    %17 = vector.load %arg3[%c0_7, %c0_8] : memref<1x512xf32, #tpu.memory_space<vmem>>, vector<1x512xf32>
    %c0_9 = arith.constant 0 : index
    %c0_10 = arith.constant 0 : index
    %18 = vector.load %arg4[%c0_9, %c0_10] : memref<1x512xf32, #tpu.memory_space<vmem>>, vector<1x512xf32>
    %19 = vector.broadcast %5 : vector<8x1xf32> to vector<8x512xf32>
    %20 = arith.mulf %16, %19 : vector<8x512xf32>
    %cst_11 = arith.constant dense<0.000000e+00> : vector<512xf32>
    %21 = vector.multi_reduction <add>, %20, %cst_11 [0] : vector<8x512xf32> to vector<512xf32>
    %22 = vector.shape_cast %21 : vector<512xf32> to vector<1x512xf32>
    %cst_12 = arith.constant 5.000000e-01 : f32
    %23 = vector.broadcast %cst_12 : f32 to vector<1x512xf32>
    %24 = arith.mulf %22, %23 : vector<1x512xf32>
    %25 = vector.broadcast %24 : vector<1x512xf32> to vector<8x512xf32>
    %26 = arith.subf %16, %25 : vector<8x512xf32>
    %27 = arith.mulf %26, %26 : vector<8x512xf32>
    %28 = vector.broadcast %5 : vector<8x1xf32> to vector<8x512xf32>
    %29 = arith.mulf %27, %28 : vector<8x512xf32>
    %cst_13 = arith.constant dense<0.000000e+00> : vector<512xf32>
    %30 = vector.multi_reduction <add>, %29, %cst_13 [0] : vector<8x512xf32> to vector<512xf32>
    %31 = vector.shape_cast %30 : vector<512xf32> to vector<1x512xf32>
    %cst_14 = arith.constant 5.000000e-01 : f32
    %32 = vector.broadcast %cst_14 : f32 to vector<1x512xf32>
    %33 = arith.mulf %31, %32 : vector<1x512xf32>
    %cst_15 = arith.constant 9.99999974E-6 : f32
    %34 = vector.broadcast %cst_15 : f32 to vector<1x512xf32>
    %35 = arith.addf %33, %34 : vector<1x512xf32>
    %36 = math.rsqrt %35 : vector<1x512xf32>
    %37 = vector.broadcast %36 : vector<1x512xf32> to vector<8x512xf32>
    %38 = arith.mulf %26, %37 : vector<8x512xf32>
    %39 = vector.broadcast %17 : vector<1x512xf32> to vector<8x512xf32>
    %40 = arith.mulf %38, %39 : vector<8x512xf32>
    %41 = vector.broadcast %18 : vector<1x512xf32> to vector<8x512xf32>
    %42 = arith.addf %40, %41 : vector<8x512xf32>
    %c0_16 = arith.constant 0 : index
    %c0_17 = arith.constant 0 : index
    %43 = vector.load %arg5[%c0_16, %c0_17] : memref<512x256xbf16, #tpu.memory_space<vmem>>, vector<512x256xbf16>
    %c0_18 = arith.constant 0 : index
    %c0_19 = arith.constant 0 : index
    %44 = vector.load %arg6[%c0_18, %c0_19] : memref<1x256xf32, #tpu.memory_space<vmem>>, vector<1x256xf32>
    %45 = arith.truncf %42 : vector<8x512xf32> to vector<8x512xbf16>
    %cst_20 = arith.constant dense<0.000000e+00> : vector<8x256xf32>
    %46 = tpu.matmul %45, %43, %cst_20 {dimension_numbers = #tpu.dot_dimension_numbers<[1], [0], [0], [1], [0, 0, 1, 1], [], []>} : vector<8x512xbf16>, vector<512x256xbf16>, vector<8x256xf32> -> vector<8x256xf32>
    %47 = vector.broadcast %44 : vector<1x256xf32> to vector<8x256xf32>
    %48 = arith.addf %46, %47 : vector<8x256xf32>
    %cst_21 = arith.constant 0.000000e+00 : f32
    %49 = vector.broadcast %cst_21 : f32 to vector<8x256xf32>
    %50 = arith.cmpf oge, %48, %49 : vector<8x256xf32>
    %cst_22 = arith.constant 2.000000e-01 : f32
    %51 = vector.broadcast %cst_22 : f32 to vector<8x256xf32>
    %52 = arith.mulf %51, %48 : vector<8x256xf32>
    %53 = arith.select %50, %48, %52 : vector<8x256xi1>, vector<8x256xf32>
    %c0_23 = arith.constant 0 : index
    %c0_24 = arith.constant 0 : index
    %54 = vector.load %arg7[%c0_23, %c0_24] : memref<1x256xf32, #tpu.memory_space<vmem>>, vector<1x256xf32>
    %c0_25 = arith.constant 0 : index
    %c0_26 = arith.constant 0 : index
    %55 = vector.load %arg8[%c0_25, %c0_26] : memref<1x256xf32, #tpu.memory_space<vmem>>, vector<1x256xf32>
    %56 = vector.broadcast %5 : vector<8x1xf32> to vector<8x256xf32>
    %57 = arith.mulf %53, %56 : vector<8x256xf32>
    %cst_27 = arith.constant dense<0.000000e+00> : vector<256xf32>
    %58 = vector.multi_reduction <add>, %57, %cst_27 [0] : vector<8x256xf32> to vector<256xf32>
    %59 = vector.shape_cast %58 : vector<256xf32> to vector<1x256xf32>
    %cst_28 = arith.constant 5.000000e-01 : f32
    %60 = vector.broadcast %cst_28 : f32 to vector<1x256xf32>
    %61 = arith.mulf %59, %60 : vector<1x256xf32>
    %62 = vector.broadcast %61 : vector<1x256xf32> to vector<8x256xf32>
    %63 = arith.subf %53, %62 : vector<8x256xf32>
    %64 = arith.mulf %63, %63 : vector<8x256xf32>
    %65 = vector.broadcast %5 : vector<8x1xf32> to vector<8x256xf32>
    %66 = arith.mulf %64, %65 : vector<8x256xf32>
    %cst_29 = arith.constant dense<0.000000e+00> : vector<256xf32>
    %67 = vector.multi_reduction <add>, %66, %cst_29 [0] : vector<8x256xf32> to vector<256xf32>
    %68 = vector.shape_cast %67 : vector<256xf32> to vector<1x256xf32>
    %cst_30 = arith.constant 5.000000e-01 : f32
    %69 = vector.broadcast %cst_30 : f32 to vector<1x256xf32>
    %70 = arith.mulf %68, %69 : vector<1x256xf32>
    %cst_31 = arith.constant 9.99999974E-6 : f32
    %71 = vector.broadcast %cst_31 : f32 to vector<1x256xf32>
    %72 = arith.addf %70, %71 : vector<1x256xf32>
    %73 = math.rsqrt %72 : vector<1x256xf32>
    %74 = vector.broadcast %73 : vector<1x256xf32> to vector<8x256xf32>
    %75 = arith.mulf %63, %74 : vector<8x256xf32>
    %76 = vector.broadcast %54 : vector<1x256xf32> to vector<8x256xf32>
    %77 = arith.mulf %75, %76 : vector<8x256xf32>
    %78 = vector.broadcast %55 : vector<1x256xf32> to vector<8x256xf32>
    %79 = arith.addf %77, %78 : vector<8x256xf32>
    %c0_32 = arith.constant 0 : index
    %c0_33 = arith.constant 0 : index
    %80 = vector.load %arg9[%c0_32, %c0_33] : memref<256x128xbf16, #tpu.memory_space<vmem>>, vector<256x128xbf16>
    %c0_34 = arith.constant 0 : index
    %c0_35 = arith.constant 0 : index
    %81 = vector.load %arg10[%c0_34, %c0_35] : memref<1x128xf32, #tpu.memory_space<vmem>>, vector<1x128xf32>
    %82 = arith.truncf %79 : vector<8x256xf32> to vector<8x256xbf16>
    %cst_36 = arith.constant dense<0.000000e+00> : vector<8x128xf32>
    %83 = tpu.matmul %82, %80, %cst_36 {dimension_numbers = #tpu.dot_dimension_numbers<[1], [0], [0], [1], [0, 0, 1, 1], [], []>} : vector<8x256xbf16>, vector<256x128xbf16>, vector<8x128xf32> -> vector<8x128xf32>
    %84 = vector.broadcast %81 : vector<1x128xf32> to vector<8x128xf32>
    %85 = arith.addf %83, %84 : vector<8x128xf32>
    %cst_37 = arith.constant 0.000000e+00 : f32
    %86 = vector.broadcast %cst_37 : f32 to vector<8x128xf32>
    %87 = arith.cmpf oge, %85, %86 : vector<8x128xf32>
    %cst_38 = arith.constant 2.000000e-01 : f32
    %88 = vector.broadcast %cst_38 : f32 to vector<8x128xf32>
    %89 = arith.mulf %88, %85 : vector<8x128xf32>
    %90 = arith.select %87, %85, %89 : vector<8x128xi1>, vector<8x128xf32>
    %c0_39 = arith.constant 0 : index
    %c0_40 = arith.constant 0 : index
    %91 = vector.load %arg11[%c0_39, %c0_40] : memref<1x128xf32, #tpu.memory_space<vmem>>, vector<1x128xf32>
    %c0_41 = arith.constant 0 : index
    %c0_42 = arith.constant 0 : index
    %92 = vector.load %arg12[%c0_41, %c0_42] : memref<1x128xf32, #tpu.memory_space<vmem>>, vector<1x128xf32>
    %93 = vector.broadcast %5 : vector<8x1xf32> to vector<8x128xf32>
    %94 = arith.mulf %90, %93 : vector<8x128xf32>
    %cst_43 = arith.constant dense<0.000000e+00> : vector<128xf32>
    %95 = vector.multi_reduction <add>, %94, %cst_43 [0] : vector<8x128xf32> to vector<128xf32>
    %96 = vector.shape_cast %95 : vector<128xf32> to vector<1x128xf32>
    %cst_44 = arith.constant 5.000000e-01 : f32
    %97 = vector.broadcast %cst_44 : f32 to vector<1x128xf32>
    %98 = arith.mulf %96, %97 : vector<1x128xf32>
    %99 = vector.broadcast %98 : vector<1x128xf32> to vector<8x128xf32>
    %100 = arith.subf %90, %99 : vector<8x128xf32>
    %101 = arith.mulf %100, %100 : vector<8x128xf32>
    %102 = vector.broadcast %5 : vector<8x1xf32> to vector<8x128xf32>
    %103 = arith.mulf %101, %102 : vector<8x128xf32>
    %cst_45 = arith.constant dense<0.000000e+00> : vector<128xf32>
    %104 = vector.multi_reduction <add>, %103, %cst_45 [0] : vector<8x128xf32> to vector<128xf32>
    %105 = vector.shape_cast %104 : vector<128xf32> to vector<1x128xf32>
    %cst_46 = arith.constant 5.000000e-01 : f32
    %106 = vector.broadcast %cst_46 : f32 to vector<1x128xf32>
    %107 = arith.mulf %105, %106 : vector<1x128xf32>
    %cst_47 = arith.constant 9.99999974E-6 : f32
    %108 = vector.broadcast %cst_47 : f32 to vector<1x128xf32>
    %109 = arith.addf %107, %108 : vector<1x128xf32>
    %110 = math.rsqrt %109 : vector<1x128xf32>
    %111 = vector.broadcast %110 : vector<1x128xf32> to vector<8x128xf32>
    %112 = arith.mulf %100, %111 : vector<8x128xf32>
    %113 = vector.broadcast %91 : vector<1x128xf32> to vector<8x128xf32>
    %114 = arith.mulf %112, %113 : vector<8x128xf32>
    %115 = vector.broadcast %92 : vector<1x128xf32> to vector<8x128xf32>
    %116 = arith.addf %114, %115 : vector<8x128xf32>
    %c0_48 = arith.constant 0 : index
    %c0_49 = arith.constant 0 : index
    %117 = vector.load %arg13[%c0_48, %c0_49] : memref<128x64xbf16, #tpu.memory_space<vmem>>, vector<128x64xbf16>
    %c0_50 = arith.constant 0 : index
    %c0_51 = arith.constant 0 : index
    %118 = vector.load %arg14[%c0_50, %c0_51] : memref<1x64xf32, #tpu.memory_space<vmem>>, vector<1x64xf32>
    %119 = arith.truncf %116 : vector<8x128xf32> to vector<8x128xbf16>
    %cst_52 = arith.constant dense<0.000000e+00> : vector<8x64xf32>
    %120 = tpu.matmul %119, %117, %cst_52 {dimension_numbers = #tpu.dot_dimension_numbers<[1], [0], [0], [1], [0, 0, 1, 1], [], []>} : vector<8x128xbf16>, vector<128x64xbf16>, vector<8x64xf32> -> vector<8x64xf32>
    %121 = vector.broadcast %118 : vector<1x64xf32> to vector<8x64xf32>
    %122 = arith.addf %120, %121 : vector<8x64xf32>
    %cst_53 = arith.constant 0.000000e+00 : f32
    %123 = vector.broadcast %cst_53 : f32 to vector<8x64xf32>
    %124 = arith.cmpf oge, %122, %123 : vector<8x64xf32>
    %cst_54 = arith.constant 2.000000e-01 : f32
    %125 = vector.broadcast %cst_54 : f32 to vector<8x64xf32>
    %126 = arith.mulf %125, %122 : vector<8x64xf32>
    %127 = arith.select %124, %122, %126 : vector<8x64xi1>, vector<8x64xf32>
    %c0_55 = arith.constant 0 : index
    %c0_56 = arith.constant 0 : index
    %128 = vector.load %arg15[%c0_55, %c0_56] : memref<64x3xbf16, #tpu.memory_space<vmem>>, vector<64x3xbf16>
    %c0_57 = arith.constant 0 : index
    %c0_58 = arith.constant 0 : index
    %129 = vector.load %arg16[%c0_57, %c0_58] : memref<1x3xf32, #tpu.memory_space<vmem>>, vector<1x3xf32>
    %130 = arith.truncf %127 : vector<8x64xf32> to vector<8x64xbf16>
    %cst_59 = arith.constant dense<0.000000e+00> : vector<8x3xf32>
    %131 = tpu.matmul %130, %128, %cst_59 {dimension_numbers = #tpu.dot_dimension_numbers<[1], [0], [0], [1], [0, 0, 1, 1], [], []>} : vector<8x64xbf16>, vector<64x3xbf16>, vector<8x3xf32> -> vector<8x3xf32>
    %132 = vector.broadcast %129 : vector<1x3xf32> to vector<8x3xf32>
    %133 = arith.addf %131, %132 : vector<8x3xf32>
    %c0_60 = arith.constant 0 : index
    %c0_61 = arith.constant 0 : index
    %134 = vector.load %arg17[%c0_60, %c0_61] : memref<3x64xbf16, #tpu.memory_space<vmem>>, vector<3x64xbf16>
    %c0_62 = arith.constant 0 : index
    %c0_63 = arith.constant 0 : index
    %135 = vector.load %arg18[%c0_62, %c0_63] : memref<1x64xf32, #tpu.memory_space<vmem>>, vector<1x64xf32>
    %136 = arith.truncf %133 : vector<8x3xf32> to vector<8x3xbf16>
    %cst_64 = arith.constant dense<0.000000e+00> : vector<8x64xf32>
    %137 = tpu.matmul %136, %134, %cst_64 {dimension_numbers = #tpu.dot_dimension_numbers<[1], [0], [0], [1], [0, 0, 1, 1], [], []>} : vector<8x3xbf16>, vector<3x64xbf16>, vector<8x64xf32> -> vector<8x64xf32>
    %138 = vector.broadcast %135 : vector<1x64xf32> to vector<8x64xf32>
    %139 = arith.addf %137, %138 : vector<8x64xf32>
    %cst_65 = arith.constant 0.000000e+00 : f32
    %140 = vector.broadcast %cst_65 : f32 to vector<8x64xf32>
    %141 = arith.cmpf oge, %139, %140 : vector<8x64xf32>
    %cst_66 = arith.constant 2.000000e-01 : f32
    %142 = vector.broadcast %cst_66 : f32 to vector<8x64xf32>
    %143 = arith.mulf %142, %139 : vector<8x64xf32>
    %144 = arith.select %141, %139, %143 : vector<8x64xi1>, vector<8x64xf32>
    %c0_67 = arith.constant 0 : index
    %c0_68 = arith.constant 0 : index
    %145 = vector.load %arg19[%c0_67, %c0_68] : memref<64x128xbf16, #tpu.memory_space<vmem>>, vector<64x128xbf16>
    %c0_69 = arith.constant 0 : index
    %c0_70 = arith.constant 0 : index
    %146 = vector.load %arg20[%c0_69, %c0_70] : memref<1x128xf32, #tpu.memory_space<vmem>>, vector<1x128xf32>
    %147 = arith.truncf %144 : vector<8x64xf32> to vector<8x64xbf16>
    %cst_71 = arith.constant dense<0.000000e+00> : vector<8x128xf32>
    %148 = tpu.matmul %147, %145, %cst_71 {dimension_numbers = #tpu.dot_dimension_numbers<[1], [0], [0], [1], [0, 0, 1, 1], [], []>} : vector<8x64xbf16>, vector<64x128xbf16>, vector<8x128xf32> -> vector<8x128xf32>
    %149 = vector.broadcast %146 : vector<1x128xf32> to vector<8x128xf32>
    %150 = arith.addf %148, %149 : vector<8x128xf32>
    %cst_72 = arith.constant 0.000000e+00 : f32
    %151 = vector.broadcast %cst_72 : f32 to vector<8x128xf32>
    %152 = arith.cmpf oge, %150, %151 : vector<8x128xf32>
    %cst_73 = arith.constant 2.000000e-01 : f32
    %153 = vector.broadcast %cst_73 : f32 to vector<8x128xf32>
    %154 = arith.mulf %153, %150 : vector<8x128xf32>
    %155 = arith.select %152, %150, %154 : vector<8x128xi1>, vector<8x128xf32>
    %c0_74 = arith.constant 0 : index
    %c0_75 = arith.constant 0 : index
    %156 = vector.load %arg21[%c0_74, %c0_75] : memref<1x128xf32, #tpu.memory_space<vmem>>, vector<1x128xf32>
    %c0_76 = arith.constant 0 : index
    %c0_77 = arith.constant 0 : index
    %157 = vector.load %arg22[%c0_76, %c0_77] : memref<1x128xf32, #tpu.memory_space<vmem>>, vector<1x128xf32>
    %158 = vector.broadcast %5 : vector<8x1xf32> to vector<8x128xf32>
    %159 = arith.mulf %155, %158 : vector<8x128xf32>
    %cst_78 = arith.constant dense<0.000000e+00> : vector<128xf32>
    %160 = vector.multi_reduction <add>, %159, %cst_78 [0] : vector<8x128xf32> to vector<128xf32>
    %161 = vector.shape_cast %160 : vector<128xf32> to vector<1x128xf32>
    %cst_79 = arith.constant 5.000000e-01 : f32
    %162 = vector.broadcast %cst_79 : f32 to vector<1x128xf32>
    %163 = arith.mulf %161, %162 : vector<1x128xf32>
    %164 = vector.broadcast %163 : vector<1x128xf32> to vector<8x128xf32>
    %165 = arith.subf %155, %164 : vector<8x128xf32>
    %166 = arith.mulf %165, %165 : vector<8x128xf32>
    %167 = vector.broadcast %5 : vector<8x1xf32> to vector<8x128xf32>
    %168 = arith.mulf %166, %167 : vector<8x128xf32>
    %cst_80 = arith.constant dense<0.000000e+00> : vector<128xf32>
    %169 = vector.multi_reduction <add>, %168, %cst_80 [0] : vector<8x128xf32> to vector<128xf32>
    %170 = vector.shape_cast %169 : vector<128xf32> to vector<1x128xf32>
    %cst_81 = arith.constant 5.000000e-01 : f32
    %171 = vector.broadcast %cst_81 : f32 to vector<1x128xf32>
    %172 = arith.mulf %170, %171 : vector<1x128xf32>
    %cst_82 = arith.constant 9.99999974E-6 : f32
    %173 = vector.broadcast %cst_82 : f32 to vector<1x128xf32>
    %174 = arith.addf %172, %173 : vector<1x128xf32>
    %175 = math.rsqrt %174 : vector<1x128xf32>
    %176 = vector.broadcast %175 : vector<1x128xf32> to vector<8x128xf32>
    %177 = arith.mulf %165, %176 : vector<8x128xf32>
    %178 = vector.broadcast %156 : vector<1x128xf32> to vector<8x128xf32>
    %179 = arith.mulf %177, %178 : vector<8x128xf32>
    %180 = vector.broadcast %157 : vector<1x128xf32> to vector<8x128xf32>
    %181 = arith.addf %179, %180 : vector<8x128xf32>
    %c0_83 = arith.constant 0 : index
    %c0_84 = arith.constant 0 : index
    %182 = vector.load %arg23[%c0_83, %c0_84] : memref<128x256xbf16, #tpu.memory_space<vmem>>, vector<128x256xbf16>
    %c0_85 = arith.constant 0 : index
    %c0_86 = arith.constant 0 : index
    %183 = vector.load %arg24[%c0_85, %c0_86] : memref<1x256xf32, #tpu.memory_space<vmem>>, vector<1x256xf32>
    %184 = arith.truncf %181 : vector<8x128xf32> to vector<8x128xbf16>
    %cst_87 = arith.constant dense<0.000000e+00> : vector<8x256xf32>
    %185 = tpu.matmul %184, %182, %cst_87 {dimension_numbers = #tpu.dot_dimension_numbers<[1], [0], [0], [1], [0, 0, 1, 1], [], []>} : vector<8x128xbf16>, vector<128x256xbf16>, vector<8x256xf32> -> vector<8x256xf32>
    %186 = vector.broadcast %183 : vector<1x256xf32> to vector<8x256xf32>
    %187 = arith.addf %185, %186 : vector<8x256xf32>
    %cst_88 = arith.constant 0.000000e+00 : f32
    %188 = vector.broadcast %cst_88 : f32 to vector<8x256xf32>
    %189 = arith.cmpf oge, %187, %188 : vector<8x256xf32>
    %cst_89 = arith.constant 2.000000e-01 : f32
    %190 = vector.broadcast %cst_89 : f32 to vector<8x256xf32>
    %191 = arith.mulf %190, %187 : vector<8x256xf32>
    %192 = arith.select %189, %187, %191 : vector<8x256xi1>, vector<8x256xf32>
    %c0_90 = arith.constant 0 : index
    %c0_91 = arith.constant 0 : index
    %193 = vector.load %arg25[%c0_90, %c0_91] : memref<1x256xf32, #tpu.memory_space<vmem>>, vector<1x256xf32>
    %c0_92 = arith.constant 0 : index
    %c0_93 = arith.constant 0 : index
    %194 = vector.load %arg26[%c0_92, %c0_93] : memref<1x256xf32, #tpu.memory_space<vmem>>, vector<1x256xf32>
    %195 = vector.broadcast %5 : vector<8x1xf32> to vector<8x256xf32>
    %196 = arith.mulf %192, %195 : vector<8x256xf32>
    %cst_94 = arith.constant dense<0.000000e+00> : vector<256xf32>
    %197 = vector.multi_reduction <add>, %196, %cst_94 [0] : vector<8x256xf32> to vector<256xf32>
    %198 = vector.shape_cast %197 : vector<256xf32> to vector<1x256xf32>
    %cst_95 = arith.constant 5.000000e-01 : f32
    %199 = vector.broadcast %cst_95 : f32 to vector<1x256xf32>
    %200 = arith.mulf %198, %199 : vector<1x256xf32>
    %201 = vector.broadcast %200 : vector<1x256xf32> to vector<8x256xf32>
    %202 = arith.subf %192, %201 : vector<8x256xf32>
    %203 = arith.mulf %202, %202 : vector<8x256xf32>
    %204 = vector.broadcast %5 : vector<8x1xf32> to vector<8x256xf32>
    %205 = arith.mulf %203, %204 : vector<8x256xf32>
    %cst_96 = arith.constant dense<0.000000e+00> : vector<256xf32>
    %206 = vector.multi_reduction <add>, %205, %cst_96 [0] : vector<8x256xf32> to vector<256xf32>
    %207 = vector.shape_cast %206 : vector<256xf32> to vector<1x256xf32>
    %cst_97 = arith.constant 5.000000e-01 : f32
    %208 = vector.broadcast %cst_97 : f32 to vector<1x256xf32>
    %209 = arith.mulf %207, %208 : vector<1x256xf32>
    %cst_98 = arith.constant 9.99999974E-6 : f32
    %210 = vector.broadcast %cst_98 : f32 to vector<1x256xf32>
    %211 = arith.addf %209, %210 : vector<1x256xf32>
    %212 = math.rsqrt %211 : vector<1x256xf32>
    %213 = vector.broadcast %212 : vector<1x256xf32> to vector<8x256xf32>
    %214 = arith.mulf %202, %213 : vector<8x256xf32>
    %215 = vector.broadcast %193 : vector<1x256xf32> to vector<8x256xf32>
    %216 = arith.mulf %214, %215 : vector<8x256xf32>
    %217 = vector.broadcast %194 : vector<1x256xf32> to vector<8x256xf32>
    %218 = arith.addf %216, %217 : vector<8x256xf32>
    %c0_99 = arith.constant 0 : index
    %c0_100 = arith.constant 0 : index
    %219 = vector.load %arg27[%c0_99, %c0_100] : memref<256x512xbf16, #tpu.memory_space<vmem>>, vector<256x512xbf16>
    %c0_101 = arith.constant 0 : index
    %c0_102 = arith.constant 0 : index
    %220 = vector.load %arg28[%c0_101, %c0_102] : memref<1x512xf32, #tpu.memory_space<vmem>>, vector<1x512xf32>
    %221 = arith.truncf %218 : vector<8x256xf32> to vector<8x256xbf16>
    %cst_103 = arith.constant dense<0.000000e+00> : vector<8x512xf32>
    %222 = tpu.matmul %221, %219, %cst_103 {dimension_numbers = #tpu.dot_dimension_numbers<[1], [0], [0], [1], [0, 0, 1, 1], [], []>} : vector<8x256xbf16>, vector<256x512xbf16>, vector<8x512xf32> -> vector<8x512xf32>
    %223 = vector.broadcast %220 : vector<1x512xf32> to vector<8x512xf32>
    %224 = arith.addf %222, %223 : vector<8x512xf32>
    %cst_104 = arith.constant 0.000000e+00 : f32
    %225 = vector.broadcast %cst_104 : f32 to vector<8x512xf32>
    %226 = arith.cmpf oge, %224, %225 : vector<8x512xf32>
    %cst_105 = arith.constant 2.000000e-01 : f32
    %227 = vector.broadcast %cst_105 : f32 to vector<8x512xf32>
    %228 = arith.mulf %227, %224 : vector<8x512xf32>
    %229 = arith.select %226, %224, %228 : vector<8x512xi1>, vector<8x512xf32>
    %c0_106 = arith.constant 0 : index
    %c0_107 = arith.constant 0 : index
    %230 = vector.load %arg29[%c0_106, %c0_107] : memref<512x1024xbf16, #tpu.memory_space<vmem>>, vector<512x1024xbf16>
    %c0_108 = arith.constant 0 : index
    %c0_109 = arith.constant 0 : index
    %231 = vector.load %arg30[%c0_108, %c0_109] : memref<1x1024xf32, #tpu.memory_space<vmem>>, vector<1x1024xf32>
    %232 = arith.truncf %229 : vector<8x512xf32> to vector<8x512xbf16>
    %cst_110 = arith.constant dense<0.000000e+00> : vector<8x1024xf32>
    %233 = tpu.matmul %232, %230, %cst_110 {dimension_numbers = #tpu.dot_dimension_numbers<[1], [0], [0], [1], [0, 0, 1, 1], [], []>} : vector<8x512xbf16>, vector<512x1024xbf16>, vector<8x1024xf32> -> vector<8x1024xf32>
    %234 = vector.broadcast %231 : vector<1x1024xf32> to vector<8x1024xf32>
    %235 = arith.addf %233, %234 : vector<8x1024xf32>
    %cst_111 = arith.constant 0.000000e+00 : f32
    %236 = vector.broadcast %cst_111 : f32 to vector<8x1024xf32>
    %237 = arith.subf %236, %235 : vector<8x1024xf32>
    %238 = math.exp %237 : vector<8x1024xf32>
    %cst_112 = arith.constant 1.000000e+00 : f32
    %239 = vector.broadcast %cst_112 : f32 to vector<8x1024xf32>
    %240 = arith.addf %239, %238 : vector<8x1024xf32>
    %241 = tpu.reciprocal %240 : vector<8x1024xf32> -> vector<8x1024xf32>
    %c0_113 = arith.constant 0 : index
    %c0_114 = arith.constant 0 : index
    %242 = vector.load %arg31[%c0_113, %c0_114] : memref<8x1024xf32, #tpu.memory_space<vmem>>, vector<8x1024xf32>
    tpu.vector_store %arg31[%c0_113, %c0_114], %241 {strides = array<i32>} : memref<8x1024xf32, #tpu.memory_space<vmem>>, vector<8x1024xf32>,
    return
  }
}

</mosaic_0001>

<bundles_post_ra>
// kernel: _lambda_.1
= control target key start
LH: loop header
LB: loop body
LE: loop exit
PB: predicated region body
PF: predicated region fallthrough
CT: control target
= control target key end

     0   :  { %s7638_s3 = smov 1   ;;  %s7639_s10 = smov 5   ;;  %vm7649_vm7 = vmmov 0   ;;  %vm3173_vm9 = vcmask 1040384   ;;  %vm3174_vm10 = vcmask 1041408   ;;  %vm3116_vm12 = vcmask 523264   ;;  %s8618_s0 = inlined_call_operand.smem [shape: u32[32], index: -1, kind: input, shape index: {}] }
   0x1   :  { %s7681_s6 = sld [smem:[%s8618_s0 + %s7638_s3]]   ;;  %s7640_s14 = smov 2   ;;  %vm3169_vm13 = vcmask 23552  }
   0x2   :  { %s7724_s9 = sld [smem:[%s8618_s0]]   ;;  %s7642_s18 = smov 3  }
   0x3   :  { %s7955_s13 = sld [smem:[%s8618_s0 + %s7639_s10]]   ;;  %s7643_s22 = smov 4  }
   0x4   :  { %s6037_s17 = sld [smem:[%s8618_s0 + %s7640_s14]]   ;;  %s7644_s26 = smov 9  }
   0x5   :  { %s6038_s21 = sld [smem:[%s8618_s0 + %s7642_s18]]   ;;  %s7645_s30 = smov 6  }
   0x6   :  { %s6039_s25 = sld [smem:[%s8618_s0 + %s7643_s22]]   ;;  %s7646_s4 = smov 7  }
   0x7   :  { %v6954_v0 = vld [vmem:[%s7681_s6 + $0x4] ss:$16 sps:$4 sm:$0xff]   ;;  %v6956_v1 = vld [vmem:[%s7681_s6 + $0xc] ss:$16 sps:$4 sm:$0xff]   ;;  %v6958_v2 = vld [vmem:[%s7681_s6] ss:$16 sps:$4 sm:$0xff]   ;;  %s6044_s29 = sld [smem:[%s8618_s0 + %s7644_s26]]  }
   0x8   :  { %1710 = vmatprep.subr.bf16.mxu0 %v6954_v0  ;;  %v6959_v3 = vld [vmem:[%s7681_s6 + $0x8] ss:$16 sps:$4 sm:$0xff]   ;;  %1874 = vmatprep.subr.bf16.mxu1 %v6956_v1  ;;  %v6960_v4 = vld [vmem:[%s7681_s6 + $0x24] ss:$16 sps:$4 sm:$0xff]   ;;  %v6962_v5 = vld [vmem:[%s7681_s6 + $0x2c] ss:$16 sps:$4 sm:$0xff]   ;;  %s6041_s3 = sld [smem:[%s8618_s0 + %s7645_s30]]  }
   0x9   :  { %1711 = vmatpush1.bf16.msra.mxu0 %v6958_v2  ;;  %1875 = vmatpush1.bf16.msra.mxu1 %v6959_v3  ;;  %v6964_v6 = vld [vmem:[%s7681_s6 + $0x20] ss:$16 sps:$4 sm:$0xff]   ;;  %v6965_v7 = vld [vmem:[%s7681_s6 + $0x28] ss:$16 sps:$4 sm:$0xff]   ;;  %v6966_v8 = vld [vmem:[%s7681_s6 + $0x44] ss:$16 sps:$4 sm:$0xff]   ;;  %s6042_s7 = sld [smem:[%s8618_s0 + %s7646_s4]]  }
   0xa   :  { %1712 = vmatprep.subr.bf16.mxu0 %v6960_v4  ;;  %1876 = vmatprep.subr.bf16.mxu1 %v6962_v5  ;;  %v6968_v9 = vld [vmem:[%s7681_s6 + $0x4c] ss:$16 sps:$4 sm:$0xff]   ;;  %v6970_v10 = vld [vmem:[%s7681_s6 + $0x40] ss:$16 sps:$4 sm:$0xff]   ;;  %v6971_v11 = vld [vmem:[%s7681_s6 + $0x48] ss:$16 sps:$4 sm:$0xff]  }
   0xb   :  { %v6972_v12 = vld [vmem:[%s7681_s6 + $0x64] ss:$16 sps:$4 sm:$0xff]   ;;  %v6974_v13 = vld [vmem:[%s7681_s6 + $0x6c] ss:$16 sps:$4 sm:$0xff]   ;;  %v6976_v14 = vld [vmem:[%s7681_s6 + $0x60] ss:$16 sps:$4 sm:$0xff]  }
   0xc   :  { %v6977_v15 = vld [vmem:[%s7681_s6 + $0x68] ss:$16 sps:$4 sm:$0xff]   ;;  %v6978_v16 = vld [vmem:[%s7681_s6 + $0x84] ss:$16 sps:$4 sm:$0xff]   ;;  %v6980_v17 = vld [vmem:[%s7681_s6 + $0x8c] ss:$16 sps:$4 sm:$0xff]  }
   0xd   :  { %1713 = vmatpush1.bf16.msra.mxu0 %v6964_v6  ;;  %1877 = vmatpush1.bf16.msra.mxu1 %v6965_v7  ;;  %v6982_v18 = vld [vmem:[%s7681_s6 + $0x80] ss:$16 sps:$4 sm:$0xff]   ;;  %v6983_v19 = vld [vmem:[%s7681_s6 + $0x88] ss:$16 sps:$4 sm:$0xff]   ;;  %v6984_v20 = vld [vmem:[%s7681_s6 + $0xa4] ss:$16 sps:$4 sm:$0xff]  }
   0xe   :  { %1714 = vmatprep.subr.bf16.mxu0 %v6966_v8  ;;  %1878 = vmatprep.subr.bf16.mxu1 %v6968_v9  ;;  %v6986_v21 = vld [vmem:[%s7681_s6 + $0xac] ss:$16 sps:$4 sm:$0xff]   ;;  %v6988_v22 = vld [vmem:[%s7681_s6 + $0xa0] ss:$16 sps:$4 sm:$0xff]   ;;  %v6989_v23 = vld [vmem:[%s7681_s6 + $0xa8] ss:$16 sps:$4 sm:$0xff]  }
   0xf   :  { %v6990_v24 = vld [vmem:[%s7681_s6 + $0xc4] ss:$16 sps:$4 sm:$0xff]   ;;  %v6992_v25 = vld [vmem:[%s7681_s6 + $0xcc] ss:$16 sps:$4 sm:$0xff]   ;;  %v6994_v26 = vld [vmem:[%s7681_s6 + $0xc0] ss:$16 sps:$4 sm:$0xff]  }
  0x10   :  { %v6995_v27 = vld [vmem:[%s7681_s6 + $0xc8] ss:$16 sps:$4 sm:$0xff]   ;;  %v6996_v28 = vld [vmem:[%s7681_s6 + $0xe4] ss:$16 sps:$4 sm:$0xff]   ;;  %v6998_v29 = vld [vmem:[%s7681_s6 + $0xec] ss:$16 sps:$4 sm:$0xff]  }
  0x11   :  { %1715 = vmatpush1.bf16.msra.mxu0 %v6970_v10  ;;  %1879 = vmatpush1.bf16.msra.mxu1 %v6971_v11  ;;  %v7000_v30 = vld [vmem:[%s7681_s6 + $0xe0] ss:$16 sps:$4 sm:$0xff]   ;;  %v7001_v31 = vld [vmem:[%s7681_s6 + $0xe8] ss:$16 sps:$4 sm:$0xff]   ;;  %v7002_v32 = vld [vmem:[%s7681_s6 + $0x104] ss:$16 sps:$4 sm:$0xff]  }
  0x12   :  { %1716 = vmatprep.subr.bf16.mxu0 %v6972_v12  ;;  %1880 = vmatprep.subr.bf16.mxu1 %v6974_v13  ;;  %v7004_v33 = vld [vmem:[%s7681_s6 + $0x10c] ss:$16 sps:$4 sm:$0xff]   ;;  %v7006_v34 = vld [vmem:[%s7681_s6 + $0x100] ss:$16 sps:$4 sm:$0xff]   ;;  %v7007_v35 = vld [vmem:[%s7681_s6 + $0x108] ss:$16 sps:$4 sm:$0xff]  }
  0x13   :  { %v7008_v36 = vld [vmem:[%s7681_s6 + $0x124] ss:$16 sps:$4 sm:$0xff]   ;;  %v7010_v37 = vld [vmem:[%s7681_s6 + $0x12c] ss:$16 sps:$4 sm:$0xff]   ;;  %v7012_v38 = vld [vmem:[%s7681_s6 + $0x120] ss:$16 sps:$4 sm:$0xff]  }
  0x14   :  { %v7013_v39 = vld [vmem:[%s7681_s6 + $0x128] ss:$16 sps:$4 sm:$0xff]   ;;  %v7014_v40 = vld [vmem:[%s7681_s6 + $0x144] ss:$16 sps:$4 sm:$0xff]   ;;  %v7016_v41 = vld [vmem:[%s7681_s6 + $0x14c] ss:$16 sps:$4 sm:$0xff]  }
  0x15   :  { %1717 = vmatpush1.bf16.msra.mxu0 %v6976_v14  ;;  %1881 = vmatpush1.bf16.msra.mxu1 %v6977_v15  ;;  %v7018_v42 = vld [vmem:[%s7681_s6 + $0x140] ss:$16 sps:$4 sm:$0xff]   ;;  %v7019_v43 = vld [vmem:[%s7681_s6 + $0x148] ss:$16 sps:$4 sm:$0xff]   ;;  %v7020_v44 = vld [vmem:[%s7681_s6 + $0x164] ss:$16 sps:$4 sm:$0xff]  }
  0x16   :  { %1718 = vmatprep.subr.bf16.mxu0 %v6978_v16  ;;  %1882 = vmatprep.subr.bf16.mxu1 %v6980_v17  ;;  %v7022_v45 = vld [vmem:[%s7681_s6 + $0x16c] ss:$16 sps:$4 sm:$0xff]   ;;  %v7024_v47 = vld [vmem:[%s7681_s6 + $0x160] ss:$16 sps:$4 sm:$0xff]   ;;  %v7025_v49 = vld [vmem:[%s7681_s6 + $0x168] ss:$16 sps:$4 sm:$0xff]  }
  0x17   :  { %v132_v46 = vld [vmem:[%s7724_s9 + $0x8] sm:$0xff]  ;;  %v7026_v50 = vld [vmem:[%s7681_s6 + $0x184] ss:$16 sps:$4 sm:$0xff]   ;;  %v7030_v52 = vld [vmem:[%s7681_s6 + $0x180] ss:$16 sps:$4 sm:$0xff]   ;;  %s7647_s8 = smov 8  }
  0x18   :  { %v402_v48 = vpack.c.bf16 %v132_v46, %v132_v46  ;;  %v7028_v51 = vld [vmem:[%s7681_s6 + $0x18c] ss:$16 sps:$4 sm:$0xff]   ;;  %v7031_v53 = vld [vmem:[%s7681_s6 + $0x188] ss:$16 sps:$4 sm:$0xff]   ;;  %v7032_v54 = vld [vmem:[%s7681_s6 + $0x1a4] ss:$16 sps:$4 sm:$0xff]   ;;  %s6043_s11 = sld [smem:[%s8618_s0 + %s7647_s8]]  }
  0x19   :  { %1719 = vmatpush1.bf16.msra.mxu0 %v6982_v18  ;;  %1883 = vmatpush1.bf16.msra.mxu1 %v6983_v19  ;;  %v7034_v55 = vld [vmem:[%s7681_s6 + $0x1ac] ss:$16 sps:$4 sm:$0xff]   ;;  %v7036_v56 = vld [vmem:[%s7681_s6 + $0x1a0] ss:$16 sps:$4 sm:$0xff]   ;;  %v7037_v57 = vld [vmem:[%s7681_s6 + $0x1a8] ss:$16 sps:$4 sm:$0xff]  }
  0x1a   :  { %1720 = vmatprep.subr.bf16.mxu0 %v6984_v20  ;;  %1884 = vmatprep.subr.bf16.mxu1 %v6986_v21  ;;  %v7038_v58 = vld [vmem:[%s7681_s6 + $0x1c4] ss:$16 sps:$4 sm:$0xff]   ;;  %v7040_v59 = vld [vmem:[%s7681_s6 + $0x1cc] ss:$16 sps:$4 sm:$0xff]   ;;  %v7042_v60 = vld [vmem:[%s7681_s6 + $0x1c0] ss:$16 sps:$4 sm:$0xff]  }
  0x1b   :  { %1742 = vmatprep.mubr.bf16.mxu0 %v402_v48  ;;  %1906 = vmatprep.mubr.bf16.mxu1 %v402_v48  ;;  %v7043_v61 = vld [vmem:[%s7681_s6 + $0x1c8] ss:$16 sps:$4 sm:$0xff]   ;;  %v7044_v62 = vld [vmem:[%s7681_s6 + $0x1e4] ss:$16 sps:$4 sm:$0xff]   ;;  %v7046_v63 = vld [vmem:[%s7681_s6 + $0x1ec] ss:$16 sps:$4 sm:$0xff]  }
  0x1c   :  { %v7048_v0 = vld [vmem:[%s7681_s6 + $0x1e0] ss:$16 sps:$4 sm:$0xff]   ;;  %v7049_v1 = vld [vmem:[%s7681_s6 + $0x1e8] ss:$16 sps:$4 sm:$0xff]   ;;  %v7052_v3 = vld [vmem:[%s7681_s6 + $0x204] ss:$16 sps:$4 sm:$0xff]  }
  0x1d   :  { %1721 = vmatpush1.bf16.msra.mxu0 %v6988_v22  ;;  %1885 = vmatpush1.bf16.msra.mxu1 %v6989_v23  ;;  %v131_v2 = vld [vmem:[%s7724_s9] sm:$0xff]  ;;  %v7055_v4 = vld [vmem:[%s7681_s6 + $0x20c] ss:$16 sps:$4 sm:$0xff]   ;;  %v7053_v7 = vld [vmem:[%s7681_s6 + $0x208] ss:$16 sps:$4 sm:$0xff]   ;;  %s7648_s12 = smov 13  }
  0x1e   :  { %1722 = vmatprep.subr.bf16.mxu0 %v6990_v24  ;;  %1886 = vmatprep.subr.bf16.mxu1 %v6992_v25  ;;  %v401_v5 = vpack.c.bf16 %v131_v2, %v131_v2  ;;  %v7050_v6 = vld [vmem:[%s7681_s6 + $0x200] ss:$16 sps:$4 sm:$0xff]   ;;  %v7058_v8 = vld [vmem:[%s7681_s6 + $0x224] ss:$16 sps:$4 sm:$0xff]   ;;  %v7061_v9 = vld [vmem:[%s7681_s6 + $0x22c] ss:$16 sps:$4 sm:$0xff]   ;;  %s6048_s15 = sld [smem:[%s8618_s0 + %s7648_s12]]  }
  0x1f   :  { %v7056_v10 = vld [vmem:[%s7681_s6 + $0x220] ss:$16 sps:$4 sm:$0xff]   ;;  %v7059_v11 = vld [vmem:[%s7681_s6 + $0x228] ss:$16 sps:$4 sm:$0xff]   ;;  %v7064_v12 = vld [vmem:[%s7681_s6 + $0x244] ss:$16 sps:$4 sm:$0xff]  }
  0x20   :  { %v7067_v13 = vld [vmem:[%s7681_s6 + $0x24c] ss:$16 sps:$4 sm:$0xff]   ;;  %v7062_v14 = vld [vmem:[%s7681_s6 + $0x240] ss:$16 sps:$4 sm:$0xff]   ;;  %v7065_v15 = vld [vmem:[%s7681_s6 + $0x248] ss:$16 sps:$4 sm:$0xff]  }
  0x21   :  { %1723 = vmatpush1.bf16.msra.mxu0 %v6994_v26  ;;  %1887 = vmatpush1.bf16.msra.mxu1 %v6995_v27  ;;  %v7070_v16 = vld [vmem:[%s7681_s6 + $0x264] ss:$16 sps:$4 sm:$0xff]   ;;  %v7073_v17 = vld [vmem:[%s7681_s6 + $0x26c] ss:$16 sps:$4 sm:$0xff]   ;;  %v7068_v18 = vld [vmem:[%s7681_s6 + $0x260] ss:$16 sps:$4 sm:$0xff]  }
  0x22   :  { %1724 = vmatprep.subr.bf16.mxu0 %v6996_v28  ;;  %1888 = vmatprep.subr.bf16.mxu1 %v6998_v29  ;;  %v7071_v19 = vld [vmem:[%s7681_s6 + $0x268] ss:$16 sps:$4 sm:$0xff]   ;;  %v7076_v20 = vld [vmem:[%s7681_s6 + $0x284] ss:$16 sps:$4 sm:$0xff]   ;;  %v7079_v21 = vld [vmem:[%s7681_s6 + $0x28c] ss:$16 sps:$4 sm:$0xff]  }
  0x23   :  { %v7074_v22 = vld [vmem:[%s7681_s6 + $0x280] ss:$16 sps:$4 sm:$0xff]   ;;  %v7077_v23 = vld [vmem:[%s7681_s6 + $0x288] ss:$16 sps:$4 sm:$0xff]   ;;  %v7082_v24 = vld [vmem:[%s7681_s6 + $0x2a4] ss:$16 sps:$4 sm:$0xff]  }
  0x24   :  { %v7085_v25 = vld [vmem:[%s7681_s6 + $0x2ac] ss:$16 sps:$4 sm:$0xff]   ;;  %v7080_v26 = vld [vmem:[%s7681_s6 + $0x2a0] ss:$16 sps:$4 sm:$0xff]   ;;  %v7083_v27 = vld [vmem:[%s7681_s6 + $0x2a8] ss:$16 sps:$4 sm:$0xff]  }
  0x25   :  { %1725 = vmatpush1.bf16.msra.mxu0 %v7000_v30  ;;  %1889 = vmatpush1.bf16.msra.mxu1 %v7001_v31  ;;  %v7088_v28 = vld [vmem:[%s7681_s6 + $0x2c4] ss:$16 sps:$4 sm:$0xff]   ;;  %v7091_v29 = vld [vmem:[%s7681_s6 + $0x2cc] ss:$16 sps:$4 sm:$0xff]   ;;  %v7086_v31 = vld [vmem:[%s7681_s6 + $0x2c0] ss:$16 sps:$4 sm:$0xff]  }
  0x26   :  { %1726 = vmatprep.subr.bf16.mxu0 %v7002_v32  ;;  %1890 = vmatprep.subr.bf16.mxu1 %v7004_v33  ;;  %v134_v30 = vld [vmem:[%s7724_s9 + $0x18] sm:$0xff]  ;;  %v7112_v46 = vld [vmem:[%s7681_s6 + $0x344] ss:$16 sps:$4 sm:$0xff]   ;;  %v7110_v48 = vld [vmem:[%s7681_s6 + $0x340] ss:$16 sps:$4 sm:$0xff]   ;;  %s7650_s16 = smov 15  }
  0x27   :  { %v404_v32 = vpack.c.bf16 %v134_v30, %v134_v30  ;;  %v7089_v33 = vld [vmem:[%s7681_s6 + $0x2c8] ss:$16 sps:$4 sm:$0xff]   ;;  %v7142_v2 = vld [vmem:[%s7681_s6 + $0x3e4] ss:$16 sps:$4 sm:$0xff]   ;;  %s8121_s19 = sld [smem:[%s8618_s0 + %s7650_s16]]   ;;  %s7651_s20 = smov 10  }
  0x28   :  { %v7178_v30 = vld [vmem:[%s7681_s6 + $0x4a4] ss:$16 sps:$4 sm:$0xff]   ;;  %s6045_s23 = sld [smem:[%s8618_s0 + %s7651_s20]]   ;;  %s7652_s24 = smov 11  }
  0x29   :  { %1727 = vmatpush1.bf16.msra.mxu0 %v7006_v34  ;;  %1891 = vmatpush1.bf16.msra.mxu1 %v7007_v35  ;;  %v7094_v34 = vld [vmem:[%s7681_s6 + $0x2e4] ss:$16 sps:$4 sm:$0xff]   ;;  %v7097_v35 = vld [vmem:[%s7681_s6 + $0x2ec] ss:$16 sps:$4 sm:$0xff]   ;;  %s6046_s27 = sld [smem:[%s8618_s0 + %s7652_s24]]   ;;  %s7653_s28 = smov 12  }
  0x2a   :  { %1728 = vmatprep.subr.bf16.mxu0 %v7008_v36  ;;  %1892 = vmatprep.subr.bf16.mxu1 %v7010_v37  ;;  %v7092_v36 = vld [vmem:[%s7681_s6 + $0x2e0] ss:$16 sps:$4 sm:$0xff]   ;;  %v7095_v37 = vld [vmem:[%s7681_s6 + $0x2e8] ss:$16 sps:$4 sm:$0xff]   ;;  %s6047_s1 = sld [smem:[%s8618_s0 + %s7653_s28]]   ;;  %s7654_s2 = smov 14  }
  0x2b   :  { %s6049_s5 = sld [smem:[%s8618_s0 + %s7654_s2]]   ;;  %s7657_s10 = smov 19  }
  0x2c   :  { %s7658_s14 = smov 16   ;;  %s7659_s18 = smov 18  }
  0x2d   :  { %1729 = vmatpush1.bf16.msra.mxu0 %v7012_v38  ;;  %1893 = vmatpush1.bf16.msra.mxu1 %v7013_v39  ;;  %v7100_v38 = vld [vmem:[%s7681_s6 + $0x304] ss:$16 sps:$4 sm:$0xff]   ;;  %v7103_v39 = vld [vmem:[%s7681_s6 + $0x30c] ss:$16 sps:$4 sm:$0xff]   ;;  %s7660_s22 = smov 23   ;;  %s7662_s26 = smov 20  }
  0x2e   :  { %1730 = vmatprep.subr.bf16.mxu0 %v7014_v40  ;;  %1894 = vmatprep.subr.bf16.mxu1 %v7016_v41  ;;  %v7098_v40 = vld [vmem:[%s7681_s6 + $0x300] ss:$16 sps:$4 sm:$0xff]   ;;  %v7101_v41 = vld [vmem:[%s7681_s6 + $0x308] ss:$16 sps:$4 sm:$0xff]   ;;  %s7663_s30 = smov 21   ;;  %s7664_s4 = smov 22  }
  0x2f   :  { %s7665_s8 = smov 27   ;;  %s7666_s12 = smov 29  }
  0x30   :  { %s7667_s16 = smov 24   ;;  %s7668_s20 = smov 25  }
  0x31   :  { %1731 = vmatpush1.bf16.msra.mxu0 %v7018_v42  ;;  %1895 = vmatpush1.bf16.msra.mxu1 %v7019_v43  ;;  %v7106_v42 = vld [vmem:[%s7681_s6 + $0x324] ss:$16 sps:$4 sm:$0xff]   ;;  %v7109_v43 = vld [vmem:[%s7681_s6 + $0x32c] ss:$16 sps:$4 sm:$0xff]   ;;  %s7669_s24 = smov 26   ;;  %s7670_s28 = smov 28  }
  0x32   :  { %1732 = vmatprep.subr.bf16.mxu0 %v7020_v44  ;;  %1896 = vmatprep.subr.bf16.mxu1 %v7022_v45  ;;  %v7104_v44 = vld [vmem:[%s7681_s6 + $0x320] ss:$16 sps:$4 sm:$0xff]   ;;  %v7107_v45 = vld [vmem:[%s7681_s6 + $0x328] ss:$16 sps:$4 sm:$0xff]   ;;  %s7671_s2 = smov 30  }
  0x35   :  { %1733 = vmatpush1.bf16.msra.mxu0 %v7024_v47  ;;  %1897 = vmatpush1.bf16.msra.mxu1 %v7025_v49  ;;  %v7115_v47 = vld [vmem:[%s7681_s6 + $0x34c] ss:$16 sps:$4 sm:$0xff]   ;;  %v7113_v49 = vld [vmem:[%s7681_s6 + $0x348] ss:$16 sps:$4 sm:$0xff]  }
  0x36   :  { %1734 = vmatprep.subr.bf16.mxu0 %v7026_v50  ;;  %1898 = vmatprep.subr.bf16.mxu1 %v7028_v51  ;;  %v7118_v50 = vld [vmem:[%s7681_s6 + $0x364] ss:$16 sps:$4 sm:$0xff]   ;;  %v7121_v51 = vld [vmem:[%s7681_s6 + $0x36c] ss:$16 sps:$4 sm:$0xff]  }
  0x39   :  { %1735 = vmatpush1.bf16.msra.mxu0 %v7030_v52  ;;  %1899 = vmatpush1.bf16.msra.mxu1 %v7031_v53  ;;  %v7116_v52 = vld [vmem:[%s7681_s6 + $0x360] ss:$16 sps:$4 sm:$0xff]   ;;  %v7119_v53 = vld [vmem:[%s7681_s6 + $0x368] ss:$16 sps:$4 sm:$0xff]  }
  0x3a   :  { %1736 = vmatprep.subr.bf16.mxu0 %v7032_v54  ;;  %1900 = vmatprep.subr.bf16.mxu1 %v7034_v55  ;;  %v7124_v54 = vld [vmem:[%s7681_s6 + $0x384] ss:$16 sps:$4 sm:$0xff]   ;;  %v7127_v55 = vld [vmem:[%s7681_s6 + $0x38c] ss:$16 sps:$4 sm:$0xff]  }
  0x3d   :  { %1737 = vmatpush1.bf16.msra.mxu0 %v7036_v56  ;;  %1901 = vmatpush1.bf16.msra.mxu1 %v7037_v57  ;;  %v7122_v56 = vld [vmem:[%s7681_s6 + $0x380] ss:$16 sps:$4 sm:$0xff]   ;;  %v7125_v57 = vld [vmem:[%s7681_s6 + $0x388] ss:$16 sps:$4 sm:$0xff]  }
  0x3e   :  { %1738 = vmatprep.subr.bf16.mxu0 %v7038_v58  ;;  %1902 = vmatprep.subr.bf16.mxu1 %v7040_v59  ;;  %v7130_v58 = vld [vmem:[%s7681_s6 + $0x3a4] ss:$16 sps:$4 sm:$0xff]   ;;  %v7133_v59 = vld [vmem:[%s7681_s6 + $0x3ac] ss:$16 sps:$4 sm:$0xff]  }
  0x41   :  { %1739 = vmatpush1.bf16.msra.mxu0 %v7042_v60  ;;  %1903 = vmatpush1.bf16.msra.mxu1 %v7043_v61  ;;  %v7128_v60 = vld [vmem:[%s7681_s6 + $0x3a0] ss:$16 sps:$4 sm:$0xff]   ;;  %v7131_v61 = vld [vmem:[%s7681_s6 + $0x3a8] ss:$16 sps:$4 sm:$0xff]  }
  0x42   :  { %1740 = vmatprep.subr.bf16.mxu0 %v7044_v62  ;;  %1904 = vmatprep.subr.bf16.mxu1 %v7046_v63  ;;  %v7136_v62 = vld [vmem:[%s7681_s6 + $0x3c4] ss:$16 sps:$4 sm:$0xff]   ;;  %v7139_v63 = vld [vmem:[%s7681_s6 + $0x3cc] ss:$16 sps:$4 sm:$0xff]  }
  0x45   :  { %1741 = vmatpush1.bf16.msra.mxu0 %v7048_v0  ;;  %1905 = vmatpush1.bf16.msra.mxu1 %v7049_v1  ;;  %v7134_v0 = vld [vmem:[%s7681_s6 + $0x3c0] ss:$16 sps:$4 sm:$0xff]   ;;  %v7137_v1 = vld [vmem:[%s7681_s6 + $0x3c8] ss:$16 sps:$4 sm:$0xff]  }
  0x46   :  { %1751 = vmatprep.subr.bf16.mxu0 %v7052_v3  ;;  %1915 = vmatprep.subr.bf16.mxu1 %v7055_v4  ;;  %v7145_v3 = vld [vmem:[%s7681_s6 + $0x3ec] ss:$16 sps:$4 sm:$0xff]   ;;  %v7140_v4 = vld [vmem:[%s7681_s6 + $0x3e0] ss:$16 sps:$4 sm:$0xff]  }
  0x48   :  { %1743 = vmatmul.mubr.bf16.vlgmr.msra.gmra.mrb[0].mxu0 %v401_v5  ;;  %1907 = vmatmul.mubr.bf16.vlgmr.msra.gmra.mrb[0].mxu1 %v401_v5  ;;  %v7143_v5 = vld [vmem:[%s7681_s6 + $0x3e8] ss:$16 sps:$4 sm:$0xff]  }
  0x49   :  { %1752 = vmatpush1.bf16.msra.mxu0 %v7050_v6  ;;  %1916 = vmatpush1.bf16.msra.mxu1 %v7053_v7  ;;  %v7148_v6 = vld [vmem:[%s7681_s6 + $0x404] ss:$16 sps:$4 sm:$0xff]  }
  0x4a   :  { %1753 = vmatprep.subr.bf16.mxu0 %v7058_v8  ;;  %1917 = vmatprep.subr.bf16.mxu1 %v7061_v9  ;;  %v133_v7 = vld [vmem:[%s7724_s9 + $0x10] sm:$0xff]  ;;  %v7151_v8 = vld [vmem:[%s7681_s6 + $0x40c] ss:$16 sps:$4 sm:$0xff]  }
  0x4b   :  { %1783 = vmatprep.mubr.bf16.mxu0 %v404_v32  ;;  %1947 = vmatprep.mubr.bf16.mxu1 %v404_v32  ;;  %v7146_v9 = vld [vmem:[%s7681_s6 + $0x400] ss:$16 sps:$4 sm:$0xff]  }
  0x4c   :  { %v7176_v32 = vld [vmem:[%s7681_s6 + $0x4a0] ss:$16 sps:$4 sm:$0xff]  }
  0x4d   :  { %1754 = vmatpush1.bf16.msra.mxu0 %v7056_v10  ;;  %1918 = vmatpush1.bf16.msra.mxu1 %v7059_v11  ;;  %v7149_v10 = vld [vmem:[%s7681_s6 + $0x408] ss:$16 sps:$4 sm:$0xff]   ;;  %v403_v11 = vpack.c.bf16 %v133_v7, %v133_v7  ;;  %v7241_v7 = vld [vmem:[%s7681_s6 + $0x5ec] ss:$16 sps:$4 sm:$0xff]  }
  0x4e   :  { %1755 = vmatprep.subr.bf16.mxu0 %v7064_v12  ;;  %1919 = vmatprep.subr.bf16.mxu1 %v7067_v13  ;;  %v7154_v12 = vld [vmem:[%s7681_s6 + $0x424] ss:$16 sps:$4 sm:$0xff]   ;;  %v7157_v13 = vld [vmem:[%s7681_s6 + $0x42c] ss:$16 sps:$4 sm:$0xff]  }
  0x51   :  { %1756 = vmatpush1.bf16.msra.mxu0 %v7062_v14  ;;  %1920 = vmatpush1.bf16.msra.mxu1 %v7065_v15  ;;  %v136_v14 = vld [vmem:[%s7724_s9 + $0x28] sm:$0xff] }
  0x52   :  { %1757 = vmatprep.subr.bf16.mxu0 %v7070_v16  ;;  %1921 = vmatprep.subr.bf16.mxu1 %v7073_v17  ;;  %v406_v15 = vpack.c.bf16 %v136_v14, %v136_v14  ;;  %v7152_v16 = vld [vmem:[%s7681_s6 + $0x420] ss:$16 sps:$4 sm:$0xff]   ;;  %v7155_v17 = vld [vmem:[%s7681_s6 + $0x428] ss:$16 sps:$4 sm:$0xff]  }
  0x53   :  { %v138_v14 = vld [vmem:[%s7724_s9 + $0x38] sm:$0xff] }
  0x55   :  { %1758 = vmatpush1.bf16.msra.mxu0 %v7068_v18  ;;  %1922 = vmatpush1.bf16.msra.mxu1 %v7071_v19  ;;  %v7160_v18 = vld [vmem:[%s7681_s6 + $0x444] ss:$16 sps:$4 sm:$0xff]   ;;  %v7163_v19 = vld [vmem:[%s7681_s6 + $0x44c] ss:$16 sps:$4 sm:$0xff]  }
  0x56   :  { %1759 = vmatprep.subr.bf16.mxu0 %v7076_v20  ;;  %1923 = vmatprep.subr.bf16.mxu1 %v7079_v21  ;;  %v7158_v20 = vld [vmem:[%s7681_s6 + $0x440] ss:$16 sps:$4 sm:$0xff]   ;;  %v7161_v21 = vld [vmem:[%s7681_s6 + $0x448] ss:$16 sps:$4 sm:$0xff]  }
  0x59   :  { %1760 = vmatpush1.bf16.msra.mxu0 %v7074_v22  ;;  %1924 = vmatpush1.bf16.msra.mxu1 %v7077_v23  ;;  %v7166_v22 = vld [vmem:[%s7681_s6 + $0x464] ss:$16 sps:$4 sm:$0xff]   ;;  %v7169_v23 = vld [vmem:[%s7681_s6 + $0x46c] ss:$16 sps:$4 sm:$0xff]  }
  0x5a   :  { %1761 = vmatprep.subr.bf16.mxu0 %v7082_v24  ;;  %1925 = vmatprep.subr.bf16.mxu1 %v7085_v25  ;;  %v7164_v24 = vld [vmem:[%s7681_s6 + $0x460] ss:$16 sps:$4 sm:$0xff]   ;;  %v7167_v25 = vld [vmem:[%s7681_s6 + $0x468] ss:$16 sps:$4 sm:$0xff]  }
  0x5d   :  { %1762 = vmatpush1.bf16.msra.mxu0 %v7080_v26  ;;  %1926 = vmatpush1.bf16.msra.mxu1 %v7083_v27  ;;  %v7172_v26 = vld [vmem:[%s7681_s6 + $0x484] ss:$16 sps:$4 sm:$0xff]   ;;  %v7175_v27 = vld [vmem:[%s7681_s6 + $0x48c] ss:$16 sps:$4 sm:$0xff]  }
  0x5e   :  { %1763 = vmatprep.subr.bf16.mxu0 %v7088_v28  ;;  %1927 = vmatprep.subr.bf16.mxu1 %v7091_v29  ;;  %v7170_v28 = vld [vmem:[%s7681_s6 + $0x480] ss:$16 sps:$4 sm:$0xff]   ;;  %v7173_v29 = vld [vmem:[%s7681_s6 + $0x488] ss:$16 sps:$4 sm:$0xff]  }
  0x61   :  { %1764 = vmatpush1.bf16.msra.mxu0 %v7086_v31  ;;  %1928 = vmatpush1.bf16.msra.mxu1 %v7089_v33  ;;  %v7181_v31 = vld [vmem:[%s7681_s6 + $0x4ac] ss:$16 sps:$4 sm:$0xff]   ;;  %v7179_v33 = vld [vmem:[%s7681_s6 + $0x4a8] ss:$16 sps:$4 sm:$0xff]  }
  0x62   :  { %1765 = vmatprep.subr.bf16.mxu0 %v7094_v34  ;;  %1929 = vmatprep.subr.bf16.mxu1 %v7097_v35  ;;  %v7184_v34 = vld [vmem:[%s7681_s6 + $0x4c4] ss:$16 sps:$4 sm:$0xff]   ;;  %v7187_v35 = vld [vmem:[%s7681_s6 + $0x4cc] ss:$16 sps:$4 sm:$0xff]  }
  0x65   :  { %1766 = vmatpush1.bf16.msra.mxu0 %v7092_v36  ;;  %1930 = vmatpush1.bf16.msra.mxu1 %v7095_v37  ;;  %v7182_v36 = vld [vmem:[%s7681_s6 + $0x4c0] ss:$16 sps:$4 sm:$0xff]   ;;  %v7185_v37 = vld [vmem:[%s7681_s6 + $0x4c8] ss:$16 sps:$4 sm:$0xff]  }
  0x66   :  { %1767 = vmatprep.subr.bf16.mxu0 %v7100_v38  ;;  %1931 = vmatprep.subr.bf16.mxu1 %v7103_v39  ;;  %v7190_v38 = vld [vmem:[%s7681_s6 + $0x4e4] ss:$16 sps:$4 sm:$0xff]   ;;  %v7193_v39 = vld [vmem:[%s7681_s6 + $0x4ec] ss:$16 sps:$4 sm:$0xff]  }
  0x69   :  { %1768 = vmatpush1.bf16.msra.mxu0 %v7098_v40  ;;  %1932 = vmatpush1.bf16.msra.mxu1 %v7101_v41  ;;  %v7188_v40 = vld [vmem:[%s7681_s6 + $0x4e0] ss:$16 sps:$4 sm:$0xff]   ;;  %v7191_v41 = vld [vmem:[%s7681_s6 + $0x4e8] ss:$16 sps:$4 sm:$0xff]  }
  0x6a   :  { %1769 = vmatprep.subr.bf16.mxu0 %v7106_v42  ;;  %1933 = vmatprep.subr.bf16.mxu1 %v7109_v43  ;;  %v7196_v42 = vld [vmem:[%s7681_s6 + $0x504] ss:$16 sps:$4 sm:$0xff]   ;;  %v7199_v43 = vld [vmem:[%s7681_s6 + $0x50c] ss:$16 sps:$4 sm:$0xff]  }
  0x6d   :  { %1770 = vmatpush1.bf16.msra.mxu0 %v7104_v44  ;;  %1934 = vmatpush1.bf16.msra.mxu1 %v7107_v45  ;;  %v7194_v44 = vld [vmem:[%s7681_s6 + $0x500] ss:$16 sps:$4 sm:$0xff]   ;;  %v7197_v45 = vld [vmem:[%s7681_s6 + $0x508] ss:$16 sps:$4 sm:$0xff]  }
  0x6e   :  { %1771 = vmatprep.subr.bf16.mxu0 %v7112_v46  ;;  %1935 = vmatprep.subr.bf16.mxu1 %v7115_v47  ;;  %v7202_v46 = vld [vmem:[%s7681_s6 + $0x524] ss:$16 sps:$4 sm:$0xff]   ;;  %v7205_v47 = vld [vmem:[%s7681_s6 + $0x52c] ss:$16 sps:$4 sm:$0xff]  }
  0x71   :  { %1772 = vmatpush1.bf16.msra.mxu0 %v7110_v48  ;;  %1936 = vmatpush1.bf16.msra.mxu1 %v7113_v49  ;;  %v7200_v48 = vld [vmem:[%s7681_s6 + $0x520] ss:$16 sps:$4 sm:$0xff]   ;;  %v7203_v49 = vld [vmem:[%s7681_s6 + $0x528] ss:$16 sps:$4 sm:$0xff]  }
  0x72   :  { %1773 = vmatprep.subr.bf16.mxu0 %v7118_v50  ;;  %1937 = vmatprep.subr.bf16.mxu1 %v7121_v51  ;;  %v7208_v50 = vld [vmem:[%s7681_s6 + $0x544] ss:$16 sps:$4 sm:$0xff]   ;;  %v7211_v51 = vld [vmem:[%s7681_s6 + $0x54c] ss:$16 sps:$4 sm:$0xff]  }
  0x75   :  { %1774 = vmatpush1.bf16.msra.mxu0 %v7116_v52  ;;  %1938 = vmatpush1.bf16.msra.mxu1 %v7119_v53  ;;  %v7206_v52 = vld [vmem:[%s7681_s6 + $0x540] ss:$16 sps:$4 sm:$0xff]   ;;  %v7209_v53 = vld [vmem:[%s7681_s6 + $0x548] ss:$16 sps:$4 sm:$0xff]  }
  0x76   :  { %1775 = vmatprep.subr.bf16.mxu0 %v7124_v54  ;;  %1939 = vmatprep.subr.bf16.mxu1 %v7127_v55  ;;  %v7214_v54 = vld [vmem:[%s7681_s6 + $0x564] ss:$16 sps:$4 sm:$0xff]   ;;  %v7217_v55 = vld [vmem:[%s7681_s6 + $0x56c] ss:$16 sps:$4 sm:$0xff]  }
  0x79   :  { %1776 = vmatpush1.bf16.msra.mxu0 %v7122_v56  ;;  %1940 = vmatpush1.bf16.msra.mxu1 %v7125_v57  ;;  %v7212_v56 = vld [vmem:[%s7681_s6 + $0x560] ss:$16 sps:$4 sm:$0xff]   ;;  %v7215_v57 = vld [vmem:[%s7681_s6 + $0x568] ss:$16 sps:$4 sm:$0xff]  }
  0x7a   :  { %1777 = vmatprep.subr.bf16.mxu0 %v7130_v58  ;;  %1941 = vmatprep.subr.bf16.mxu1 %v7133_v59  ;;  %v7220_v58 = vld [vmem:[%s7681_s6 + $0x584] ss:$16 sps:$4 sm:$0xff]   ;;  %v7223_v59 = vld [vmem:[%s7681_s6 + $0x58c] ss:$16 sps:$4 sm:$0xff]  }
  0x7d   :  { %1778 = vmatpush1.bf16.msra.mxu0 %v7128_v60  ;;  %1942 = vmatpush1.bf16.msra.mxu1 %v7131_v61  ;;  %v7218_v60 = vld [vmem:[%s7681_s6 + $0x580] ss:$16 sps:$4 sm:$0xff]   ;;  %v7221_v61 = vld [vmem:[%s7681_s6 + $0x588] ss:$16 sps:$4 sm:$0xff]  }
  0x7e   :  { %1779 = vmatprep.subr.bf16.mxu0 %v7136_v62  ;;  %1943 = vmatprep.subr.bf16.mxu1 %v7139_v63  ;;  %v7226_v62 = vld [vmem:[%s7681_s6 + $0x5a4] ss:$16 sps:$4 sm:$0xff]   ;;  %v7229_v63 = vld [vmem:[%s7681_s6 + $0x5ac] ss:$16 sps:$4 sm:$0xff]  }
  0x81   :  { %1780 = vmatpush1.bf16.msra.mxu0 %v7134_v0  ;;  %1944 = vmatpush1.bf16.msra.mxu1 %v7137_v1  ;;  %v7224_v0 = vld [vmem:[%s7681_s6 + $0x5a0] ss:$16 sps:$4 sm:$0xff]   ;;  %v7227_v1 = vld [vmem:[%s7681_s6 + $0x5a8] ss:$16 sps:$4 sm:$0xff]  }
  0x82   :  { %1781 = vmatprep.subr.bf16.mxu0 %v7142_v2  ;;  %1945 = vmatprep.subr.bf16.mxu1 %v7145_v3  ;;  %v7232_v2 = vld [vmem:[%s7681_s6 + $0x5c4] ss:$16 sps:$4 sm:$0xff]   ;;  %v7235_v3 = vld [vmem:[%s7681_s6 + $0x5cc] ss:$16 sps:$4 sm:$0xff]  }
  0x85   :  { %1782 = vmatpush1.bf16.msra.mxu0 %v7140_v4  ;;  %1946 = vmatpush1.bf16.msra.mxu1 %v7143_v5  ;;  %v7230_v4 = vld [vmem:[%s7681_s6 + $0x5c0] ss:$16 sps:$4 sm:$0xff]   ;;  %v7233_v5 = vld [vmem:[%s7681_s6 + $0x5c8] ss:$16 sps:$4 sm:$0xff]  }
  0x86   :  { %1792 = vmatprep.subr.bf16.mxu0 %v7148_v6  ;;  %1956 = vmatprep.subr.bf16.mxu1 %v7151_v8  ;;  %v7238_v6 = vld [vmem:[%s7681_s6 + $0x5e4] ss:$16 sps:$4 sm:$0xff]   ;;  %v7236_v8 = vld [vmem:[%s7681_s6 + $0x5e0] ss:$16 sps:$4 sm:$0xff]  }
  0x88   :  { %1784 = vmatmul.mubr.bf16.vlgmr.msra.gmra.mrb[0].mxu0 %v403_v11  ;;  %1948 = vmatmul.mubr.bf16.vlgmr.msra.gmra.mrb[0].mxu1 %v403_v11  ;;  %v7244_v11 = vld [vmem:[%s7681_s6 + $0x604] ss:$16 sps:$4 sm:$0xff]  }
  0x89   :  { %1793 = vmatpush1.bf16.msra.mxu0 %v7146_v9  ;;  %1957 = vmatpush1.bf16.msra.mxu1 %v7149_v10  ;;  %v7239_v9 = vld [vmem:[%s7681_s6 + $0x5e8] ss:$16 sps:$4 sm:$0xff]   ;;  %v135_v10 = vld [vmem:[%s7724_s9 + $0x20] sm:$0xff] }
  0x8a   :  { %1794 = vmatprep.subr.bf16.mxu0 %v7154_v12  ;;  %1958 = vmatprep.subr.bf16.mxu1 %v7157_v13  ;;  %v7247_v12 = vld [vmem:[%s7681_s6 + $0x60c] ss:$16 sps:$4 sm:$0xff]   ;;  %v405_v13 = vpack.c.bf16 %v135_v10, %v135_v10  ;;  %v7334_v10 = vld [vmem:[%s7681_s6 + $0x7e4] ss:$16 sps:$4 sm:$0xff]  }
  0x8b   :  { %1824 = vmatprep.mubr.bf16.mxu0 %v406_v15  ;;  %1988 = vmatprep.mubr.bf16.mxu1 %v406_v15  ;;  %v7242_v15 = vld [vmem:[%s7681_s6 + $0x600] ss:$16 sps:$4 sm:$0xff]  }
  0x8d   :  { %1795 = vmatpush1.bf16.msra.mxu0 %v7152_v16  ;;  %1959 = vmatpush1.bf16.msra.mxu1 %v7155_v17  ;;  %v7245_v16 = vld [vmem:[%s7681_s6 + $0x608] ss:$16 sps:$4 sm:$0xff]   ;;  %v7250_v17 = vld [vmem:[%s7681_s6 + $0x624] ss:$16 sps:$4 sm:$0xff]  }
  0x8e   :  { %1796 = vmatprep.subr.bf16.mxu0 %v7160_v18  ;;  %1960 = vmatprep.subr.bf16.mxu1 %v7163_v19  ;;  %v7253_v18 = vld [vmem:[%s7681_s6 + $0x62c] ss:$16 sps:$4 sm:$0xff]   ;;  %v408_v19 = vpack.c.bf16 %v138_v14, %v138_v14  ;;  %v137_v14 = vld [vmem:[%s7724_s9 + $0x30] sm:$0xff] }
  0x91   :  { %1797 = vmatpush1.bf16.msra.mxu0 %v7158_v20  ;;  %1961 = vmatpush1.bf16.msra.mxu1 %v7161_v21  ;;  %v7248_v20 = vld [vmem:[%s7681_s6 + $0x620] ss:$16 sps:$4 sm:$0xff]   ;;  %v7251_v21 = vld [vmem:[%s7681_s6 + $0x628] ss:$16 sps:$4 sm:$0xff]  }
  0x92   :  { %1798 = vmatprep.subr.bf16.mxu0 %v7166_v22  ;;  %1962 = vmatprep.subr.bf16.mxu1 %v7169_v23  ;;  %v7256_v22 = vld [vmem:[%s7681_s6 + $0x644] ss:$16 sps:$4 sm:$0xff]   ;;  %v7259_v23 = vld [vmem:[%s7681_s6 + $0x64c] ss:$16 sps:$4 sm:$0xff]  }
  0x95   :  { %1799 = vmatpush1.bf16.msra.mxu0 %v7164_v24  ;;  %1963 = vmatpush1.bf16.msra.mxu1 %v7167_v25  ;;  %v7254_v24 = vld [vmem:[%s7681_s6 + $0x640] ss:$16 sps:$4 sm:$0xff]   ;;  %v7257_v25 = vld [vmem:[%s7681_s6 + $0x648] ss:$16 sps:$4 sm:$0xff]  }
  0x96   :  { %1800 = vmatprep.subr.bf16.mxu0 %v7172_v26  ;;  %1964 = vmatprep.subr.bf16.mxu1 %v7175_v27  ;;  %v7262_v26 = vld [vmem:[%s7681_s6 + $0x664] ss:$16 sps:$4 sm:$0xff]   ;;  %v7265_v27 = vld [vmem:[%s7681_s6 + $0x66c] ss:$16 sps:$4 sm:$0xff]  }
  0x99   :  { %1801 = vmatpush1.bf16.msra.mxu0 %v7170_v28  ;;  %1965 = vmatpush1.bf16.msra.mxu1 %v7173_v29  ;;  %v7260_v28 = vld [vmem:[%s7681_s6 + $0x660] ss:$16 sps:$4 sm:$0xff]   ;;  %v7263_v29 = vld [vmem:[%s7681_s6 + $0x668] ss:$16 sps:$4 sm:$0xff]  }
  0x9a   :  { %1802 = vmatprep.subr.bf16.mxu0 %v7178_v30  ;;  %1966 = vmatprep.subr.bf16.mxu1 %v7181_v31  ;;  %v7268_v30 = vld [vmem:[%s7681_s6 + $0x684] ss:$16 sps:$4 sm:$0xff]   ;;  %v7271_v31 = vld [vmem:[%s7681_s6 + $0x68c] ss:$16 sps:$4 sm:$0xff]  }
  0x9d   :  { %1803 = vmatpush1.bf16.msra.mxu0 %v7176_v32  ;;  %1967 = vmatpush1.bf16.msra.mxu1 %v7179_v33  ;;  %v7266_v32 = vld [vmem:[%s7681_s6 + $0x680] ss:$16 sps:$4 sm:$0xff]   ;;  %v7269_v33 = vld [vmem:[%s7681_s6 + $0x688] ss:$16 sps:$4 sm:$0xff]  }
  0x9e   :  { %1804 = vmatprep.subr.bf16.mxu0 %v7184_v34  ;;  %1968 = vmatprep.subr.bf16.mxu1 %v7187_v35  ;;  %v7274_v34 = vld [vmem:[%s7681_s6 + $0x6a4] ss:$16 sps:$4 sm:$0xff]   ;;  %v7277_v35 = vld [vmem:[%s7681_s6 + $0x6ac] ss:$16 sps:$4 sm:$0xff]  }
  0xa1   :  { %1805 = vmatpush1.bf16.msra.mxu0 %v7182_v36  ;;  %1969 = vmatpush1.bf16.msra.mxu1 %v7185_v37  ;;  %v7272_v36 = vld [vmem:[%s7681_s6 + $0x6a0] ss:$16 sps:$4 sm:$0xff]   ;;  %v7275_v37 = vld [vmem:[%s7681_s6 + $0x6a8] ss:$16 sps:$4 sm:$0xff]  }
  0xa2   :  { %1806 = vmatprep.subr.bf16.mxu0 %v7190_v38  ;;  %1970 = vmatprep.subr.bf16.mxu1 %v7193_v39  ;;  %v7280_v38 = vld [vmem:[%s7681_s6 + $0x6c4] ss:$16 sps:$4 sm:$0xff]   ;;  %v7283_v39 = vld [vmem:[%s7681_s6 + $0x6cc] ss:$16 sps:$4 sm:$0xff]  }
  0xa5   :  { %1807 = vmatpush1.bf16.msra.mxu0 %v7188_v40  ;;  %1971 = vmatpush1.bf16.msra.mxu1 %v7191_v41  ;;  %v7278_v40 = vld [vmem:[%s7681_s6 + $0x6c0] ss:$16 sps:$4 sm:$0xff]   ;;  %v7281_v41 = vld [vmem:[%s7681_s6 + $0x6c8] ss:$16 sps:$4 sm:$0xff]  }
  0xa6   :  { %1808 = vmatprep.subr.bf16.mxu0 %v7196_v42  ;;  %1972 = vmatprep.subr.bf16.mxu1 %v7199_v43  ;;  %v7286_v42 = vld [vmem:[%s7681_s6 + $0x6e4] ss:$16 sps:$4 sm:$0xff]   ;;  %v7289_v43 = vld [vmem:[%s7681_s6 + $0x6ec] ss:$16 sps:$4 sm:$0xff]  }
  0xa9   :  { %1809 = vmatpush1.bf16.msra.mxu0 %v7194_v44  ;;  %1973 = vmatpush1.bf16.msra.mxu1 %v7197_v45  ;;  %v7284_v44 = vld [vmem:[%s7681_s6 + $0x6e0] ss:$16 sps:$4 sm:$0xff]   ;;  %v7287_v45 = vld [vmem:[%s7681_s6 + $0x6e8] ss:$16 sps:$4 sm:$0xff]  }
  0xaa   :  { %1810 = vmatprep.subr.bf16.mxu0 %v7202_v46  ;;  %1974 = vmatprep.subr.bf16.mxu1 %v7205_v47  ;;  %v7292_v46 = vld [vmem:[%s7681_s6 + $0x704] ss:$16 sps:$4 sm:$0xff]   ;;  %v7295_v47 = vld [vmem:[%s7681_s6 + $0x70c] ss:$16 sps:$4 sm:$0xff]  }
  0xad   :  { %1811 = vmatpush1.bf16.msra.mxu0 %v7200_v48  ;;  %1975 = vmatpush1.bf16.msra.mxu1 %v7203_v49  ;;  %v7290_v48 = vld [vmem:[%s7681_s6 + $0x700] ss:$16 sps:$4 sm:$0xff]   ;;  %v7293_v49 = vld [vmem:[%s7681_s6 + $0x708] ss:$16 sps:$4 sm:$0xff]  }
  0xae   :  { %1812 = vmatprep.subr.bf16.mxu0 %v7208_v50  ;;  %1976 = vmatprep.subr.bf16.mxu1 %v7211_v51  ;;  %v7298_v50 = vld [vmem:[%s7681_s6 + $0x724] ss:$16 sps:$4 sm:$0xff]   ;;  %v7301_v51 = vld [vmem:[%s7681_s6 + $0x72c] ss:$16 sps:$4 sm:$0xff]  }
  0xb1   :  { %1813 = vmatpush1.bf16.msra.mxu0 %v7206_v52  ;;  %1977 = vmatpush1.bf16.msra.mxu1 %v7209_v53  ;;  %v7296_v52 = vld [vmem:[%s7681_s6 + $0x720] ss:$16 sps:$4 sm:$0xff]   ;;  %v7299_v53 = vld [vmem:[%s7681_s6 + $0x728] ss:$16 sps:$4 sm:$0xff]  }
  0xb2   :  { %1814 = vmatprep.subr.bf16.mxu0 %v7214_v54  ;;  %1978 = vmatprep.subr.bf16.mxu1 %v7217_v55  ;;  %v7304_v54 = vld [vmem:[%s7681_s6 + $0x744] ss:$16 sps:$4 sm:$0xff]   ;;  %v7307_v55 = vld [vmem:[%s7681_s6 + $0x74c] ss:$16 sps:$4 sm:$0xff]  }
  0xb5   :  { %1815 = vmatpush1.bf16.msra.mxu0 %v7212_v56  ;;  %1979 = vmatpush1.bf16.msra.mxu1 %v7215_v57  ;;  %v7302_v56 = vld [vmem:[%s7681_s6 + $0x740] ss:$16 sps:$4 sm:$0xff]   ;;  %v7305_v57 = vld [vmem:[%s7681_s6 + $0x748] ss:$16 sps:$4 sm:$0xff]  }
  0xb6   :  { %1816 = vmatprep.subr.bf16.mxu0 %v7220_v58  ;;  %1980 = vmatprep.subr.bf16.mxu1 %v7223_v59  ;;  %v7310_v58 = vld [vmem:[%s7681_s6 + $0x764] ss:$16 sps:$4 sm:$0xff]   ;;  %v7313_v59 = vld [vmem:[%s7681_s6 + $0x76c] ss:$16 sps:$4 sm:$0xff]  }
  0xb9   :  { %1817 = vmatpush1.bf16.msra.mxu0 %v7218_v60  ;;  %1981 = vmatpush1.bf16.msra.mxu1 %v7221_v61  ;;  %v7308_v60 = vld [vmem:[%s7681_s6 + $0x760] ss:$16 sps:$4 sm:$0xff]   ;;  %v7311_v61 = vld [vmem:[%s7681_s6 + $0x768] ss:$16 sps:$4 sm:$0xff]  }
  0xba   :  { %1818 = vmatprep.subr.bf16.mxu0 %v7226_v62  ;;  %1982 = vmatprep.subr.bf16.mxu1 %v7229_v63  ;;  %v7316_v62 = vld [vmem:[%s7681_s6 + $0x784] ss:$16 sps:$4 sm:$0xff]   ;;  %v7319_v63 = vld [vmem:[%s7681_s6 + $0x78c] ss:$16 sps:$4 sm:$0xff]  }
  0xbd   :  { %1819 = vmatpush1.bf16.msra.mxu0 %v7224_v0  ;;  %1983 = vmatpush1.bf16.msra.mxu1 %v7227_v1  ;;  %v7314_v0 = vld [vmem:[%s7681_s6 + $0x780] ss:$16 sps:$4 sm:$0xff]   ;;  %v7317_v1 = vld [vmem:[%s7681_s6 + $0x788] ss:$16 sps:$4 sm:$0xff]  }
  0xbe   :  { %1820 = vmatprep.subr.bf16.mxu0 %v7232_v2  ;;  %1984 = vmatprep.subr.bf16.mxu1 %v7235_v3  ;;  %v7322_v2 = vld [vmem:[%s7681_s6 + $0x7a4] ss:$16 sps:$4 sm:$0xff]   ;;  %v7325_v3 = vld [vmem:[%s7681_s6 + $0x7ac] ss:$16 sps:$4 sm:$0xff]  }
  0xc1   :  { %1821 = vmatpush1.bf16.msra.mxu0 %v7230_v4  ;;  %1985 = vmatpush1.bf16.msra.mxu1 %v7233_v5  ;;  %v7320_v4 = vld [vmem:[%s7681_s6 + $0x7a0] ss:$16 sps:$4 sm:$0xff]   ;;  %v7323_v5 = vld [vmem:[%s7681_s6 + $0x7a8] ss:$16 sps:$4 sm:$0xff]  }
  0xc2   :  { %1822 = vmatprep.subr.bf16.mxu0 %v7238_v6  ;;  %1986 = vmatprep.subr.bf16.mxu1 %v7241_v7  ;;  %v7328_v6 = vld [vmem:[%s7681_s6 + $0x7c4] ss:$16 sps:$4 sm:$0xff]   ;;  %v7331_v7 = vld [vmem:[%s7681_s6 + $0x7cc] ss:$16 sps:$4 sm:$0xff]  }
  0xc5   :  { %1823 = vmatpush1.bf16.msra.mxu0 %v7236_v8  ;;  %1987 = vmatpush1.bf16.msra.mxu1 %v7239_v9  ;;  %v7326_v8 = vld [vmem:[%s7681_s6 + $0x7c0] ss:$16 sps:$4 sm:$0xff]   ;;  %v7329_v9 = vld [vmem:[%s7681_s6 + $0x7c8] ss:$16 sps:$4 sm:$0xff]  }
  0xc6   :  { %1833 = vmatprep.subr.bf16.mxu0 %v7244_v11  ;;  %1997 = vmatprep.subr.bf16.mxu1 %v7247_v12  ;;  %v7337_v11 = vld [vmem:[%s7681_s6 + $0x7ec] ss:$16 sps:$4 sm:$0xff]   ;;  %v7332_v12 = vld [vmem:[%s7681_s6 + $0x7e0] ss:$16 sps:$4 sm:$0xff]  }
  0xc8   :  { %1825 = vmatmul.mubr.bf16.vlgmr.msra.gmra.mrb[0].mxu0 %v405_v13  ;;  %1989 = vmatmul.mubr.bf16.vlgmr.msra.gmra.mrb[0].mxu1 %v405_v13  ;;  %v7335_v13 = vld [vmem:[%s7681_s6 + $0x7e8] ss:$16 sps:$4 sm:$0xff]   ;;  %s7655_s6 = smov 17  }
  0xc9   :  { %1834 = vmatpush1.bf16.msra.mxu0 %v7242_v15  ;;  %1998 = vmatpush1.bf16.msra.mxu1 %v7245_v16  ;;  %v407_v15 = vpack.c.bf16 %v137_v14, %v137_v14  ;;  %v7340_v16 = vld [vmem:[%s7955_s13 + $0x4] ss:$8 sps:$4 sm:$0xff]   ;;  %s6052_s9 = sld [smem:[%s8618_s0 + %s7655_s6]]   ;;  %s7672_s6 = smov 31  }
  0xca   :  { %1835 = vmatprep.subr.bf16.mxu0 %v7250_v17  ;;  %1999 = vmatprep.subr.bf16.mxu1 %v7253_v18  ;;  %v7338_v17 = vld [vmem:[%s7955_s13] ss:$8 sps:$4 sm:$0xff]   ;;  %v7343_v18 = vld [vmem:[%s7955_s13 + $0x14] ss:$8 sps:$4 sm:$0xff]  }
  0xcb   :  { %1865 = vmatprep.mubr.bf16.mxu0 %v408_v19  ;;  %2029 = vmatprep.mubr.bf16.mxu1 %v408_v19  ;;  %v7341_v19 = vld [vmem:[%s7955_s13 + $0x10] ss:$8 sps:$4 sm:$0xff]  }
  0xcd   :  { %1836 = vmatpush1.bf16.msra.mxu0 %v7248_v20  ;;  %2000 = vmatpush1.bf16.msra.mxu1 %v7251_v21  ;;  %v7346_v20 = vld [vmem:[%s7955_s13 + $0x24] ss:$8 sps:$4 sm:$0xff]   ;;  %v7344_v21 = vld [vmem:[%s7955_s13 + $0x20] ss:$8 sps:$4 sm:$0xff]  }
  0xce   :  { %1837 = vmatprep.subr.bf16.mxu0 %v7256_v22  ;;  %2001 = vmatprep.subr.bf16.mxu1 %v7259_v23  ;;  %v7349_v22 = vld [vmem:[%s7955_s13 + $0x34] ss:$8 sps:$4 sm:$0xff]   ;;  %v7347_v23 = vld [vmem:[%s7955_s13 + $0x30] ss:$8 sps:$4 sm:$0xff]  }
  0xd1   :  { %1838 = vmatpush1.bf16.msra.mxu0 %v7254_v24  ;;  %2002 = vmatpush1.bf16.msra.mxu1 %v7257_v25  ;;  %v7352_v24 = vld [vmem:[%s7955_s13 + $0x44] ss:$8 sps:$4 sm:$0xff]   ;;  %v7350_v25 = vld [vmem:[%s7955_s13 + $0x40] ss:$8 sps:$4 sm:$0xff]  }
  0xd2   :  { %1839 = vmatprep.subr.bf16.mxu0 %v7262_v26  ;;  %2003 = vmatprep.subr.bf16.mxu1 %v7265_v27  ;;  %v7355_v26 = vld [vmem:[%s7955_s13 + $0x54] ss:$8 sps:$4 sm:$0xff]   ;;  %v7353_v27 = vld [vmem:[%s7955_s13 + $0x50] ss:$8 sps:$4 sm:$0xff]  }
  0xd5   :  { %1840 = vmatpush1.bf16.msra.mxu0 %v7260_v28  ;;  %2004 = vmatpush1.bf16.msra.mxu1 %v7263_v29  ;;  %v7358_v28 = vld [vmem:[%s7955_s13 + $0x64] ss:$8 sps:$4 sm:$0xff]   ;;  %v7356_v29 = vld [vmem:[%s7955_s13 + $0x60] ss:$8 sps:$4 sm:$0xff]  }
  0xd6   :  { %1841 = vmatprep.subr.bf16.mxu0 %v7268_v30  ;;  %2005 = vmatprep.subr.bf16.mxu1 %v7271_v31  ;;  %v7361_v30 = vld [vmem:[%s7955_s13 + $0x74] ss:$8 sps:$4 sm:$0xff]   ;;  %v7359_v31 = vld [vmem:[%s7955_s13 + $0x70] ss:$8 sps:$4 sm:$0xff]  }
  0xd9   :  { %1842 = vmatpush1.bf16.msra.mxu0 %v7266_v32  ;;  %2006 = vmatpush1.bf16.msra.mxu1 %v7269_v33  ;;  %v7364_v32 = vld [vmem:[%s7955_s13 + $0x84] ss:$8 sps:$4 sm:$0xff]   ;;  %v7362_v33 = vld [vmem:[%s7955_s13 + $0x80] ss:$8 sps:$4 sm:$0xff]  }
  0xda   :  { %1843 = vmatprep.subr.bf16.mxu0 %v7274_v34  ;;  %2007 = vmatprep.subr.bf16.mxu1 %v7277_v35  ;;  %v7367_v34 = vld [vmem:[%s7955_s13 + $0x94] ss:$8 sps:$4 sm:$0xff]   ;;  %v7365_v35 = vld [vmem:[%s7955_s13 + $0x90] ss:$8 sps:$4 sm:$0xff]  }
  0xdd   :  { %1844 = vmatpush1.bf16.msra.mxu0 %v7272_v36  ;;  %2008 = vmatpush1.bf16.msra.mxu1 %v7275_v37  ;;  %v7370_v36 = vld [vmem:[%s7955_s13 + $0xa4] ss:$8 sps:$4 sm:$0xff]   ;;  %v7368_v37 = vld [vmem:[%s7955_s13 + $0xa0] ss:$8 sps:$4 sm:$0xff]  }
  0xde   :  { %1845 = vmatprep.subr.bf16.mxu0 %v7280_v38  ;;  %2009 = vmatprep.subr.bf16.mxu1 %v7283_v39  ;;  %v7373_v38 = vld [vmem:[%s7955_s13 + $0xb4] ss:$8 sps:$4 sm:$0xff]   ;;  %v7371_v39 = vld [vmem:[%s7955_s13 + $0xb0] ss:$8 sps:$4 sm:$0xff]  }
  0xe1   :  { %1846 = vmatpush1.bf16.msra.mxu0 %v7278_v40  ;;  %2010 = vmatpush1.bf16.msra.mxu1 %v7281_v41  ;;  %v7376_v40 = vld [vmem:[%s7955_s13 + $0xc4] ss:$8 sps:$4 sm:$0xff]   ;;  %v7374_v41 = vld [vmem:[%s7955_s13 + $0xc0] ss:$8 sps:$4 sm:$0xff]  }
  0xe2   :  { %1847 = vmatprep.subr.bf16.mxu0 %v7286_v42  ;;  %2011 = vmatprep.subr.bf16.mxu1 %v7289_v43  ;;  %v7379_v42 = vld [vmem:[%s7955_s13 + $0xd4] ss:$8 sps:$4 sm:$0xff]   ;;  %v7377_v43 = vld [vmem:[%s7955_s13 + $0xd0] ss:$8 sps:$4 sm:$0xff]  }
  0xe5   :  { %1848 = vmatpush1.bf16.msra.mxu0 %v7284_v44  ;;  %2012 = vmatpush1.bf16.msra.mxu1 %v7287_v45  ;;  %v7382_v44 = vld [vmem:[%s7955_s13 + $0xe4] ss:$8 sps:$4 sm:$0xff]   ;;  %v7380_v45 = vld [vmem:[%s7955_s13 + $0xe0] ss:$8 sps:$4 sm:$0xff]  }
  0xe6   :  { %1849 = vmatprep.subr.bf16.mxu0 %v7292_v46  ;;  %2013 = vmatprep.subr.bf16.mxu1 %v7295_v47  ;;  %v7385_v46 = vld [vmem:[%s7955_s13 + $0xf4] ss:$8 sps:$4 sm:$0xff]   ;;  %v7383_v47 = vld [vmem:[%s7955_s13 + $0xf0] ss:$8 sps:$4 sm:$0xff]  }
  0xe9   :  { %1850 = vmatpush1.bf16.msra.mxu0 %v7290_v48  ;;  %2014 = vmatpush1.bf16.msra.mxu1 %v7293_v49  ;;  %v7388_v48 = vld [vmem:[%s7955_s13 + $0x104] ss:$8 sps:$4 sm:$0xff]   ;;  %v139_v49 = vlaneseq }
  0xea   :  { %1851 = vmatprep.subr.bf16.mxu0 %v7298_v50  ;;  %2015 = vmatprep.subr.bf16.mxu1 %v7301_v51 }
  0xeb   :  { %v7993_v50 = vshrl.u32 %v139_v49, 7 }
  0xed   :  { %1852 = vmatpush1.bf16.msra.mxu0 %v7296_v52  ;;  %2016 = vmatpush1.bf16.msra.mxu1 %v7299_v53  ;;  %v7996_v51 = vsub.s32 0, %v7993_v50  ;;  %v7999_v52 = vsub.s32 2, %v7993_v50  ;;  %v400_v53 = vld [vmem:[%s6037_s17] sm:$0xf]  ;;  %vm141_vm0 = vcmp.lt.s32.totalorder %v7993_v50, 2  ;;  %s6051_s17 = sld [smem:[%s8618_s0 + %s7658_s14]]  }
  0xee   :  { %1853 = vmatprep.subr.bf16.mxu0 %v7304_v54  ;;  %2017 = vmatprep.subr.bf16.mxu1 %v7307_v55  ;;  %v8002_v54 = vsub.s32 1, %v7993_v50  ;;  %v8005_v55 = vsub.s32 3, %v7993_v50 }
  0xf1   :  { %1854 = vmatpush1.bf16.msra.mxu0 %v7302_v56  ;;  %2018 = vmatpush1.bf16.msra.mxu1 %v7305_v57  ;;  %v413_v56 = vrot.slane %v400_v53, %v7996_v51  ;;  %v421_v57 = vrot.slane %v400_v53, %v7999_v52 }
  0xf2   :  { %1855 = vmatprep.subr.bf16.mxu0 %v7310_v58  ;;  %2019 = vmatprep.subr.bf16.mxu1 %v7313_v59  ;;  %v417_v58 = vrot.slane %v400_v53, %v8002_v54  ;;  %v425_v59 = vrot.slane %v400_v53, %v8005_v55 }
  0xf5   :  { %1856 = vmatpush1.bf16.msra.mxu0 %v7308_v60  ;;  %2020 = vmatpush1.bf16.msra.mxu1 %v7311_v61 }
  0xf6   :  { %1857 = vmatprep.subr.bf16.mxu0 %v7316_v62  ;;  %2021 = vmatprep.subr.bf16.mxu1 %v7319_v63 }
  0xf9   :  { %1858 = vmatpush1.bf16.msra.mxu0 %v7314_v0  ;;  %2022 = vmatpush1.bf16.msra.mxu1 %v7317_v1 }
  0xfa   :  { %1859 = vmatprep.subr.bf16.mxu0 %v7322_v2  ;;  %2023 = vmatprep.subr.bf16.mxu1 %v7325_v3  ;;  %v7641_v2 = vmov 0.0  }
  0xfb   :  { %v8013_v3 = vsel %vm141_vm0, 1.0, %v7641_v2 }
  0xfd   :  { %1860 = vmatpush1.bf16.msra.mxu0 %v7320_v4  ;;  %2024 = vmatpush1.bf16.msra.mxu1 %v7323_v5 }
  0xfe   :  { %1861 = vmatprep.subr.bf16.mxu0 %v7328_v6  ;;  %2025 = vmatprep.subr.bf16.mxu1 %v7331_v7 }
 0x101   :  { %1862 = vmatpush1.bf16.msra.mxu0 %v7326_v8  ;;  %2026 = vmatpush1.bf16.msra.mxu1 %v7329_v9 }
 0x102   :  { %1863 = vmatprep.subr.bf16.mxu0 %v7334_v10  ;;  %2027 = vmatprep.subr.bf16.mxu1 %v7337_v11 }
 0x105   :  { %1864 = vmatpush1.bf16.msra.mxu0 %v7332_v12  ;;  %2028 = vmatpush1.bf16.msra.mxu1 %v7335_v13 }
 0x106   :  { %2586 = vmatprep.subr.bf16.mxu0 %v7340_v16 }
 0x108   :  { %1866 = vmatmul.mubr.bf16.vlgmr.msra.gmra.mrb[0].mxu0 %v407_v15  ;;  %2030 = vmatmul.mubr.bf16.vlgmr.msra.gmra.mrb[0].mxu1 %v407_v15 }
 0x109   :  { %2587 = vmatpush1.bf16.msra.mxu0 %v7338_v17 }
 0x10a   :  { %2588 = vmatprep.subr.bf16.mxu0 %v7343_v18 }
 0x10d   :  { %2589 = vmatpush1.bf16.msra.mxu0 %v7341_v19 }
 0x10e   :  { %2590 = vmatprep.subr.bf16.mxu0 %v7346_v20 }
 0x111   :  { %2591 = vmatpush1.bf16.msra.mxu0 %v7344_v21 }
 0x112   :  { %2592 = vmatprep.subr.bf16.mxu0 %v7349_v22 }
 0x115   :  { %2593 = vmatpush1.bf16.msra.mxu0 %v7347_v23 }
 0x116   :  { %2594 = vmatprep.subr.bf16.mxu0 %v7352_v24 }
 0x119   :  { %2595 = vmatpush1.bf16.msra.mxu0 %v7350_v25 }
 0x11a   :  { %2596 = vmatprep.subr.bf16.mxu0 %v7355_v26 }
 0x11d   :  { %2597 = vmatpush1.bf16.msra.mxu0 %v7353_v27 }
 0x11e   :  { %2598 = vmatprep.subr.bf16.mxu0 %v7358_v28 }
 0x121   :  { %2599 = vmatpush1.bf16.msra.mxu0 %v7356_v29 }
 0x122   :  { %2600 = vmatprep.subr.bf16.mxu0 %v7361_v30 }
 0x125   :  { %2601 = vmatpush1.bf16.msra.mxu0 %v7359_v31 }
 0x126   :  { %2602 = vmatprep.subr.bf16.mxu0 %v7364_v32 }
 0x129   :  { %2603 = vmatpush1.bf16.msra.mxu0 %v7362_v33 }
 0x12a   :  { %2604 = vmatprep.subr.bf16.mxu0 %v7367_v34 }
 0x12d   :  { %2605 = vmatpush1.bf16.msra.mxu0 %v7365_v35 }
 0x12e   :  { %2606 = vmatprep.subr.bf16.mxu0 %v7370_v36 }
 0x131   :  { %2607 = vmatpush1.bf16.msra.mxu0 %v7368_v37 }
 0x132   :  { %2608 = vmatprep.subr.bf16.mxu0 %v7373_v38 }
 0x135   :  { %2609 = vmatpush1.bf16.msra.mxu0 %v7371_v39 }
 0x136   :  { %2610 = vmatprep.subr.bf16.mxu0 %v7376_v40 }
 0x139   :  { %2611 = vmatpush1.bf16.msra.mxu0 %v7374_v41 }
 0x13a   :  { %2612 = vmatprep.subr.bf16.mxu0 %v7379_v42 }
 0x13d   :  { %2613 = vmatpush1.bf16.msra.mxu0 %v7377_v43 }
 0x13e   :  { %2614 = vmatprep.subr.bf16.mxu0 %v7382_v44 }
 0x141   :  { %2615 = vmatpush1.bf16.msra.mxu0 %v7380_v45 }
 0x142   :  { %2616 = vmatprep.subr.bf16.mxu0 %v7385_v46 }
 0x145   :  { %2617 = vmatpush1.bf16.msra.mxu0 %v7383_v47 }
 0x146   :  { %2627 = vmatprep.subr.bf16.mxu0 %v7388_v48 }
 0x1db   :  { %v1867_v60 = vpop.f32.mrb[0].mxu0  ;;  %v2031_v61 = vpop.f32.mrb[0].mxu1 }
 0x1dc   :  { %v6861_v62 = vadd.f32 %v1867_v60, %v413_v56  ;;  %v6863_v63 = vadd.f32 %v2031_v61, %v421_v57  ;;  %v1869_v0 = vpop.f32.mrb[1].mxu0  ;;  %v2033_v1 = vpop.f32.mrb[1].mxu1 }
 0x1dd   :  { %v6862_v4 = vadd.f32 %v1869_v0, %v417_v58  ;;  %v6864_v5 = vadd.f32 %v2033_v1, %v425_v59  ;;  %v1871_v6 = vpop.f32.mrb[2].mxu0  ;;  %v2035_v7 = vpop.f32.mrb[2].mxu1 }
 0x1de   :  { %vm2038_vm1 = vcmp.ge.f32.partialorder %v6861_v62, 0.0  ;;  %v2042_v8 = vmul.f32 0.2, %v6861_v62  ;;  %vm2040_vm2 = vcmp.ge.f32.partialorder %v6863_v63, 0.0  ;;  %v2044_v9 = vmul.f32 0.2, %v6863_v63 }
 0x1df   :  { %vm2039_vm3 = vcmp.ge.f32.partialorder %v6862_v4, 0.0  ;;  %v2043_v10 = vmul.f32 0.2, %v6862_v4  ;;  %vm2041_vm4 = vcmp.ge.f32.partialorder %v6864_v5, 0.0  ;;  %v2045_v11 = vmul.f32 0.2, %v6864_v5 }
 0x1e0   :  { %v2046_v12 = vsel %vm2038_vm1, %v6861_v62, %v2042_v8  ;;  %v2048_v13 = vsel %vm2040_vm2, %v6863_v63, %v2044_v9  ;;  %v1872_v14 = vpop.f32.mrb[3].mxu0  ;;  %v2036_v15 = vpop.f32.mrb[3].mxu1 }
 0x1e1   :  { %v2052_v16 = vmul.f32 %v8013_v3, %v2046_v12  ;;  %v2054_v17 = vmul.f32 %v8013_v3, %v2048_v13  ;;  %v2047_v18 = vsel %vm2039_vm3, %v6862_v4, %v2043_v10  ;;  %v2049_v19 = vsel %vm2041_vm4, %v6864_v5, %v2045_v11 }
 0x1e2   :  { %v2053_v20 = vmul.f32 %v8013_v3, %v2047_v18  ;;  %v2055_v21 = vmul.f32 %v8013_v3, %v2049_v19 }
 0x1e3   :  { %v2056_v22 = vrot.slane %v2052_v16, 4  ;;  %v2068_v23 = vrot.slane %v2054_v17, 4 }
 0x1e4   :  { %v2062_v24 = vrot.slane %v2053_v20, 4  ;;  %v2074_v25 = vrot.slane %v2055_v21, 4 }
 0x1e5   :  { %v2057_v26 = vadd.f32 %v2056_v22, %v2052_v16  ;;  %v2069_v27 = vadd.f32 %v2068_v23, %v2054_v17 }
 0x1e6   :  { %v2063_v28 = vadd.f32 %v2062_v24, %v2053_v20  ;;  %v2075_v29 = vadd.f32 %v2074_v25, %v2055_v21 }
 0x1e7   :  { %v2058_v30 = vrot.slane %v2057_v26, 2  ;;  %v2070_v31 = vrot.slane %v2069_v27, 2 }
 0x1e8   :  { %v2064_v32 = vrot.slane %v2063_v28, 2  ;;  %v2076_v33 = vrot.slane %v2075_v29, 2 }
 0x1e9   :  { %v2059_v34 = vadd.f32 %v2058_v30, %v2057_v26  ;;  %v2071_v35 = vadd.f32 %v2070_v31, %v2069_v27 }
 0x1ea   :  { %v2065_v36 = vadd.f32 %v2064_v32, %v2063_v28  ;;  %v2077_v37 = vadd.f32 %v2076_v33, %v2075_v29 }
 0x1eb   :  { %v2060_v38 = vrot.slane %v2059_v34, 1  ;;  %v2072_v39 = vrot.slane %v2071_v35, 1 }
 0x1ec   :  { %v2066_v40 = vrot.slane %v2065_v36, 1  ;;  %v2078_v41 = vrot.slane %v2077_v37, 1 }
 0x1ed   :  { %v2061_v42 = vadd.f32 %v2060_v38, %v2059_v34  ;;  %v2073_v43 = vadd.f32 %v2072_v39, %v2071_v35  ;;  %v2051_v38 = vld [vmem:[%s6039_s25] sm:$0xf]  ;;  %s6058_s25 = sld [smem:[%s8618_s0 + %s7660_s22]]  }
 0x1ee   :  { %v2067_v44 = vadd.f32 %v2066_v40, %v2065_v36  ;;  %v2079_v45 = vadd.f32 %v2078_v41, %v2077_v37  ;;  %v2050_v37 = vld [vmem:[%s6038_s21] sm:$0xf]  ;;  %s6053_s21 = sld [smem:[%s8618_s0 + %s7659_s18]]  }
 0x1ef   :  { %v2080_v46 = vmul.f32 0.5, %v2061_v42  ;;  %v2082_v47 = vmul.f32 0.5, %v2073_v43  ;;  %v2140_v39 = vrot.slane %v2050_v37, %v7996_v51  ;;  %v2148_v41 = vrot.slane %v2050_v37, %v7999_v52 }
 0x1f0   :  { %v2081_v48 = vmul.f32 0.5, %v2067_v44  ;;  %v2083_v49 = vmul.f32 0.5, %v2079_v45  ;;  %v2144_v44 = vrot.slane %v2050_v37, %v8002_v54 }
 0x1f1   :  { %v2084_v53 = vsub.f32 %v2046_v12, %v2080_v46  ;;  %v2086_v56 = vsub.f32 %v2048_v13, %v2082_v47  ;;  %v2165_v47 = vrot.slane %v2051_v38, %v7996_v51 }
 0x1f2   :  { %v8019_v57 = vsub.f32 %v2047_v18, %v2081_v48  ;;  %v8021_v58 = vsub.f32 %v2049_v19, %v2083_v49  ;;  %v2152_v48 = vrot.slane %v2050_v37, %v8005_v55  ;;  %v2173_v49 = vrot.slane %v2051_v38, %v7999_v52  ;;  %v7428_v37 = vld [vmem:[%s7955_s13 + $0x1e0] ss:$8 sps:$4 sm:$0xff]  }
 0x1f3   :  { %v2088_v59 = vmul.f32 %v2084_v53, %v2084_v53  ;;  %v2090_v60 = vmul.f32 %v2086_v56, %v2086_v56 }
 0x1f4   :  { %v2089_v61 = vmul.f32 %v8019_v57, %v8019_v57  ;;  %v2091_v62 = vmul.f32 %v8021_v58, %v8021_v58 }
 0x1f5   :  { %v2092_v63 = vmul.f32 %v8013_v3, %v2088_v59  ;;  %v2094_v0 = vmul.f32 %v8013_v3, %v2090_v60 }
 0x1f6   :  { %v2093_v1 = vmul.f32 %v8013_v3, %v2089_v61  ;;  %v2095_v4 = vmul.f32 %v8013_v3, %v2091_v62  ;;  %v2169_v61 = vrot.slane %v2051_v38, %v8002_v54 }
 0x1f7   :  { %v2096_v5 = vrot.slane %v2092_v63, 4  ;;  %v2108_v6 = vrot.slane %v2094_v0, 4 }
 0x1f8   :  { %v2102_v7 = vrot.slane %v2093_v1, 4  ;;  %v2114_v8 = vrot.slane %v2095_v4, 4 }
 0x1f9   :  { %v2097_v9 = vadd.f32 %v2096_v5, %v2092_v63  ;;  %v2109_v10 = vadd.f32 %v2108_v6, %v2094_v0  ;;  %v2177_v63 = vrot.slane %v2051_v38, %v8005_v55  ;;  %v7433_v38 = vld [vmem:[%s7955_s13 + $0x1f4] ss:$8 sps:$4 sm:$0xff]  }
 0x1fa   :  { %v2103_v11 = vadd.f32 %v2102_v7, %v2093_v1  ;;  %v2115_v12 = vadd.f32 %v2114_v8, %v2095_v4  ;;  %v7386_v8 = vld [vmem:[%s7955_s13 + $0x100] ss:$8 sps:$4 sm:$0xff]  }
 0x1fb   :  { %v2098_v13 = vrot.slane %v2097_v9, 2  ;;  %v2110_v14 = vrot.slane %v2109_v10, 2 }
 0x1fc   :  { %v2104_v15 = vrot.slane %v2103_v11, 2  ;;  %v2116_v16 = vrot.slane %v2115_v12, 2 }
 0x1fd   :  { %v2099_v17 = vadd.f32 %v2098_v13, %v2097_v9  ;;  %v2111_v18 = vadd.f32 %v2110_v14, %v2109_v10  ;;  %v7391_v10 = vld [vmem:[%s7955_s13 + $0x114] ss:$8 sps:$4 sm:$0xff]   ;;  %v7392_v13 = vld [vmem:[%s7955_s13 + $0x120] ss:$8 sps:$4 sm:$0xff]  }
 0x1fe   :  { %v2105_v19 = vadd.f32 %v2104_v15, %v2103_v11  ;;  %v2117_v20 = vadd.f32 %v2116_v16, %v2115_v12  ;;  %v7389_v11 = vld [vmem:[%s7955_s13 + $0x110] ss:$8 sps:$4 sm:$0xff]   ;;  %v7394_v12 = vld [vmem:[%s7955_s13 + $0x124] ss:$8 sps:$4 sm:$0xff]   ;;  %v7397_v14 = vld [vmem:[%s7955_s13 + $0x134] ss:$8 sps:$4 sm:$0xff]  }
 0x1ff   :  { %v2100_v21 = vrot.slane %v2099_v17, 1  ;;  %v2112_v22 = vrot.slane %v2111_v18, 1  ;;  %v7395_v15 = vld [vmem:[%s7955_s13 + $0x130] ss:$8 sps:$4 sm:$0xff]   ;;  %v7400_v16 = vld [vmem:[%s7955_s13 + $0x144] ss:$8 sps:$4 sm:$0xff]  }
 0x200   :  { %v2106_v23 = vrot.slane %v2105_v19, 1  ;;  %v2118_v24 = vrot.slane %v2117_v20, 1 }
 0x201   :  { %v2101_v25 = vadd.f32 %v2100_v21, %v2099_v17  ;;  %v2113_v26 = vadd.f32 %v2112_v22, %v2111_v18  ;;  %v7398_v17 = vld [vmem:[%s7955_s13 + $0x140] ss:$8 sps:$4 sm:$0xff]   ;;  %v7403_v18 = vld [vmem:[%s7955_s13 + $0x154] ss:$8 sps:$4 sm:$0xff]  }
 0x202   :  { %v2107_v27 = vadd.f32 %v2106_v23, %v2105_v19  ;;  %v2119_v28 = vadd.f32 %v2118_v24, %v2117_v20  ;;  %v7401_v19 = vld [vmem:[%s7955_s13 + $0x150] ss:$8 sps:$4 sm:$0xff]   ;;  %v7406_v20 = vld [vmem:[%s7955_s13 + $0x164] ss:$8 sps:$4 sm:$0xff]   ;;  %v7404_v21 = vld [vmem:[%s7955_s13 + $0x160] ss:$8 sps:$4 sm:$0xff]  }
 0x203   :  { %v2120_v29 = vmul.f32 0.5, %v2101_v25  ;;  %v2122_v30 = vmul.f32 0.5, %v2113_v26  ;;  %v7409_v22 = vld [vmem:[%s7955_s13 + $0x174] ss:$8 sps:$4 sm:$0xff]   ;;  %v7407_v23 = vld [vmem:[%s7955_s13 + $0x170] ss:$8 sps:$4 sm:$0xff]  }
 0x204   :  { %v2121_v31 = vmul.f32 0.5, %v2107_v27  ;;  %v2123_v32 = vmul.f32 0.5, %v2119_v28  ;;  %v7412_v24 = vld [vmem:[%s7955_s13 + $0x184] ss:$8 sps:$4 sm:$0xff]   ;;  %v7410_v25 = vld [vmem:[%s7955_s13 + $0x180] ss:$8 sps:$4 sm:$0xff]  }
 0x205   :  { %v2124_v33 = vadd.f32 1e-05, %v2120_v29  ;;  %v2126_v34 = vadd.f32 1e-05, %v2122_v30  ;;  %v7415_v26 = vld [vmem:[%s7955_s13 + $0x194] ss:$8 sps:$4 sm:$0xff]  }
 0x206   :  { %v2125_v35 = vadd.f32 1e-05, %v2121_v31  ;;  %v2127_v36 = vadd.f32 1e-05, %v2123_v32  ;;  %v7413_v27 = vld [vmem:[%s7955_s13 + $0x190] ss:$8 sps:$4 sm:$0xff]  }
 0x207   :  { %7586 = vrsqrt.f32 %v2124_v33  ;;  %v7418_v28 = vld [vmem:[%s7955_s13 + $0x1a4] ss:$8 sps:$4 sm:$0xff]   ;;  %v7416_v29 = vld [vmem:[%s7955_s13 + $0x1a0] ss:$8 sps:$4 sm:$0xff]   ;;  %v7421_v30 = vld [vmem:[%s7955_s13 + $0x1b4] ss:$8 sps:$4 sm:$0xff]  }
 0x208   :  { %7588 = vrsqrt.f32 %v2126_v34  ;;  %v7419_v31 = vld [vmem:[%s7955_s13 + $0x1b0] ss:$8 sps:$4 sm:$0xff]   ;;  %v7424_v32 = vld [vmem:[%s7955_s13 + $0x1c4] ss:$8 sps:$4 sm:$0xff]   ;;  %v7422_v33 = vld [vmem:[%s7955_s13 + $0x1c0] ss:$8 sps:$4 sm:$0xff]  }
 0x209   :  { %7590 = vrsqrt.f32 %v2125_v35  ;;  %v7427_v34 = vld [vmem:[%s7955_s13 + $0x1d4] ss:$8 sps:$4 sm:$0xff]   ;;  %v7425_v35 = vld [vmem:[%s7955_s13 + $0x1d0] ss:$8 sps:$4 sm:$0xff]  }
 0x20a   :  { %7592 = vrsqrt.f32 %v2127_v36  ;;  %v7430_v36 = vld [vmem:[%s7955_s13 + $0x1e4] ss:$8 sps:$4 sm:$0xff]  }
 0x211   :  { %v7587_v40 = vpop.eup %7586 }
 0x212   :  { %v7589_v42 = vpop.eup %7588  ;;  %v2132_v43 = vmul.f32 %v7587_v40, %v2084_v53 }
 0x213   :  { %v7591_v45 = vpop.eup %7590  ;;  %v2134_v46 = vmul.f32 %v7589_v42, %v2086_v56  ;;  %v7435_v42 = vld [vmem:[%s6044_s29] sm:$0xff]  }
 0x214   :  { %v7593_v59 = vpop.eup %7592  ;;  %v2133_v60 = vmul.f32 %v7591_v45, %v8019_v57  ;;  %v2157_v62 = vmul.f32 %v2140_v39, %v2132_v43  ;;  %v7431_v39 = vld [vmem:[%s7955_s13 + $0x1f0] ss:$8 sps:$4 sm:$0xff]   ;;  %v7436_v43 = vld [vmem:[%s6044_s29 + $0x48] sm:$0xff]   ;;  %s6054_s13 = sld [smem:[%s8618_s0 + %s7657_s10]]  }
 0x215   :  { %v2135_v53 = vmul.f32 %v7593_v59, %v8021_v58  ;;  %v2159_v0 = vmul.f32 %v2148_v41, %v2134_v46  ;;  %v7434_v41 = vld [vmem:[%s6044_s29 + $0x40] sm:$0xff]   ;;  %v7438_v45 = vld [vmem:[%s6044_s29 + $0x50] sm:$0xff]  }
 0x216   :  { %v2158_v56 = vmul.f32 %v2144_v44, %v2133_v60  ;;  %v2182_v1 = vadd.f32 %v2165_v47, %v2157_v62  ;;  %6768 = vmatprep.subr.bf16.mxu1 %v7434_v41  ;;  %v7437_v44 = vld [vmem:[%s6044_s29 + $0x8] sm:$0xff]   ;;  %v7439_v46 = vld [vmem:[%s6044_s29 + $0x10] sm:$0xff]   ;;  %v7440_v47 = vld [vmem:[%s6044_s29 + $0x58] sm:$0xff]  }
 0x217   :  { %v2160_v4 = vmul.f32 %v2152_v48, %v2135_v53  ;;  %v8047_v5 = vadd.f32 %v2173_v49, %v2159_v0  ;;  %6769 = vmatpush3.bf16.msra.mxu1 %v7435_v42  ;;  %v7441_v48 = vld [vmem:[%s6044_s29 + $0x18] sm:$0xff]   ;;  %v7442_v49 = vld [vmem:[%s6044_s29 + $0x60] sm:$0xff]   ;;  %v7444_v60 = vld [vmem:[%s6044_s29 + $0x68] sm:$0xff]  }
 0x218   :  { %v2183_v6 = vadd.f32 %v2169_v61, %v2158_v56  ;;  %v2251_v9 = vpack.c.bf16 %v2182_v1, %v2182_v1  ;;  %6770 = vmatprep.subr.bf16.mxu1 %v7436_v43  ;;  %v7443_v59 = vld [vmem:[%s6044_s29 + $0x20] sm:$0xff]   ;;  %v7445_v61 = vld [vmem:[%s6044_s29 + $0x28] sm:$0xff]   ;;  %v7446_v62 = vld [vmem:[%s6044_s29 + $0x70] sm:$0xff]  }
 0x219   :  { %v2185_v7 = vadd.f32 %v2177_v63, %v2160_v4  ;;  %v2253_v40 = vpack.c.bf16 %v8047_v5, %v8047_v5  ;;  %v7447_v53 = vld [vmem:[%s6044_s29 + $0x30] sm:$0xff]   ;;  %v7448_v63 = vld [vmem:[%s6044_s29 + $0x78] sm:$0xff]   ;;  %v2250_v56 = vld [vmem:[%s6041_s3] sm:$0x3]  ;;  %s6056_s3 = sld [smem:[%s8618_s0 + %s7663_s30]]  }
 0x21a   :  { %v2252_v57 = vpack.c.bf16 %v2183_v6, %v2183_v6  ;;  %v7449_v0 = vld [vmem:[%s6044_s29 + $0x38] sm:$0xff]   ;;  %v2259_v1 = vrot.slane %v2250_v56, %v7996_v51  ;;  %v2263_v4 = vrot.slane %v2250_v56, %v8002_v54  ;;  %s6055_s29 = sld [smem:[%s8618_s0 + %s7662_s26]]  }
 0x21b   :  { %v2254_v58 = vpack.c.bf16 %v2185_v7, %v2185_v7  ;;  %6771 = vmatpush3.bf16.msra.mxu1 %v7437_v44 }
 0x21c   :  { %2618 = vmatprep.mubr.bf16.mxu0 %v2252_v57  ;;  %6772 = vmatprep.subr.bf16.mxu1 %v7438_v45 }
 0x21d   :  { %2619 = vmatmul.mubr.bf16.vlgmr.msra.gmra.mrb[4].mxu0 %v2251_v9 }
 0x21e   :  { %2628 = vmatpush1.bf16.msra.mxu0 %v7386_v8  ;;  %2659 = vmatprep.mubr.bf16.mxu0 %v2254_v58 }
 0x21f   :  { %2629 = vmatprep.subr.bf16.mxu0 %v7391_v10  ;;  %6773 = vmatpush3.bf16.msra.mxu1 %v7439_v46 }
 0x220   :  { %6774 = vmatprep.subr.bf16.mxu1 %v7440_v47 }
 0x222   :  { %2630 = vmatpush1.bf16.msra.mxu0 %v7389_v11 }
 0x223   :  { %2631 = vmatprep.subr.bf16.mxu0 %v7394_v12  ;;  %6775 = vmatpush3.bf16.msra.mxu1 %v7441_v48 }
 0x224   :  { %6776 = vmatprep.subr.bf16.mxu1 %v7442_v49 }
 0x226   :  { %2632 = vmatpush1.bf16.msra.mxu0 %v7392_v13 }
 0x227   :  { %2633 = vmatprep.subr.bf16.mxu0 %v7397_v14  ;;  %6777 = vmatpush3.bf16.msra.mxu1 %v7443_v59 }
 0x228   :  { %6778 = vmatprep.subr.bf16.mxu1 %v7444_v60  ;;  %v2674_v60 = vld [vmem:[%s6042_s7] sm:$0x3]  ;;  %s6057_s7 = sld [smem:[%s8618_s0 + %s7664_s4]]  }
 0x22a   :  { %2634 = vmatpush1.bf16.msra.mxu0 %v7395_v15 }
 0x22b   :  { %2635 = vmatprep.subr.bf16.mxu0 %v7400_v16  ;;  %6779 = vmatpush3.bf16.msra.mxu1 %v7445_v61  ;;  %v2675_v61 = vld [vmem:[%s6043_s11] sm:$0x3]  ;;  %s8186_s11 = sld [smem:[%s8618_s0 + %s7665_s8]]  }
 0x22c   :  { %6780 = vmatprep.subr.bf16.mxu1 %v7446_v62  ;;  %v2722_v62 = vrot.slane %v2674_v60, %v7996_v51 }
 0x22e   :  { %2636 = vmatpush1.bf16.msra.mxu0 %v7398_v17 }
 0x22f   :  { %2637 = vmatprep.subr.bf16.mxu0 %v7403_v18  ;;  %6781 = vmatpush3.bf16.msra.mxu1 %v7447_v53 }
 0x230   :  { %6782 = vmatprep.subr.bf16.mxu1 %v7448_v63  ;;  %v2726_v63 = vrot.slane %v2674_v60, %v8002_v54 }
 0x232   :  { %2638 = vmatpush1.bf16.msra.mxu0 %v7401_v19 }
 0x233   :  { %2639 = vmatprep.subr.bf16.mxu0 %v7406_v20  ;;  %6783 = vmatpush3.bf16.msra.mxu1 %v7449_v0 }
 0x234   :  { %6811 = vmatprep.subr.bf16.mxu1 %v7641_v2 }
 0x236   :  { %2640 = vmatpush1.bf16.msra.mxu0 %v7404_v21 }
 0x237   :  { %2641 = vmatprep.subr.bf16.mxu0 %v7409_v22 }
 0x23a   :  { %2642 = vmatpush1.bf16.msra.mxu0 %v7407_v23 }
 0x23b   :  { %2643 = vmatprep.subr.bf16.mxu0 %v7412_v24 }
 0x23e   :  { %2644 = vmatpush1.bf16.msra.mxu0 %v7410_v25 }
 0x23f   :  { %2645 = vmatprep.subr.bf16.mxu0 %v7415_v26 }
 0x242   :  { %2646 = vmatpush1.bf16.msra.mxu0 %v7413_v27 }
 0x243   :  { %2647 = vmatprep.subr.bf16.mxu0 %v7418_v28 }
 0x246   :  { %2648 = vmatpush1.bf16.msra.mxu0 %v7416_v29 }
 0x247   :  { %2649 = vmatprep.subr.bf16.mxu0 %v7421_v30 }
 0x24a   :  { %2650 = vmatpush1.bf16.msra.mxu0 %v7419_v31 }
 0x24b   :  { %2651 = vmatprep.subr.bf16.mxu0 %v7424_v32 }
 0x24e   :  { %2652 = vmatpush1.bf16.msra.mxu0 %v7422_v33 }
 0x24f   :  { %2653 = vmatprep.subr.bf16.mxu0 %v7427_v34 }
 0x252   :  { %2654 = vmatpush1.bf16.msra.mxu0 %v7425_v35 }
 0x253   :  { %2655 = vmatprep.subr.bf16.mxu0 %v7430_v36 }
 0x256   :  { %2656 = vmatpush1.bf16.msra.mxu0 %v7428_v37 }
 0x257   :  { %2657 = vmatprep.subr.bf16.mxu0 %v7433_v38 }
 0x25a   :  { %2658 = vmatpush1.bf16.msra.mxu0 %v7431_v39 }
 0x25d   :  { %2660 = vmatmul.mubr.bf16.vlgmr.msra.gmra.mrb[4].mxu0 %v2253_v40 }
 0x330   :  { %v2661_v5 = vpop.f32.mrb[4].mxu0 }
 0x331   :  { %v6865_v6 = vadd.f32 %v2661_v5, %v2259_v1  ;;  %v2663_v7 = vpop.f32.mrb[5].mxu0  ;;  %v2735_v1 = vrot.slane %v2675_v61, %v7996_v51  ;;  %v2739_v5 = vrot.slane %v2675_v61, %v8002_v54  ;;  %v7458_v61 = vld [vmem:[%s8121_s19] sm:$0xff]  }
 0x332   :  { %v6866_v57 = vadd.f32 %v2663_v7, %v2263_v4  ;;  %v2665_v8 = vpop.f32.mrb[6].mxu0 }
 0x333   :  { %vm2668_vm5 = vcmp.ge.f32.partialorder %v6865_v6, 0.0  ;;  %v2670_v9 = vmul.f32 0.2, %v6865_v6  ;;  %v2666_v10 = vpop.f32.mrb[7].mxu0 }
 0x334   :  { %vm2669_vm6 = vcmp.ge.f32.partialorder %v6866_v57, 0.0  ;;  %v2671_v58 = vmul.f32 0.2, %v6866_v57 }
 0x335   :  { %v2672_v11 = vsel %vm2668_vm5, %v6865_v6, %v2670_v9 }
 0x336   :  { %v2676_v12 = vmul.f32 %v8013_v3, %v2672_v11  ;;  %v2673_v13 = vsel %vm2669_vm6, %v6866_v57, %v2671_v58  ;;  %v7450_v58 = vld [vmem:[%s6048_s15] sm:$0xff]  }
 0x337   :  { %v2677_v14 = vmul.f32 %v8013_v3, %v2673_v13 }
 0x338   :  { %v2678_v15 = vrot.slane %v2676_v12, 4 }
 0x339   :  { %v2684_v16 = vrot.slane %v2677_v14, 4 }
 0x33a   :  { %v2679_v17 = vadd.f32 %v2678_v15, %v2676_v12  ;;  %v7452_v12 = vld [vmem:[%s6048_s15 + $0x10] sm:$0xff]   ;;  %v7455_v15 = vld [vmem:[%s6048_s15 + $0x28] sm:$0xff]  }
 0x33b   :  { %v2685_v18 = vadd.f32 %v2684_v16, %v2677_v14  ;;  %v7454_v14 = vld [vmem:[%s6048_s15 + $0x20] sm:$0xff]   ;;  %v7456_v16 = vld [vmem:[%s6048_s15 + $0x30] sm:$0xff]  }
 0x33c   :  { %v2680_v19 = vrot.slane %v2679_v17, 2 }
 0x33d   :  { %v2686_v20 = vrot.slane %v2685_v18, 2 }
 0x33e   :  { %v2681_v21 = vadd.f32 %v2680_v19, %v2679_v17  ;;  %v7457_v17 = vld [vmem:[%s6048_s15 + $0x38] sm:$0xff]   ;;  %v6388_v19 = vld [vmem:[%s6045_s23] ss:$0 sm:$0xff]  ;;  %s6060_s23 = sld [smem:[%s8618_s0 + %s7668_s20]]  }
 0x33f   :  { %v2687_v22 = vadd.f32 %v2686_v20, %v2685_v18 }
 0x340   :  { %v2682_v23 = vrot.slane %v2681_v21, 1 }
 0x341   :  { %v2688_v24 = vrot.slane %v2687_v22, 1 }
 0x342   :  { %v2683_v25 = vadd.f32 %v2682_v23, %v2681_v21 }
 0x343   :  { %v2689_v26 = vadd.f32 %v2688_v24, %v2687_v22 }
 0x344   :  { %v2690_v27 = vmul.f32 0.5, %v2683_v25 }
 0x345   :  { %v2691_v28 = vmul.f32 0.5, %v2689_v26 }
 0x346   :  { %v2692_v29 = vsub.f32 %v2672_v11, %v2690_v27  ;;  %v7451_v11 = vld [vmem:[%s6048_s15 + $0x8] sm:$0xff]  }
 0x347   :  { %v2693_v30 = vsub.f32 %v2673_v13, %v2691_v28  ;;  %v7453_v13 = vld [vmem:[%s6048_s15 + $0x18] sm:$0xff]   ;;  %s8255_s15 = sld [smem:[%s8618_s0 + %s7666_s12]]  }
 0x348   :  { %v2694_v31 = vmul.f32 %v2692_v29, %v2692_v29 }
 0x349   :  { %v2695_v32 = vmul.f32 %v2693_v30, %v2693_v30 }
 0x34a   :  { %v2696_v33 = vmul.f32 %v8013_v3, %v2694_v31 }
 0x34b   :  { %v2697_v34 = vmul.f32 %v8013_v3, %v2695_v32 }
 0x34c   :  { %v2698_v35 = vrot.slane %v2696_v33, 4 }
 0x34d   :  { %v2704_v36 = vrot.slane %v2697_v34, 4 }
 0x34e   :  { %v2699_v37 = vadd.f32 %v2698_v35, %v2696_v33 }
 0x34f   :  { %v2705_v38 = vadd.f32 %v2704_v36, %v2697_v34 }
 0x350   :  { %v2700_v39 = vrot.slane %v2699_v37, 2 }
 0x351   :  { %v2706_v40 = vrot.slane %v2705_v38, 2 }
 0x352   :  { %v2701_v41 = vadd.f32 %v2700_v39, %v2699_v37 }
 0x353   :  { %v2707_v42 = vadd.f32 %v2706_v40, %v2705_v38 }
 0x354   :  { %v2702_v43 = vrot.slane %v2701_v41, 1 }
 0x355   :  { %v2708_v44 = vrot.slane %v2707_v42, 1 }
 0x356   :  { %v2703_v45 = vadd.f32 %v2702_v43, %v2701_v41 }
 0x357   :  { %v2709_v46 = vadd.f32 %v2708_v44, %v2707_v42 }
 0x358   :  { %v2710_v47 = vmul.f32 0.5, %v2703_v45 }
 0x359   :  { %v2711_v48 = vmul.f32 0.5, %v2709_v46 }
 0x35a   :  { %v2712_v49 = vadd.f32 1e-05, %v2710_v47  ;;  %v6405_v47 = vld [vmem:[%s6046_s27] ss:$0 sm:$0xff]  ;;  %s6061_s27 = sld [smem:[%s8618_s0 + %s7669_s24]]  }
 0x35b   :  { %v2713_v59 = vadd.f32 1e-05, %v2711_v48 }
 0x35c   :  { %7594 = vrsqrt.f32 %v2712_v49  ;;  %v6406_v49 = vld [vmem:[%s6047_s1] ss:$0 sm:$0xff]  ;;  %s6063_s1 = sld [smem:[%s8618_s0 + %s7670_s28]]  }
 0x35d   :  { %7596 = vrsqrt.f32 %v2713_v59 }
 0x366   :  { %v7595_v53 = vpop.eup %7594 }
 0x367   :  { %v7597_v0 = vpop.eup %7596  ;;  %v2716_v56 = vmul.f32 %v7595_v53, %v2692_v29  ;;  %v7459_v53 = vld [vmem:[%s8121_s19 + $0x8] sm:$0xff]  }
 0x368   :  { %v2717_v4 = vmul.f32 %v7597_v0, %v2693_v30  ;;  %v7461_v0 = vld [vmem:[%s8121_s19 + $0x18] sm:$0xff]  }
 0x369   :  { %v2729_v6 = vmul.f32 %v2722_v62, %v2716_v56  ;;  %v6407_v56 = vld [vmem:[%s6049_s5] ss:$0 sm:$0xff]  ;;  %s6065_s5 = sld [smem:[%s8618_s0 + %s7671_s2]]  }
 0x36a   :  { %v2730_v7 = vmul.f32 %v2726_v63, %v2717_v4  ;;  %v7460_v63 = vld [vmem:[%s8121_s19 + $0x10] sm:$0xff]   ;;  %s6059_s19 = sld [smem:[%s8618_s0 + %s7667_s16]]  }
 0x36b   :  { %v2742_v57 = vadd.f32 %v2735_v1, %v2729_v6  ;;  %v7656_v1 = vmov 65535  }
 0x36c   :  { %v2743_v8 = vadd.f32 %v2739_v5, %v2730_v7  ;;  %v3175_v4 = vsel %vm3173_vm9, 4294967295, %v7656_v1 }
 0x36d   :  { %v2777_v10 = vpack.c.bf16 %v2742_v57, %v2742_v57 }
 0x36e   :  { %v2778_v9 = vpack.c.bf16 %v2743_v8, %v2743_v8  ;;  %v3160_v8 = vld [vmem:[%s6052_s9] sm:$0x3]  ;;  %s8604_s9 = sld [smem:[%s8618_s0 + %s7672_s6]]  }
 0x370   :  { %2913 = vmatprep.mubr.bf16.mxu1 %v2778_v9  ;;  %v3176_v9 = vsel %vm3174_vm10, %v3175_v4, 0 }
 0x371   :  { %2914 = vmatmul.mubr.bf16.vlgmr.msra.gmra.mrb[4].mxu1 %v2777_v10 }
 0x372   :  { %6812 = vmatpush3.bf16.msra.mxu1 %v7450_v58  ;;  %6827 = vmatprep.mubr.msk.bf16.mxu1 %vm7649_vm7, %v7641_v2 }
 0x373   :  { %6813 = vmatprep.subr.bf16.mxu1 %v7641_v2 }
 0x376   :  { %6814 = vmatpush3.bf16.msra.mxu1 %v7451_v11 }
 0x377   :  { %6815 = vmatprep.subr.bf16.mxu1 %v7641_v2 }
 0x37a   :  { %6816 = vmatpush3.bf16.msra.mxu1 %v7452_v12  ;;  %v3178_v12 = vand.u32 %v3176_v9, %v3160_v8 }
 0x37b   :  { %6817 = vmatprep.subr.bf16.mxu1 %v7641_v2 }
 0x37e   :  { %6818 = vmatpush3.bf16.msra.mxu1 %v7453_v13 }
 0x37f   :  { %6819 = vmatprep.subr.bf16.mxu1 %v7641_v2 }
 0x382   :  { %6820 = vmatpush3.bf16.msra.mxu1 %v7454_v14  ;;  %v6416_v14 = vld [vmem:[%s6051_s17] ss:$0 sm:$0xff] }
 0x383   :  { %6821 = vmatprep.subr.bf16.mxu1 %v7641_v2 }
 0x386   :  { %6822 = vmatpush3.bf16.msra.mxu1 %v7455_v15 }
 0x387   :  { %6823 = vmatprep.subr.bf16.mxu1 %v7641_v2 }
 0x38a   :  { %6824 = vmatpush3.bf16.msra.mxu1 %v7456_v16 }
 0x38b   :  { %6825 = vmatprep.subr.bf16.mxu1 %v7641_v2 }
 0x38e   :  { %6826 = vmatpush3.bf16.msra.mxu1 %v7457_v17 }
 0x38f   :  { %6831 = vmatprep.subr.bf16.mxu1 %v7641_v2 }
 0x444   :  { %v6784_v18 = vpop.f32.mrb[4].mxu1 }
 0x445   :  { %v6785_v20 = vpop.f32.mrb[5].mxu1 }
 0x446   :  { %v6786_v21 = vadd.f32 %v6785_v20, %v6784_v18  ;;  %v6787_v22 = vpop.f32.mrb[6].mxu1 }
 0x447   :  { %v6788_v23 = vpop.f32.mrb[7].mxu1  ;;  %v7463_v22 = vld [vmem:[%s6054_s13 + $0x8] sm:$0xff]  }
 0x448   :  { %v2916_v24 = vadd.f32 %v6786_v21, %v6388_v19  ;;  %v7462_v19 = vld [vmem:[%s6054_s13] sm:$0xff]   ;;  %v7464_v23 = vld [vmem:[%s6054_s13 + $0x10] sm:$0xff]  }
 0x44a   :  { %vm2921_vm8 = vcmp.ge.f32.partialorder %v2916_v24, 0.0  ;;  %v2922_v25 = vmul.f32 0.2, %v2916_v24 }
 0x44c   :  { %v2923_v26 = vsel %vm2921_vm8, %v2916_v24, %v2922_v25  ;;  %v7465_v24 = vld [vmem:[%s6054_s13 + $0x18] sm:$0xff]   ;;  %v6422_v25 = vld [vmem:[%s6053_s21] ss:$0 sm:$0xff] }
 0x44d   :  { %v2926_v27 = vmul.f32 %v8013_v3, %v2923_v26 }
 0x44f   :  { %v2927_v28 = vrot.slane %v2926_v27, 4 }
 0x451   :  { %v2928_v29 = vadd.f32 %v2927_v28, %v2926_v27 }
 0x453   :  { %v2929_v30 = vrot.slane %v2928_v29, 2 }
 0x455   :  { %v2930_v31 = vadd.f32 %v2929_v30, %v2928_v29 }
 0x457   :  { %v2931_v32 = vrot.slane %v2930_v31, 1 }
 0x459   :  { %v2932_v33 = vadd.f32 %v2931_v32, %v2930_v31 }
 0x45b   :  { %v2933_v34 = vmul.f32 0.5, %v2932_v33 }
 0x45d   :  { %v2934_v35 = vsub.f32 %v2923_v26, %v2933_v34  ;;  %v7466_v34 = vld [vmem:[%s6058_s25] ss:$8 sps:$4 sm:$0xff]  }
 0x45f   :  { %v2935_v36 = vmul.f32 %v2934_v35, %v2934_v35 }
 0x461   :  { %v2936_v37 = vmul.f32 %v8013_v3, %v2935_v36  ;;  %v7469_v36 = vld [vmem:[%s6058_s25 + $0x10] ss:$8 sps:$4 sm:$0xff]  }
 0x463   :  { %v2937_v38 = vrot.slane %v2936_v37, 4 }
 0x465   :  { %v2938_v39 = vadd.f32 %v2937_v38, %v2936_v37  ;;  %v7474_v37 = vld [vmem:[%s6058_s25 + $0x24] ss:$8 sps:$4 sm:$0xff]   ;;  %v7472_v38 = vld [vmem:[%s6058_s25 + $0x20] ss:$8 sps:$4 sm:$0xff]  }
 0x467   :  { %v2939_v40 = vrot.slane %v2938_v39, 2 }
 0x469   :  { %v2940_v41 = vadd.f32 %v2939_v40, %v2938_v39  ;;  %v7477_v39 = vld [vmem:[%s6058_s25 + $0x34] ss:$8 sps:$4 sm:$0xff]   ;;  %v7475_v40 = vld [vmem:[%s6058_s25 + $0x30] ss:$8 sps:$4 sm:$0xff]  }
 0x46b   :  { %v2941_v42 = vrot.slane %v2940_v41, 1 }
 0x46d   :  { %v2942_v43 = vadd.f32 %v2941_v42, %v2940_v41  ;;  %v7480_v41 = vld [vmem:[%s6058_s25 + $0x44] ss:$8 sps:$4 sm:$0xff]   ;;  %v7478_v42 = vld [vmem:[%s6058_s25 + $0x40] ss:$8 sps:$4 sm:$0xff]  }
 0x46f   :  { %v2943_v44 = vmul.f32 0.5, %v2942_v43  ;;  %v7483_v43 = vld [vmem:[%s6058_s25 + $0x54] ss:$8 sps:$4 sm:$0xff]  }
 0x471   :  { %v2944_v45 = vadd.f32 1e-05, %v2943_v44  ;;  %v7481_v44 = vld [vmem:[%s6058_s25 + $0x50] ss:$8 sps:$4 sm:$0xff]  }
 0x473   :  { %7598 = vrsqrt.f32 %v2944_v45  ;;  %v7486_v45 = vld [vmem:[%s6058_s25 + $0x64] ss:$8 sps:$4 sm:$0xff]  }
 0x47d   :  { %v7599_v46 = vpop.eup %7598 }
 0x47e   :  { %v2946_v48 = vmul.f32 %v7599_v46, %v2934_v35  ;;  %v7471_v35 = vld [vmem:[%s6058_s25 + $0x14] ss:$8 sps:$4 sm:$0xff]   ;;  %v7484_v46 = vld [vmem:[%s6058_s25 + $0x60] ss:$8 sps:$4 sm:$0xff]  }
 0x480   :  { %v2953_v59 = vmul.f32 %v6405_v47, %v2946_v48  ;;  %v7489_v47 = vld [vmem:[%s6058_s25 + $0x74] ss:$8 sps:$4 sm:$0xff]   ;;  %v7487_v48 = vld [vmem:[%s6058_s25 + $0x70] ss:$8 sps:$4 sm:$0xff]  }
 0x482   :  { %v2960_v60 = vadd.f32 %v6406_v49, %v2953_v59  ;;  %v7661_v49 = vmov 0   ;;  %v6424_v59 = vld [vmem:[%s6055_s29] ss:$0 sm:$0xff] }
 0x484   :  { %v2978_v62 = vpack.c.bf16 %v2960_v60, %v2960_v60 }
 0x486   :  { %6828 = vmatmul.mubr.bf16.vlgmr.msra.gmra.mrb[8].mxu1 %v2978_v62 }
 0x487   :  { %6832 = vmatpush3.bf16.msra.mxu1 %v7458_v61  ;;  %6839 = vmatprep.mubr.msk.bf16.mxu1 %vm7649_vm7, %v7641_v2 }
 0x488   :  { %6833 = vmatprep.subr.bf16.mxu1 %v7641_v2 }
 0x48b   :  { %6834 = vmatpush3.bf16.msra.mxu1 %v7459_v53 }
 0x48c   :  { %6835 = vmatprep.subr.bf16.mxu1 %v7641_v2 }
 0x48f   :  { %6836 = vmatpush3.bf16.msra.mxu1 %v7460_v63 }
 0x490   :  { %6837 = vmatprep.subr.bf16.mxu1 %v7641_v2 }
 0x493   :  { %6838 = vmatpush3.bf16.msra.mxu1 %v7461_v0 }
 0x494   :  { %6843 = vmatprep.subr.bf16.mxu1 %v7641_v2 }
 0x559   :  { %v3067_v5 = vpop.f32.mrb[8].mxu1 }
 0x55a   :  { %v3068_v6 = vadd.f32 %v6407_v56, %v3067_v5  ;;  %v6829_v7 = vpop.f32.mrb[9].mxu1 }
 0x55b   :  { %v3070_v57 = vpop.f32.mrb[10].mxu1 }
 0x55c   :  { %vm3073_vm11 = vcmp.ge.f32.partialorder %v3068_v6, 0.0  ;;  %v3074_v10 = vmul.f32 0.2, %v3068_v6  ;;  %v6830_v58 = vpop.f32.mrb[11].mxu1 }
 0x55e   :  { %v3075_v11 = vsel %vm3073_vm11, %v3068_v6, %v3074_v10 }
 0x55f   :  { %v3085_v13 = vpack.c.bf16 %v3075_v11, %v3075_v11 }
 0x561   :  { %6840 = vmatmul.mubr.msk.bf16.vlgmr.msra.gmra.mrb[12].mxu1 %vm3116_vm12, %v3085_v13 }
 0x562   :  { %6844 = vmatpush3.bf16.msra.mxu1 %v3178_v12  ;;  %6845 = vmatprep.mubr.msk.bf16.mxu1 %vm7649_vm7, %v7641_v2 }
 0x563   :  { %6849 = vmatprep.subr.bf16.mxu1 %v7641_v2 }
 0x634   :  { %v3154_v15 = vpop.f32.mrb[12].mxu1 }
 0x635   :  { %v3155_v16 = vadd.f32 %v6416_v14, %v3154_v15  ;;  %v6841_v17 = vpop.f32.mrb[13].mxu1 }
 0x636   :  { %v3157_v18 = vpop.f32.mrb[14].mxu1 }
 0x637   :  { %v3162_v20 = vpack.c.bf16 %v3155_v16, %v3155_v16  ;;  %v6842_v21 = vpop.f32.mrb[15].mxu1 }
 0x638   :  { %v6430_v21 = vld [vmem:[%s6056_s3] ss:$0 sm:$0xff] }
 0x639   :  { %6846 = vmatmul.mubr.msk.bf16.vlgmr.msra.gmra.mrb[16].mxu1 %vm3169_vm13, %v3162_v20 }
 0x63a   :  { %6850 = vmatpush3.bf16.msra.mxu1 %v7462_v19  ;;  %6857 = vmatprep.mubr.msk.bf16.mxu1 %vm7649_vm7, %v7641_v2 }
 0x63b   :  { %6851 = vmatprep.subr.bf16.mxu1 %v7641_v2 }
 0x63e   :  { %6852 = vmatpush3.bf16.msra.mxu1 %v7463_v22 }
 0x63f   :  { %6853 = vmatprep.subr.bf16.mxu1 %v7641_v2 }
 0x642   :  { %6854 = vmatpush3.bf16.msra.mxu1 %v7464_v23  ;;  %v6431_v23 = vld [vmem:[%s6057_s7] ss:$0 sm:$0xff] }
 0x643   :  { %6855 = vmatprep.subr.bf16.mxu1 %v7641_v2  ;;  %v7468_v2 = vld [vmem:[%s6058_s25 + $0x4] ss:$8 sps:$4 sm:$0xff]  }
 0x646   :  { %6856 = vmatpush3.bf16.msra.mxu1 %v7465_v24 }
 0x647   :  { %3455 = vmatprep.subr.bf16.mxu1 %v7468_v2  ;;  %v7499_v2 = vld [vmem:[%s8186_s11 + $0x28] ss:$16 sps:$4 sm:$0xff]  }
 0x70c   :  { %v3214_v26 = vpop.f32.mrb[16].mxu1 }
 0x70d   :  { %v3215_v27 = vadd.f32 %v6422_v25, %v3214_v26  ;;  %v6847_v28 = vpop.f32.mrb[17].mxu1 }
 0x70e   :  { %v3217_v29 = vpop.f32.mrb[18].mxu1  ;;  %v7490_v28 = vld [vmem:[%s8186_s11] ss:$16 sps:$4 sm:$0xff]  }
 0x70f   :  { %vm3220_vm14 = vcmp.ge.f32.partialorder %v3215_v27, 0.0  ;;  %v3221_v30 = vmul.f32 0.2, %v3215_v27  ;;  %v6848_v31 = vpop.f32.mrb[19].mxu1  ;;  %v7493_v29 = vld [vmem:[%s8186_s11 + $0x8] ss:$16 sps:$4 sm:$0xff]  }
 0x710   :  { %v7498_v31 = vld [vmem:[%s8186_s11 + $0x24] ss:$16 sps:$4 sm:$0xff]  }
 0x711   :  { %v3222_v32 = vsel %vm3220_vm14, %v3215_v27, %v3221_v30  ;;  %v7492_v27 = vld [vmem:[%s8186_s11 + $0x4] ss:$16 sps:$4 sm:$0xff]   ;;  %v7495_v30 = vld [vmem:[%s8186_s11 + $0xc] ss:$16 sps:$4 sm:$0xff]  }
 0x712   :  { %v3232_v33 = vpack.c.bf16 %v3222_v32, %v3222_v32  ;;  %3980 = vmatprep.subr.bf16.mxu0 %v7492_v27  ;;  %v7501_v32 = vld [vmem:[%s8186_s11 + $0x2c] ss:$16 sps:$4 sm:$0xff]   ;;  %v7574_v27 = vld [vmem:[%s8186_s11 + $0x1c0] ss:$16 sps:$4 sm:$0xff]  }
 0x713   :  { %3981 = vmatpush1.bf16.msra.mxu0 %v7490_v28  ;;  %v7577_v28 = vld [vmem:[%s8186_s11 + $0x1c8] ss:$16 sps:$4 sm:$0xff]  }
 0x714   :  { %6858 = vmatmul.mubr.msk.bf16.vlgmr.msra.gmra.mrb[20].mxu1 %vm3116_vm12, %v3232_v33  ;;  %v7496_v33 = vld [vmem:[%s8186_s11 + $0x20] ss:$16 sps:$4 sm:$0xff]   ;;  %3982 = vmatprep.subr.bf16.mxu0 %v7498_v31 }
 0x715   :  { %3456 = vmatpush1.bf16.msra.mxu1 %v7466_v34  ;;  %3487 = vmatprep.mubr.bf16.mxu1 %v7661_v49  ;;  %v7504_v34 = vld [vmem:[%s8186_s11 + $0x44] ss:$16 sps:$4 sm:$0xff]   ;;  %v7523_v49 = vld [vmem:[%s8186_s11 + $0xa8] ss:$16 sps:$4 sm:$0xff]   ;;  %v7580_v31 = vld [vmem:[%s8186_s11 + $0x1e0] ss:$16 sps:$4 sm:$0xff]  }
 0x716   :  { %3457 = vmatprep.subr.bf16.mxu1 %v7471_v35  ;;  %v7507_v35 = vld [vmem:[%s8186_s11 + $0x4c] ss:$16 sps:$4 sm:$0xff]  }
 0x717   :  { %3983 = vmatpush1.bf16.msra.mxu0 %v7496_v33  ;;  %v8258_v33 = vld [vmem:[%s8255_s15] sm:$0xff] }
 0x718   :  { %3984 = vmatprep.subr.bf16.mxu0 %v7504_v34  ;;  %v8264_v34 = vld [vmem:[%s8255_s15 + $0x8] sm:$0xff] }
 0x719   :  { %3458 = vmatpush1.bf16.msra.mxu1 %v7469_v36  ;;  %v7502_v36 = vld [vmem:[%s8186_s11 + $0x40] ss:$16 sps:$4 sm:$0xff]  }
 0x71a   :  { %3459 = vmatprep.subr.bf16.mxu1 %v7474_v37  ;;  %v7505_v37 = vld [vmem:[%s8186_s11 + $0x48] ss:$16 sps:$4 sm:$0xff]  }
 0x71b   :  { %3985 = vmatpush1.bf16.msra.mxu0 %v7502_v36 }
 0x71d   :  { %3460 = vmatpush1.bf16.msra.mxu1 %v7472_v38  ;;  %v7510_v38 = vld [vmem:[%s8186_s11 + $0x64] ss:$16 sps:$4 sm:$0xff]  }
 0x71e   :  { %3461 = vmatprep.subr.bf16.mxu1 %v7477_v39  ;;  %v7513_v39 = vld [vmem:[%s8186_s11 + $0x6c] ss:$16 sps:$4 sm:$0xff]   ;;  %3986 = vmatprep.subr.bf16.mxu0 %v7510_v38 }
 0x721   :  { %3462 = vmatpush1.bf16.msra.mxu1 %v7475_v40  ;;  %v7508_v40 = vld [vmem:[%s8186_s11 + $0x60] ss:$16 sps:$4 sm:$0xff]  }
 0x722   :  { %3463 = vmatprep.subr.bf16.mxu1 %v7480_v41  ;;  %v7511_v41 = vld [vmem:[%s8186_s11 + $0x68] ss:$16 sps:$4 sm:$0xff]   ;;  %3987 = vmatpush1.bf16.msra.mxu0 %v7508_v40  ;;  %v3362_v40 = vld [vmem:[%s6059_s19] sm:$0x3] }
 0x725   :  { %3464 = vmatpush1.bf16.msra.mxu1 %v7478_v42  ;;  %v7516_v42 = vld [vmem:[%s8186_s11 + $0x84] ss:$16 sps:$4 sm:$0xff]  }
 0x726   :  { %3465 = vmatprep.subr.bf16.mxu1 %v7483_v43  ;;  %v7519_v43 = vld [vmem:[%s8186_s11 + $0x8c] ss:$16 sps:$4 sm:$0xff]   ;;  %3988 = vmatprep.subr.bf16.mxu0 %v7516_v42  ;;  %v3372_v42 = vrot.slane %v3362_v40, %v8002_v54 }
 0x729   :  { %3466 = vmatpush1.bf16.msra.mxu1 %v7481_v44  ;;  %v7514_v44 = vld [vmem:[%s8186_s11 + $0x80] ss:$16 sps:$4 sm:$0xff]  }
 0x72a   :  { %3467 = vmatprep.subr.bf16.mxu1 %v7486_v45  ;;  %v7517_v45 = vld [vmem:[%s8186_s11 + $0x88] ss:$16 sps:$4 sm:$0xff]   ;;  %3989 = vmatpush1.bf16.msra.mxu0 %v7514_v44 }
 0x72d   :  { %3468 = vmatpush1.bf16.msra.mxu1 %v7484_v46  ;;  %v7522_v46 = vld [vmem:[%s8186_s11 + $0xa4] ss:$16 sps:$4 sm:$0xff]  }
 0x72e   :  { %3469 = vmatprep.subr.bf16.mxu1 %v7489_v47  ;;  %v7525_v47 = vld [vmem:[%s8186_s11 + $0xac] ss:$16 sps:$4 sm:$0xff]   ;;  %3990 = vmatprep.subr.bf16.mxu0 %v7522_v46 }
 0x731   :  { %3470 = vmatpush1.bf16.msra.mxu1 %v7487_v48  ;;  %v7520_v48 = vld [vmem:[%s8186_s11 + $0xa0] ss:$16 sps:$4 sm:$0xff]  }
 0x732   :  { %4021 = vmatprep.subr.bf16.mxu1 %v7495_v30  ;;  %3991 = vmatpush1.bf16.msra.mxu0 %v7520_v48  ;;  %v7585_v30 = vld [vmem:[%s8186_s11 + $0x1ec] ss:$16 sps:$4 sm:$0xff]  }
 0x7e7   :  { %v3300_v60 = vpop.f32.mrb[20].mxu1 }
 0x7e8   :  { %v3301_v61 = vadd.f32 %v6424_v59, %v3300_v60  ;;  %v6859_v62 = vpop.f32.mrb[21].mxu1  ;;  %v7528_v59 = vld [vmem:[%s8186_s11 + $0xc4] ss:$16 sps:$4 sm:$0xff]   ;;  %v7531_v60 = vld [vmem:[%s8186_s11 + $0xcc] ss:$16 sps:$4 sm:$0xff]  }
 0x7e9   :  { %v3303_v53 = vpop.f32.mrb[22].mxu1  ;;  %v7529_v62 = vld [vmem:[%s8186_s11 + $0xc8] ss:$16 sps:$4 sm:$0xff]   ;;  %3992 = vmatprep.subr.bf16.mxu0 %v7528_v59 }
 0x7ea   :  { %vm3306_vm15 = vcmp.ge.f32.partialorder %v3301_v61, 0.0  ;;  %v3307_v63 = vmul.f32 0.2, %v3301_v61  ;;  %v6860_v0 = vpop.f32.mrb[23].mxu1  ;;  %v7534_v53 = vld [vmem:[%s8186_s11 + $0xe4] ss:$16 sps:$4 sm:$0xff]  }
 0x7eb   :  { %v7532_v0 = vld [vmem:[%s8186_s11 + $0xe0] ss:$16 sps:$4 sm:$0xff]  }
 0x7ec   :  { %v3308_v56 = vsel %vm3306_vm15, %v3301_v61, %v3307_v63  ;;  %v7526_v61 = vld [vmem:[%s8186_s11 + $0xc0] ss:$16 sps:$4 sm:$0xff]   ;;  %v7537_v63 = vld [vmem:[%s8186_s11 + $0xec] ss:$16 sps:$4 sm:$0xff]  }
 0x7ed   :  { %v3311_v1 = vmul.f32 %v8013_v3, %v3308_v56  ;;  %3993 = vmatpush1.bf16.msra.mxu0 %v7526_v61 }
 0x7ee   :  { %3994 = vmatprep.subr.bf16.mxu0 %v7534_v53 }
 0x7ef   :  { %v3312_v4 = vrot.slane %v3311_v1, 4 }
 0x7f1   :  { %v3313_v5 = vadd.f32 %v3312_v4, %v3311_v1  ;;  %3995 = vmatpush1.bf16.msra.mxu0 %v7532_v0  ;;  %v7540_v1 = vld [vmem:[%s8186_s11 + $0x104] ss:$16 sps:$4 sm:$0xff]   ;;  %v7543_v4 = vld [vmem:[%s8186_s11 + $0x10c] ss:$16 sps:$4 sm:$0xff]  }
 0x7f2   :  { %3996 = vmatprep.subr.bf16.mxu0 %v7540_v1 }
 0x7f3   :  { %v3314_v6 = vrot.slane %v3313_v5, 2 }
 0x7f5   :  { %v3315_v7 = vadd.f32 %v3314_v6, %v3313_v5  ;;  %v7538_v5 = vld [vmem:[%s8186_s11 + $0x100] ss:$16 sps:$4 sm:$0xff]   ;;  %v7541_v6 = vld [vmem:[%s8186_s11 + $0x108] ss:$16 sps:$4 sm:$0xff]  }
 0x7f6   :  { %3997 = vmatpush1.bf16.msra.mxu0 %v7538_v5 }
 0x7f7   :  { %v3316_v57 = vrot.slane %v3315_v7, 1 }
 0x7f9   :  { %v3317_v8 = vadd.f32 %v3316_v57, %v3315_v7  ;;  %v7546_v7 = vld [vmem:[%s8186_s11 + $0x124] ss:$16 sps:$4 sm:$0xff]   ;;  %v7549_v57 = vld [vmem:[%s8186_s11 + $0x12c] ss:$16 sps:$4 sm:$0xff]  }
 0x7fa   :  { %3998 = vmatprep.subr.bf16.mxu0 %v7546_v7 }
 0x7fb   :  { %v3318_v9 = vmul.f32 0.5, %v3317_v8  ;;  %v7544_v8 = vld [vmem:[%s8186_s11 + $0x120] ss:$16 sps:$4 sm:$0xff]  }
 0x7fc   :  { %3999 = vmatpush1.bf16.msra.mxu0 %v7544_v8 }
 0x7fd   :  { %v3319_v10 = vsub.f32 %v3308_v56, %v3318_v9  ;;  %v7535_v56 = vld [vmem:[%s8186_s11 + $0xe8] ss:$16 sps:$4 sm:$0xff]  }
 0x7fe   :  { %v7547_v9 = vld [vmem:[%s8186_s11 + $0x128] ss:$16 sps:$4 sm:$0xff]  }
 0x7ff   :  { %v3320_v58 = vmul.f32 %v3319_v10, %v3319_v10 }
 0x801   :  { %v3321_v11 = vmul.f32 %v8013_v3, %v3320_v58  ;;  %v7555_v58 = vld [vmem:[%s8186_s11 + $0x14c] ss:$16 sps:$4 sm:$0xff]  }
 0x803   :  { %v3322_v12 = vrot.slane %v3321_v11, 4 }
 0x805   :  { %v3323_v13 = vadd.f32 %v3322_v12, %v3321_v11  ;;  %v7550_v11 = vld [vmem:[%s8186_s11 + $0x140] ss:$16 sps:$4 sm:$0xff]   ;;  %v7553_v12 = vld [vmem:[%s8186_s11 + $0x148] ss:$16 sps:$4 sm:$0xff]  }
 0x807   :  { %v3324_v14 = vrot.slane %v3323_v13, 2 }
 0x809   :  { %v3325_v15 = vadd.f32 %v3324_v14, %v3323_v13  ;;  %v7558_v13 = vld [vmem:[%s8186_s11 + $0x164] ss:$16 sps:$4 sm:$0xff]   ;;  %v7561_v14 = vld [vmem:[%s8186_s11 + $0x16c] ss:$16 sps:$4 sm:$0xff]  }
 0x80b   :  { %v3326_v16 = vrot.slane %v3325_v15, 1 }
 0x80d   :  { %v3327_v17 = vadd.f32 %v3326_v16, %v3325_v15  ;;  %v7556_v15 = vld [vmem:[%s8186_s11 + $0x160] ss:$16 sps:$4 sm:$0xff]   ;;  %v7559_v16 = vld [vmem:[%s8186_s11 + $0x168] ss:$16 sps:$4 sm:$0xff]  }
 0x80f   :  { %v3328_v18 = vmul.f32 0.5, %v3327_v17  ;;  %v7564_v17 = vld [vmem:[%s8186_s11 + $0x184] ss:$16 sps:$4 sm:$0xff]  }
 0x811   :  { %v3329_v19 = vadd.f32 1e-05, %v3328_v18  ;;  %v7567_v18 = vld [vmem:[%s8186_s11 + $0x18c] ss:$16 sps:$4 sm:$0xff]  }
 0x813   :  { %7600 = vrsqrt.f32 %v3329_v19  ;;  %v7562_v19 = vld [vmem:[%s8186_s11 + $0x180] ss:$16 sps:$4 sm:$0xff]  }
 0x81d   :  { %v7601_v20 = vpop.eup %7600 }
 0x81e   :  { %v3331_v22 = vmul.f32 %v7601_v20, %v3319_v10  ;;  %v7552_v10 = vld [vmem:[%s8186_s11 + $0x144] ss:$16 sps:$4 sm:$0xff]   ;;  %v7565_v20 = vld [vmem:[%s8186_s11 + $0x188] ss:$16 sps:$4 sm:$0xff]  }
 0x81f   :  { %4000 = vmatprep.subr.bf16.mxu0 %v7552_v10 }
 0x820   :  { %v3338_v24 = vmul.f32 %v6430_v21, %v3331_v22  ;;  %4001 = vmatpush1.bf16.msra.mxu0 %v7550_v11  ;;  %v7570_v21 = vld [vmem:[%s8186_s11 + $0x1a4] ss:$16 sps:$4 sm:$0xff]   ;;  %v7573_v22 = vld [vmem:[%s8186_s11 + $0x1ac] ss:$16 sps:$4 sm:$0xff]  }
 0x821   :  { %4002 = vmatprep.subr.bf16.mxu0 %v7558_v13 }
 0x822   :  { %v3345_v25 = vadd.f32 %v6431_v23, %v3338_v24  ;;  %v7568_v23 = vld [vmem:[%s8186_s11 + $0x1a0] ss:$16 sps:$4 sm:$0xff]   ;;  %v7571_v24 = vld [vmem:[%s8186_s11 + $0x1a8] ss:$16 sps:$4 sm:$0xff]  }
 0x824   :  { %v3363_v26 = vpack.c.bf16 %v3345_v25, %v3345_v25  ;;  %4003 = vmatpush1.bf16.msra.mxu0 %v7556_v15  ;;  %v7576_v25 = vld [vmem:[%s8186_s11 + $0x1c4] ss:$16 sps:$4 sm:$0xff]  }
 0x825   :  { %4004 = vmatprep.subr.bf16.mxu0 %v7564_v17 }
 0x826   :  { %3488 = vmatmul.mubr.bf16.vlgmr.msra.gmra.mrb[24].mxu1 %v3363_v26  ;;  %v7579_v26 = vld [vmem:[%s8186_s11 + $0x1cc] ss:$16 sps:$4 sm:$0xff]  }
 0x827   :  { %4022 = vmatpush1.bf16.msra.mxu1 %v7493_v29  ;;  %v7582_v29 = vld [vmem:[%s8186_s11 + $0x1e4] ss:$16 sps:$4 sm:$0xff]  }
 0x828   :  { %4023 = vmatprep.subr.bf16.mxu1 %v7501_v32  ;;  %4005 = vmatpush1.bf16.msra.mxu0 %v7562_v19  ;;  %v7583_v32 = vld [vmem:[%s8186_s11 + $0x1e8] ss:$16 sps:$4 sm:$0xff]  }
 0x829   :  { %4006 = vmatprep.subr.bf16.mxu0 %v7570_v21 }
 0x82b   :  { %4024 = vmatpush1.bf16.msra.mxu1 %v7499_v2  ;;  %v8261_v2 = vld [vmem:[%s8255_s15 + $0x20] sm:$0xff] }
 0x82c   :  { %4025 = vmatprep.subr.bf16.mxu1 %v7507_v35  ;;  %4007 = vmatpush1.bf16.msra.mxu0 %v7568_v23  ;;  %v6512_v35 = vcombine.low %v8258_v33, %v8261_v2  ;;  %v6513_v36 = vcombine.high %v8258_v33, %v8261_v2 }
 0x82d   :  { %4008 = vmatprep.subr.bf16.mxu0 %v7576_v25 }
 0x82f   :  { %4026 = vmatpush1.bf16.msra.mxu1 %v7505_v37  ;;  %v8271_v37 = vld [vmem:[%s8255_s15 + $0x28] sm:$0xff] }
 0x830   :  { %4027 = vmatprep.subr.bf16.mxu1 %v7513_v39  ;;  %4009 = vmatpush1.bf16.msra.mxu0 %v7574_v27  ;;  %v6514_v38 = vcombine.low %v8264_v34, %v8271_v37  ;;  %v6515_v39 = vcombine.high %v8264_v34, %v8271_v37  ;;  %v4106_v37 = vld [vmem:[%s8255_s15 + $0x100] sm:$0xff] }
 0x831   :  { %4010 = vmatprep.subr.bf16.mxu0 %v7582_v29 }
 0x833   :  { %4028 = vmatpush1.bf16.msra.mxu1 %v7511_v41  ;;  %v3368_v41 = vrot.slane %v3362_v40, %v7996_v51 }
 0x834   :  { %4029 = vmatprep.subr.bf16.mxu1 %v7519_v43  ;;  %4011 = vmatpush1.bf16.msra.mxu0 %v7580_v31 }
 0x835   :  { %5656 = vmatprep.subr.bf16.mxu0 %v6513_v36  ;;  %v3502_v36 = vld [vmem:[%s6060_s23] sm:$0x3] }
 0x836   :  { %v3550_v40 = vrot.slane %v3502_v36, %v7996_v51 }
 0x837   :  { %4030 = vmatpush1.bf16.msra.mxu1 %v7517_v45 }
 0x838   :  { %4031 = vmatprep.subr.bf16.mxu1 %v7525_v47 }
 0x83b   :  { %4032 = vmatpush1.bf16.msra.mxu1 %v7523_v49 }
 0x83c   :  { %4033 = vmatprep.subr.bf16.mxu1 %v7531_v60 }
 0x83f   :  { %4034 = vmatpush1.bf16.msra.mxu1 %v7529_v62 }
 0x840   :  { %4035 = vmatprep.subr.bf16.mxu1 %v7537_v63 }
 0x843   :  { %4036 = vmatpush1.bf16.msra.mxu1 %v7535_v56 }
 0x844   :  { %4037 = vmatprep.subr.bf16.mxu1 %v7543_v4 }
 0x847   :  { %4038 = vmatpush1.bf16.msra.mxu1 %v7541_v6 }
 0x848   :  { %4039 = vmatprep.subr.bf16.mxu1 %v7549_v57 }
 0x84b   :  { %4040 = vmatpush1.bf16.msra.mxu1 %v7547_v9 }
 0x84c   :  { %4041 = vmatprep.subr.bf16.mxu1 %v7555_v58 }
 0x84f   :  { %4042 = vmatpush1.bf16.msra.mxu1 %v7553_v12 }
 0x850   :  { %4043 = vmatprep.subr.bf16.mxu1 %v7561_v14 }
 0x853   :  { %4044 = vmatpush1.bf16.msra.mxu1 %v7559_v16 }
 0x854   :  { %4045 = vmatprep.subr.bf16.mxu1 %v7567_v18 }
 0x857   :  { %4046 = vmatpush1.bf16.msra.mxu1 %v7565_v20 }
 0x858   :  { %4047 = vmatprep.subr.bf16.mxu1 %v7573_v22 }
 0x85b   :  { %4048 = vmatpush1.bf16.msra.mxu1 %v7571_v24 }
 0x85c   :  { %4049 = vmatprep.subr.bf16.mxu1 %v7579_v26 }
 0x85f   :  { %4050 = vmatpush1.bf16.msra.mxu1 %v7577_v28 }
 0x860   :  { %4051 = vmatprep.subr.bf16.mxu1 %v7585_v30 }
 0x863   :  { %4052 = vmatpush1.bf16.msra.mxu1 %v7583_v32 }
 0x864   :  { %5738 = vmatprep.subr.bf16.mxu1 %v6515_v39  ;;  %v3503_v39 = vld [vmem:[%s6061_s27] sm:$0x3] }
 0x8f9   :  { %v3489_v43 = vpop.f32.mrb[24].mxu1 }
 0x8fa   :  { %v3490_v44 = vadd.f32 %v3489_v43, %v3368_v41  ;;  %v3491_v45 = vpop.f32.mrb[25].mxu1 }
 0x8fb   :  { %v3492_v46 = vadd.f32 %v3491_v45, %v3372_v42  ;;  %v3493_v47 = vpop.f32.mrb[26].mxu1  ;;  %v3554_v42 = vrot.slane %v3502_v36, %v8002_v54  ;;  %v3563_v45 = vrot.slane %v3503_v39, %v7996_v51 }
 0x8fc   :  { %vm3496_vm0 = vcmp.ge.f32.partialorder %v3490_v44, 0.0  ;;  %v3498_v48 = vmul.f32 0.2, %v3490_v44  ;;  %v3494_v49 = vpop.f32.mrb[27].mxu1  ;;  %v3567_v47 = vrot.slane %v3503_v39, %v8002_v54 }
 0x8fd   :  { %vm3497_vm1 = vcmp.ge.f32.partialorder %v3492_v46, 0.0  ;;  %v3499_v59 = vmul.f32 0.2, %v3492_v46 }
 0x8fe   :  { %v3500_v60 = vsel %vm3496_vm0, %v3490_v44, %v3498_v48 }
 0x8ff   :  { %v3504_v61 = vmul.f32 %v8013_v3, %v3500_v60  ;;  %v3501_v62 = vsel %vm3497_vm1, %v3492_v46, %v3499_v59 }
 0x900   :  { %v3505_v53 = vmul.f32 %v8013_v3, %v3501_v62 }
 0x901   :  { %v3506_v63 = vrot.slane %v3504_v61, 4 }
 0x902   :  { %v3512_v0 = vrot.slane %v3505_v53, 4 }
 0x903   :  { %v3507_v56 = vadd.f32 %v3506_v63, %v3504_v61  ;;  %v4087_v63 = vld [vmem:[%s8255_s15 + $0x68] sm:$0xff] }
 0x904   :  { %v3513_v1 = vadd.f32 %v3512_v0, %v3505_v53  ;;  %v4083_v53 = vld [vmem:[%s8255_s15 + $0x48] sm:$0xff] }
 0x905   :  { %v3508_v4 = vrot.slane %v3507_v56, 2 }
 0x906   :  { %v3514_v5 = vrot.slane %v3513_v1, 2 }
 0x907   :  { %v3509_v6 = vadd.f32 %v3508_v4, %v3507_v56  ;;  %v6523_v4 = vcombine.high %v4083_v53, %v4087_v63 }
 0x908   :  { %v3515_v7 = vadd.f32 %v3514_v5, %v3513_v1  ;;  %v4090_v5 = vld [vmem:[%s8255_s15 + $0x80] sm:$0xff] }
 0x909   :  { %v3510_v57 = vrot.slane %v3509_v6, 1 }
 0x90a   :  { %v3516_v8 = vrot.slane %v3515_v7, 1 }
 0x90b   :  { %v3511_v9 = vadd.f32 %v3510_v57, %v3509_v6  ;;  %v4094_v6 = vld [vmem:[%s8255_s15 + $0xa0] sm:$0xff]  ;;  %v4095_v57 = vld [vmem:[%s8255_s15 + $0xa8] sm:$0xff] }
 0x90c   :  { %v3517_v10 = vadd.f32 %v3516_v8, %v3515_v7  ;;  %v4091_v7 = vld [vmem:[%s8255_s15 + $0x88] sm:$0xff]  ;;  %v6528_v33 = vcombine.low %v4090_v5, %v4094_v6 }
 0x90d   :  { %v3518_v58 = vmul.f32 0.5, %v3511_v9  ;;  %v6522_v9 = vcombine.low %v4083_v53, %v4087_v63  ;;  %v6530_v2 = vcombine.low %v4091_v7, %v4095_v57 }
 0x90e   :  { %v3519_v11 = vmul.f32 0.5, %v3517_v10  ;;  %v6529_v10 = vcombine.high %v4090_v5, %v4094_v6  ;;  %v4151_v5 = vld [vmem:[%s8255_s15 + $0x268] sm:$0xff] }
 0x90f   :  { %v3520_v12 = vsub.f32 %v3500_v60, %v3518_v58  ;;  %v4082_v60 = vld [vmem:[%s8255_s15 + $0x40] sm:$0xff]  ;;  %v6531_v58 = vcombine.high %v4091_v7, %v4095_v57 }
 0x910   :  { %v3521_v13 = vsub.f32 %v3501_v62, %v3519_v11  ;;  %v4086_v62 = vld [vmem:[%s8255_s15 + $0x60] sm:$0xff] }
 0x911   :  { %v3522_v14 = vmul.f32 %v3520_v12, %v3520_v12  ;;  %v6521_v1 = vcombine.high %v4082_v60, %v4086_v62  ;;  %v6520_v8 = vcombine.low %v4082_v60, %v4086_v62  ;;  %v4098_v11 = vld [vmem:[%s8255_s15 + $0xc0] sm:$0xff]  ;;  %v4139_v60 = vld [vmem:[%s8255_s15 + $0x208] sm:$0xff] }
 0x912   :  { %v3523_v15 = vmul.f32 %v3521_v13, %v3521_v13 }
 0x913   :  { %v3524_v16 = vmul.f32 %v8013_v3, %v3522_v14  ;;  %v4103_v14 = vld [vmem:[%s8255_s15 + $0xe8] sm:$0xff] }
 0x914   :  { %v3525_v17 = vmul.f32 %v8013_v3, %v3523_v15  ;;  %v4107_v15 = vld [vmem:[%s8255_s15 + $0x108] sm:$0xff] }
 0x915   :  { %v3526_v18 = vrot.slane %v3524_v16, 4 }
 0x916   :  { %v3532_v19 = vrot.slane %v3525_v17, 4 }
 0x917   :  { %v3527_v20 = vadd.f32 %v3526_v18, %v3524_v16  ;;  %v4111_v16 = vld [vmem:[%s8255_s15 + $0x128] sm:$0xff] }
 0x918   :  { %v3533_v21 = vadd.f32 %v3532_v19, %v3525_v17 }
 0x919   :  { %v3528_v22 = vrot.slane %v3527_v20, 2 }
 0x91a   :  { %v3534_v23 = vrot.slane %v3533_v21, 2 }
 0x91b   :  { %v3529_v24 = vadd.f32 %v3528_v22, %v3527_v20  ;;  %v6547_v20 = vcombine.high %v4107_v15, %v4111_v16  ;;  %v4118_v22 = vld [vmem:[%s8255_s15 + $0x160] sm:$0xff] }
 0x91c   :  { %v3535_v25 = vadd.f32 %v3534_v23, %v3533_v21  ;;  %v4114_v21 = vld [vmem:[%s8255_s15 + $0x140] sm:$0xff]  ;;  %v4115_v23 = vld [vmem:[%s8255_s15 + $0x148] sm:$0xff] }
 0x91d   :  { %v3530_v26 = vrot.slane %v3529_v24, 1 }
 0x91e   :  { %v3536_v27 = vrot.slane %v3535_v25, 1 }
 0x91f   :  { %v3531_v28 = vadd.f32 %v3530_v26, %v3529_v24  ;;  %v4119_v24 = vld [vmem:[%s8255_s15 + $0x168] sm:$0xff]  ;;  %v6546_v26 = vcombine.low %v4107_v15, %v4111_v16 }
 0x920   :  { %v3537_v29 = vadd.f32 %v3536_v27, %v3535_v25  ;;  %v6553_v27 = vcombine.high %v4114_v21, %v4118_v22  ;;  %v6554_v36 = vcombine.low %v4115_v23, %v4119_v24 }
 0x921   :  { %v3538_v30 = vmul.f32 0.5, %v3531_v28  ;;  %v6555_v28 = vcombine.high %v4115_v23, %v4119_v24 }
 0x922   :  { %v3539_v31 = vmul.f32 0.5, %v3537_v29  ;;  %v4122_v29 = vld [vmem:[%s8255_s15 + $0x180] sm:$0xff] }
 0x923   :  { %v3540_v32 = vadd.f32 1e-05, %v3538_v30  ;;  %v4126_v30 = vld [vmem:[%s8255_s15 + $0x1a0] sm:$0xff] }
 0x924   :  { %v3541_v3 = vadd.f32 1e-05, %v3539_v31  ;;  %v4123_v31 = vld [vmem:[%s8255_s15 + $0x188] sm:$0xff]  ;;  %v6561_v39 = vcombine.high %v4122_v29, %v4126_v30 }
 0x925   :  { %7602 = vrsqrt.f32 %v3540_v32  ;;  %v4127_v32 = vld [vmem:[%s8255_s15 + $0x1a8] sm:$0xff] }
 0x926   :  { %7604 = vrsqrt.f32 %v3541_v3  ;;  %v6552_v3 = vcombine.low %v4114_v21, %v4118_v22  ;;  %v4175_v21 = vld [vmem:[%s8255_s15 + $0x328] sm:$0xff] }
 0x92f   :  { %v7603_v41 = vpop.eup %7602 }
 0x930   :  { %v7605_v43 = vpop.eup %7604  ;;  %v3544_v44 = vmul.f32 %v7603_v41, %v3520_v12  ;;  %v4102_v12 = vld [vmem:[%s8255_s15 + $0xe0] sm:$0xff] }
 0x931   :  { %v3545_v46 = vmul.f32 %v7605_v43, %v3521_v13  ;;  %v4099_v13 = vld [vmem:[%s8255_s15 + $0xc8] sm:$0xff]  ;;  %v6537_v34 = vcombine.high %v4098_v11, %v4102_v12  ;;  %v6536_v17 = vcombine.low %v4098_v11, %v4102_v12  ;;  %v4130_v41 = vld [vmem:[%s8255_s15 + $0x1c0] sm:$0xff] }
 0x932   :  { %v3557_v48 = vmul.f32 %v3550_v40, %v3544_v44  ;;  %v6538_v18 = vcombine.low %v4099_v13, %v4103_v14  ;;  %v6563_v40 = vcombine.high %v4123_v31, %v4127_v32  ;;  %v4131_v43 = vld [vmem:[%s8255_s15 + $0x1c8] sm:$0xff] }
 0x933   :  { %v3558_v49 = vmul.f32 %v3554_v42, %v3545_v46  ;;  %v4134_v42 = vld [vmem:[%s8255_s15 + $0x1e0] sm:$0xff]  ;;  %v4135_v44 = vld [vmem:[%s8255_s15 + $0x1e8] sm:$0xff]  ;;  %v6562_v46 = vcombine.low %v4123_v31, %v4127_v32 }
 0x934   :  { %v3570_v59 = vadd.f32 %v3563_v45, %v3557_v48  ;;  %v6560_v45 = vcombine.low %v4122_v29, %v4126_v30  ;;  %v6571_v48 = vcombine.high %v4131_v43, %v4135_v44  ;;  %v6568_v62 = vcombine.low %v4130_v41, %v4134_v42  ;;  %v4159_v11 = vld [vmem:[%s8255_s15 + $0x2a8] sm:$0xff] }
 0x935   :  { %v3571_v61 = vadd.f32 %v3567_v47, %v3558_v49  ;;  %v6569_v47 = vcombine.high %v4130_v41, %v4134_v42  ;;  %v4138_v49 = vld [vmem:[%s8255_s15 + $0x200] sm:$0xff]  ;;  %v6570_v53 = vcombine.low %v4131_v43, %v4135_v44  ;;  %v4183_v29 = vld [vmem:[%s8255_s15 + $0x368] sm:$0xff] }
 0x936   :  { %v3637_v56 = vpack.c.bf16 %v3570_v59, %v3570_v59  ;;  %v4142_v59 = vld [vmem:[%s8255_s15 + $0x220] sm:$0xff]  ;;  %v4187_v42 = vld [vmem:[%s8255_s15 + $0x388] sm:$0xff] }
 0x937   :  { %v3638_v0 = vpack.c.bf16 %v3571_v61, %v3571_v61  ;;  %v4143_v61 = vld [vmem:[%s8255_s15 + $0x228] sm:$0xff]  ;;  %v6577_v63 = vcombine.high %v4138_v49, %v4142_v59  ;;  %v6576_v6 = vcombine.low %v4138_v49, %v4142_v59  ;;  %v4190_v41 = vld [vmem:[%s8255_s15 + $0x3a0] sm:$0xff] }
 0x938   :  { %v6578_v7 = vcombine.low %v4139_v60, %v4143_v61  ;;  %v4191_v44 = vld [vmem:[%s8255_s15 + $0x3a8] sm:$0xff]  ;;  %v4198_v49 = vld [vmem:[%s8255_s15 + $0x3e0] sm:$0xff] }
 0x939   :  { %4012 = vmatprep.mubr.bf16.mxu0 %v3638_v0  ;;  %4053 = vmatprep.mubr.bf16.mxu1 %v3638_v0  ;;  %v6579_v0 = vcombine.high %v4139_v60, %v4143_v61  ;;  %v4195_v59 = vld [vmem:[%s8255_s15 + $0x3c8] sm:$0xff] }
 0x93a   :  { %4013 = vmatmul.mubr.bf16.vlgmr.msra.gmra.mrb[8].mxu0 %v3637_v56  ;;  %4054 = vmatmul.mubr.bf16.vlgmr.msra.gmra.mrb[28].mxu1 %v3637_v56  ;;  %v4146_v56 = vld [vmem:[%s8255_s15 + $0x240] sm:$0xff]  ;;  %v4199_v61 = vld [vmem:[%s8255_s15 + $0x3e8] sm:$0xff] }
 0x93b   :  { %5657 = vmatpush1.bf16.msra.mxu0 %v6512_v35  ;;  %5739 = vmatpush1.bf16.msra.mxu1 %v6514_v38  ;;  %v6539_v35 = vcombine.high %v4099_v13, %v4103_v14  ;;  %v4110_v38 = vld [vmem:[%s8255_s15 + $0x120] sm:$0xff] }
 0x93c   :  { %5658 = vmatprep.subr.bf16.mxu0 %v6521_v1  ;;  %5740 = vmatprep.subr.bf16.mxu1 %v6523_v4  ;;  %v6545_v19 = vcombine.high %v4106_v37, %v4110_v38  ;;  %v6544_v25 = vcombine.low %v4106_v37, %v4110_v38  ;;  %v4150_v1 = vld [vmem:[%s8255_s15 + $0x260] sm:$0xff]  ;;  %v4147_v4 = vld [vmem:[%s8255_s15 + $0x248] sm:$0xff] }
 0x93d   :  { %v6585_v57 = vcombine.high %v4146_v56, %v4150_v1  ;;  %v6584_v12 = vcombine.low %v4146_v56, %v4150_v1  ;;  %v6586_v13 = vcombine.low %v4147_v4, %v4151_v5  ;;  %v4167_v37 = vld [vmem:[%s8255_s15 + $0x2e8] sm:$0xff]  ;;  %v4206_v56 = vld [vmem:[%s8255_s15 + $0x420] sm:$0xff] }
 0x93e   :  { %v4203_v1 = vld [vmem:[%s8255_s15 + $0x408] sm:$0xff] }
 0x93f   :  { %5659 = vmatpush1.bf16.msra.mxu0 %v6520_v8  ;;  %5741 = vmatpush1.bf16.msra.mxu1 %v6522_v9  ;;  %v6587_v8 = vcombine.high %v4147_v4, %v4151_v5  ;;  %v4154_v9 = vld [vmem:[%s8255_s15 + $0x280] sm:$0xff] }
 0x940   :  { %5660 = vmatprep.subr.bf16.mxu0 %v6529_v10  ;;  %5742 = vmatprep.subr.bf16.mxu1 %v6531_v58  ;;  %v4158_v10 = vld [vmem:[%s8255_s15 + $0x2a0] sm:$0xff]  ;;  %v4155_v58 = vld [vmem:[%s8255_s15 + $0x288] sm:$0xff] }
 0x941   :  { %v6593_v14 = vcombine.high %v4154_v9, %v4158_v10  ;;  %v6592_v38 = vcombine.low %v4154_v9, %v4158_v10  ;;  %v6594_v15 = vcombine.low %v4155_v58, %v4159_v11 }
 0x943   :  { %5661 = vmatpush1.bf16.msra.mxu0 %v6528_v33  ;;  %5743 = vmatpush1.bf16.msra.mxu1 %v6530_v2  ;;  %v6595_v33 = vcombine.high %v4155_v58, %v4159_v11  ;;  %v4162_v2 = vld [vmem:[%s8255_s15 + $0x2c0] sm:$0xff] }
 0x944   :  { %5662 = vmatprep.subr.bf16.mxu0 %v6537_v34  ;;  %5744 = vmatprep.subr.bf16.mxu1 %v6539_v35  ;;  %v4166_v34 = vld [vmem:[%s8255_s15 + $0x2e0] sm:$0xff]  ;;  %v4163_v35 = vld [vmem:[%s8255_s15 + $0x2c8] sm:$0xff] }
 0x945   :  { %v6601_v16 = vcombine.high %v4162_v2, %v4166_v34  ;;  %v6600_v22 = vcombine.low %v4162_v2, %v4166_v34  ;;  %v6602_v23 = vcombine.low %v4163_v35, %v4167_v37 }
 0x947   :  { %5663 = vmatpush1.bf16.msra.mxu0 %v6536_v17  ;;  %5745 = vmatpush1.bf16.msra.mxu1 %v6538_v18  ;;  %v6603_v17 = vcombine.high %v4163_v35, %v4167_v37  ;;  %v4170_v18 = vld [vmem:[%s8255_s15 + $0x300] sm:$0xff] }
 0x948   :  { %5664 = vmatprep.subr.bf16.mxu0 %v6545_v19  ;;  %5746 = vmatprep.subr.bf16.mxu1 %v6547_v20  ;;  %v4174_v19 = vld [vmem:[%s8255_s15 + $0x320] sm:$0xff]  ;;  %v4171_v20 = vld [vmem:[%s8255_s15 + $0x308] sm:$0xff] }
 0x949   :  { %v6609_v24 = vcombine.high %v4170_v18, %v4174_v19  ;;  %v6608_v30 = vcombine.low %v4170_v18, %v4174_v19  ;;  %v6610_v31 = vcombine.low %v4171_v20, %v4175_v21 }
 0x94b   :  { %5665 = vmatpush1.bf16.msra.mxu0 %v6544_v25  ;;  %5747 = vmatpush1.bf16.msra.mxu1 %v6546_v26  ;;  %v6611_v25 = vcombine.high %v4171_v20, %v4175_v21  ;;  %v4178_v26 = vld [vmem:[%s8255_s15 + $0x340] sm:$0xff] }
 0x94c   :  { %5666 = vmatprep.subr.bf16.mxu0 %v6553_v27  ;;  %5748 = vmatprep.subr.bf16.mxu1 %v6555_v28  ;;  %v4182_v27 = vld [vmem:[%s8255_s15 + $0x360] sm:$0xff]  ;;  %v4179_v28 = vld [vmem:[%s8255_s15 + $0x348] sm:$0xff] }
 0x94d   :  { %v6617_v32 = vcombine.high %v4178_v26, %v4182_v27  ;;  %v4210_v20 = vld [vmem:[%s8255_s15 + $0x440] sm:$0xff] }
 0x94f   :  { %5667 = vmatpush1.bf16.msra.mxu0 %v6552_v3  ;;  %5749 = vmatpush1.bf16.msra.mxu1 %v6554_v36  ;;  %v6619_v3 = vcombine.high %v4179_v28, %v4183_v29  ;;  %v6616_v36 = vcombine.low %v4178_v26, %v4182_v27 }
 0x950   :  { %5668 = vmatprep.subr.bf16.mxu0 %v6561_v39  ;;  %5750 = vmatprep.subr.bf16.mxu1 %v6563_v40  ;;  %v6618_v39 = vcombine.low %v4179_v28, %v4183_v29  ;;  %v4186_v40 = vld [vmem:[%s8255_s15 + $0x380] sm:$0xff] }
 0x951   :  { %v6625_v43 = vcombine.high %v4186_v40, %v4190_v41  ;;  %v4218_v28 = vld [vmem:[%s8255_s15 + $0x480] sm:$0xff] }
 0x953   :  { %5669 = vmatpush1.bf16.msra.mxu0 %v6560_v45  ;;  %5751 = vmatpush1.bf16.msra.mxu1 %v6562_v46  ;;  %v6624_v45 = vcombine.low %v4186_v40, %v4190_v41  ;;  %v6626_v46 = vcombine.low %v4187_v42, %v4191_v44 }
 0x954   :  { %5670 = vmatprep.subr.bf16.mxu0 %v6569_v47  ;;  %5752 = vmatprep.subr.bf16.mxu1 %v6571_v48  ;;  %v6627_v47 = vcombine.high %v4187_v42, %v4191_v44  ;;  %v4194_v48 = vld [vmem:[%s8255_s15 + $0x3c0] sm:$0xff] }
 0x955   :  { %v6633_v60 = vcombine.high %v4194_v48, %v4198_v49  ;;  %v4230_v44 = vld [vmem:[%s8255_s15 + $0x4e0] sm:$0xff] }
 0x957   :  { %5671 = vmatpush1.bf16.msra.mxu0 %v6568_v62  ;;  %5753 = vmatpush1.bf16.msra.mxu1 %v6570_v53  ;;  %v6632_v62 = vcombine.low %v4194_v48, %v4198_v49  ;;  %v6634_v53 = vcombine.low %v4195_v59, %v4199_v61 }
 0x958   :  { %5672 = vmatprep.subr.bf16.mxu0 %v6577_v63  ;;  %5754 = vmatprep.subr.bf16.mxu1 %v6579_v0  ;;  %v6635_v63 = vcombine.high %v4195_v59, %v4199_v61  ;;  %v4202_v0 = vld [vmem:[%s8255_s15 + $0x400] sm:$0xff] }
 0x959   :  { %v6640_v4 = vcombine.low %v4202_v0, %v4206_v56  ;;  %v6641_v5 = vcombine.high %v4202_v0, %v4206_v56  ;;  %v4238_v61 = vld [vmem:[%s8255_s15 + $0x520] sm:$0xff] }
 0x95b   :  { %5673 = vmatpush1.bf16.msra.mxu0 %v6576_v6  ;;  %5755 = vmatpush1.bf16.msra.mxu1 %v6578_v7  ;;  %v4207_v6 = vld [vmem:[%s8255_s15 + $0x428] sm:$0xff] }
 0x95c   :  { %5674 = vmatprep.subr.bf16.mxu0 %v6585_v57  ;;  %5756 = vmatprep.subr.bf16.mxu1 %v6587_v8  ;;  %v6642_v7 = vcombine.low %v4203_v1, %v4207_v6  ;;  %v6643_v57 = vcombine.high %v4203_v1, %v4207_v6  ;;  %v8369_v8 = vld [vmem:[%s6063_s1] sm:$0xf]  ;;  %v4243_v6 = vld [vmem:[%s8255_s15 + $0x548] sm:$0xff] }
 0x95d   :  { %v3643_v9 = vrot.slane %v8369_v8, %v7996_v51  ;;  %v3647_v10 = vrot.slane %v8369_v8, %v8002_v54  ;;  %v3655_v58 = vrot.slane %v8369_v8, %v8005_v55 }
 0x95f   :  { %5675 = vmatpush1.bf16.msra.mxu0 %v6584_v12  ;;  %5757 = vmatpush1.bf16.msra.mxu1 %v6586_v13 }
 0x960   :  { %5676 = vmatprep.subr.bf16.mxu0 %v6593_v14  ;;  %5758 = vmatprep.subr.bf16.mxu1 %v6595_v33 }
 0x963   :  { %5677 = vmatpush1.bf16.msra.mxu0 %v6592_v38  ;;  %5759 = vmatpush1.bf16.msra.mxu1 %v6594_v15 }
 0x964   :  { %5678 = vmatprep.subr.bf16.mxu0 %v6601_v16  ;;  %5760 = vmatprep.subr.bf16.mxu1 %v6603_v17 }
 0x967   :  { %5679 = vmatpush1.bf16.msra.mxu0 %v6600_v22  ;;  %5761 = vmatpush1.bf16.msra.mxu1 %v6602_v23  ;;  %v4214_v22 = vld [vmem:[%s8255_s15 + $0x460] sm:$0xff]  ;;  %v4211_v23 = vld [vmem:[%s8255_s15 + $0x448] sm:$0xff] }
 0x968   :  { %5680 = vmatprep.subr.bf16.mxu0 %v6609_v24  ;;  %5762 = vmatprep.subr.bf16.mxu1 %v6611_v25  ;;  %v4215_v24 = vld [vmem:[%s8255_s15 + $0x468] sm:$0xff]  ;;  %v6649_v29 = vcombine.high %v4210_v20, %v4214_v22 }
 0x969   :  { %v6650_v40 = vcombine.low %v4211_v23, %v4215_v24 }
 0x96b   :  { %5681 = vmatpush1.bf16.msra.mxu0 %v6608_v30  ;;  %5763 = vmatpush1.bf16.msra.mxu1 %v6610_v31  ;;  %v6651_v30 = vcombine.high %v4211_v23, %v4215_v24  ;;  %v4222_v31 = vld [vmem:[%s8255_s15 + $0x4a0] sm:$0xff]  ;;  %v4267_v24 = vld [vmem:[%s8255_s15 + $0x608] sm:$0xff] }
 0x96c   :  { %5682 = vmatprep.subr.bf16.mxu0 %v6617_v32  ;;  %5764 = vmatprep.subr.bf16.mxu1 %v6619_v3  ;;  %v4219_v32 = vld [vmem:[%s8255_s15 + $0x488] sm:$0xff]  ;;  %v6657_v41 = vcombine.high %v4218_v28, %v4222_v31  ;;  %v4270_v23 = vld [vmem:[%s8255_s15 + $0x620] sm:$0xff] }
 0x96d   :  { %v4223_v3 = vld [vmem:[%s8255_s15 + $0x4a8] sm:$0xff] }
 0x96e   :  { %v6659_v42 = vcombine.high %v4219_v32, %v4223_v3  ;;  %v6658_v48 = vcombine.low %v4219_v32, %v4223_v3  ;;  %v4274_v32 = vld [vmem:[%s8255_s15 + $0x640] sm:$0xff] }
 0x96f   :  { %5683 = vmatpush1.bf16.msra.mxu0 %v6616_v36  ;;  %5765 = vmatpush1.bf16.msra.mxu1 %v6618_v39  ;;  %v6648_v39 = vcombine.low %v4210_v20, %v4214_v22  ;;  %v4266_v22 = vld [vmem:[%s8255_s15 + $0x600] sm:$0xff] }
 0x970   :  { %5684 = vmatprep.subr.bf16.mxu0 %v6625_v43  ;;  %5766 = vmatprep.subr.bf16.mxu1 %v6627_v47  ;;  %v4226_v43 = vld [vmem:[%s8255_s15 + $0x4c0] sm:$0xff]  ;;  %v6656_v47 = vcombine.low %v4218_v28, %v4222_v31 }
 0x971   :  { %v6665_v49 = vcombine.high %v4226_v43, %v4230_v44  ;;  %v4278_v3 = vld [vmem:[%s8255_s15 + $0x660] sm:$0xff] }
 0x973   :  { %5685 = vmatpush1.bf16.msra.mxu0 %v6624_v45  ;;  %5767 = vmatpush1.bf16.msra.mxu1 %v6626_v46  ;;  %v4227_v45 = vld [vmem:[%s8255_s15 + $0x4c8] sm:$0xff] }
 0x974   :  { %5686 = vmatprep.subr.bf16.mxu0 %v6633_v60  ;;  %5768 = vmatprep.subr.bf16.mxu1 %v6635_v63  ;;  %v4231_v46 = vld [vmem:[%s8255_s15 + $0x4e8] sm:$0xff]  ;;  %v4234_v60 = vld [vmem:[%s8255_s15 + $0x500] sm:$0xff]  ;;  %v6664_v63 = vcombine.low %v4226_v43, %v4230_v44  ;;  %v6713_v43 = vcombine.high %v4274_v32, %v4278_v3 }
 0x975   :  { %v6667_v59 = vcombine.high %v4227_v45, %v4231_v46  ;;  %v6666_v0 = vcombine.low %v4227_v45, %v4231_v46  ;;  %v6673_v56 = vcombine.high %v4234_v60, %v4238_v61  ;;  %v4282_v45 = vld [vmem:[%s8255_s15 + $0x680] sm:$0xff] }
 0x976   :  { %v4286_v46 = vld [vmem:[%s8255_s15 + $0x6a0] sm:$0xff] }
 0x977   :  { %5687 = vmatpush1.bf16.msra.mxu0 %v6632_v62  ;;  %5769 = vmatpush1.bf16.msra.mxu1 %v6634_v53  ;;  %v4235_v62 = vld [vmem:[%s8255_s15 + $0x508] sm:$0xff] }
 0x978   :  { %5697 = vmatprep.subr.bf16.mxu0 %v6641_v5  ;;  %5779 = vmatprep.subr.bf16.mxu1 %v6643_v57  ;;  %v4239_v53 = vld [vmem:[%s8255_s15 + $0x528] sm:$0xff]  ;;  %v4246_v5 = vld [vmem:[%s8255_s15 + $0x560] sm:$0xff]  ;;  %v6672_v57 = vcombine.low %v4234_v60, %v4238_v61  ;;  %v6721_v60 = vcombine.high %v4282_v45, %v4286_v46 }
 0x979   :  { %v6675_v1 = vcombine.high %v4235_v62, %v4239_v53 }
 0xa0d   :  { %v4014_v11 = vpop.f32.mrb[8].mxu0  ;;  %v8377_v12 = vpop.f32.mrb[28].mxu1 }
 0xa0e   :  { %v4015_v13 = vadd.f32 %v4014_v11, %v3643_v9  ;;  %v4016_v14 = vpop.f32.mrb[9].mxu0  ;;  %v4057_v33 = vpop.f32.mrb[29].mxu1  ;;  %v6674_v9 = vcombine.low %v4235_v62, %v4239_v53  ;;  %v4250_v11 = vld [vmem:[%s8255_s15 + $0x580] sm:$0xff] }
 0xa0f   :  { %v4017_v2 = vadd.f32 %v4016_v14, %v3647_v10  ;;  %v4058_v34 = vadd.f32 %v4057_v33, %v3655_v58  ;;  %v4018_v35 = vpop.f32.mrb[10].mxu0  ;;  %v4059_v37 = vpop.f32.mrb[30].mxu1  ;;  %v4251_v14 = vld [vmem:[%s8255_s15 + $0x588] sm:$0xff]  ;;  %v4290_v62 = vld [vmem:[%s8255_s15 + $0x6c0] sm:$0xff] }
 0xa10   :  { %vm4062_vm2 = vcmp.ge.f32.partialorder %v4015_v13, 0.0  ;;  %v4066_v38 = vmul.f32 0.2, %v4015_v13  ;;  %v4019_v18 = vpop.f32.mrb[11].mxu0  ;;  %v4060_v19 = vpop.f32.mrb[31].mxu1  ;;  %v4255_v33 = vld [vmem:[%s8255_s15 + $0x5a8] sm:$0xff] }
 0xa11   :  { %vm4063_vm3 = vcmp.ge.f32.partialorder %v4017_v2, 0.0  ;;  %v4067_v15 = vmul.f32 0.2, %v4017_v2  ;;  %vm4065_vm4 = vcmp.ge.f32.partialorder %v4058_v34, 0.0  ;;  %v4069_v16 = vmul.f32 0.2, %v4058_v34 }
 0xa12   :  { %v4070_v17 = vsel %vm4062_vm2, %v4015_v13, %v4066_v38  ;;  %v4254_v13 = vld [vmem:[%s8255_s15 + $0x5a0] sm:$0xff]  ;;  %v6691_v37 = vcombine.high %v4251_v14, %v4255_v33  ;;  %v6690_v19 = vcombine.low %v4251_v14, %v4255_v33 }
 0xa13   :  { %v4071_v21 = vsel %vm4063_vm3, %v4017_v2, %v4067_v15  ;;  %v4073_v26 = vsel %vm4065_vm4, %v4058_v34, %v4069_v16  ;;  %v8385_v27 = vpack.c.bf16 %v4070_v17, %v4070_v17  ;;  %v6689_v35 = vcombine.high %v4250_v11, %v4254_v13  ;;  %v4258_v38 = vld [vmem:[%s8255_s15 + $0x5c0] sm:$0xff]  ;;  %v4259_v16 = vld [vmem:[%s8255_s15 + $0x5c8] sm:$0xff] }
 0xa14   :  { %v8383_v25 = vpack.c.bf16 %v4071_v21, %v4071_v21  ;;  %v8393_v36 = vpack.c.bf16 %v4073_v26, %v4073_v26  ;;  %v4262_v15 = vld [vmem:[%s8255_s15 + $0x5e0] sm:$0xff]  ;;  %v4263_v17 = vld [vmem:[%s8255_s15 + $0x5e8] sm:$0xff]  ;;  %v6688_v18 = vcombine.low %v4250_v11, %v4254_v13 }
 0xa15   :  { %v6697_v20 = vcombine.high %v4258_v38, %v4262_v15  ;;  %v6699_v21 = vcombine.high %v4259_v16, %v4263_v17  ;;  %v4271_v26 = vld [vmem:[%s8255_s15 + $0x628] sm:$0xff]  ;;  %v6696_v28 = vcombine.low %v4258_v38, %v4262_v15  ;;  %v4294_v53 = vld [vmem:[%s8255_s15 + $0x6e0] sm:$0xff] }
 0xa16   :  { %5688 = vmatprep.mubr.bf16.mxu0 %v8383_v25  ;;  %5770 = vmatprep.mubr.bf16.mxu1 %v8383_v25  ;;  %v6707_v31 = vcombine.high %v4267_v24, %v4271_v26  ;;  %v4306_v14 = vld [vmem:[%s8255_s15 + $0x740] sm:$0xff] }
 0xa17   :  { %5689 = vmatmul.mubr.bf16.vlgmr.msra.gmra.mrb[12].mxu0 %v8385_v27  ;;  %5771 = vmatmul.mubr.bf16.vlgmr.msra.gmra.mrb[32].mxu1 %v8385_v27  ;;  %v4310_v33 = vld [vmem:[%s8255_s15 + $0x760] sm:$0xff] }
 0xa18   :  { %5698 = vmatpush1.bf16.msra.mxu0 %v6640_v4  ;;  %5780 = vmatpush1.bf16.msra.mxu1 %v6642_v7  ;;  %v4242_v4 = vld [vmem:[%s8255_s15 + $0x540] sm:$0xff]  ;;  %v4247_v7 = vld [vmem:[%s8255_s15 + $0x568] sm:$0xff]  ;;  %v6745_v38 = vcombine.high %v4306_v14, %v4310_v33 }
 0xa19   :  { %5729 = vmatprep.mubr.bf16.mxu0 %v8393_v36  ;;  %5811 = vmatprep.mubr.bf16.mxu1 %v8393_v36  ;;  %v6681_v10 = vcombine.high %v4242_v4, %v4246_v5  ;;  %v6683_v58 = vcombine.high %v4243_v6, %v4247_v7  ;;  %v6680_v2 = vcombine.low %v4242_v4, %v4246_v5 }
 0xa1a   :  { %5699 = vmatprep.subr.bf16.mxu0 %v6649_v29  ;;  %5781 = vmatprep.subr.bf16.mxu1 %v6651_v30  ;;  %v6682_v34 = vcombine.low %v4243_v6, %v4247_v7  ;;  %v6698_v29 = vcombine.low %v4259_v16, %v4263_v17  ;;  %v6705_v30 = vcombine.high %v4266_v22, %v4270_v23  ;;  %v4298_v6 = vld [vmem:[%s8255_s15 + $0x700] sm:$0xff] }
 0xa1b   :  { %v6729_v4 = vcombine.high %v4290_v62, %v4294_v53  ;;  %v4302_v7 = vld [vmem:[%s8255_s15 + $0x720] sm:$0xff]  ;;  %v3651_v17 = vrot.slane %v8369_v8, %v7999_v52 }
 0xa1c   :  { %5700 = vmatpush1.bf16.msra.mxu0 %v6648_v39  ;;  %5782 = vmatpush1.bf16.msra.mxu1 %v6650_v40  ;;  %v4275_v39 = vld [vmem:[%s8255_s15 + $0x648] sm:$0xff]  ;;  %v6737_v11 = vcombine.high %v4298_v6, %v4302_v7  ;;  %v4314_v16 = vld [vmem:[%s8255_s15 + $0x780] sm:$0xff] }
 0xa1d   :  { %5701 = vmatprep.subr.bf16.mxu0 %v6657_v41  ;;  %5783 = vmatprep.subr.bf16.mxu1 %v6659_v42  ;;  %v4279_v40 = vld [vmem:[%s8255_s15 + $0x668] sm:$0xff]  ;;  %v6704_v41 = vcombine.low %v4266_v22, %v4270_v23  ;;  %v6706_v42 = vcombine.low %v4267_v24, %v4271_v26  ;;  %v4322_v26 = vld [vmem:[%s8255_s15 + $0x7c0] sm:$0xff] }
 0xa1e   :  { %v6715_v44 = vcombine.high %v4275_v39, %v4279_v40  ;;  %v4326_v8 = vld [vmem:[%s8255_s15 + $0x7e0] sm:$0xff] }
 0xa20   :  { %5702 = vmatpush1.bf16.msra.mxu0 %v6656_v47  ;;  %5784 = vmatpush1.bf16.msra.mxu1 %v6658_v48  ;;  %v4283_v47 = vld [vmem:[%s8255_s15 + $0x688] sm:$0xff] }
 0xa21   :  { %5703 = vmatprep.subr.bf16.mxu0 %v6665_v49  ;;  %5785 = vmatprep.subr.bf16.mxu1 %v6667_v59  ;;  %v4287_v48 = vld [vmem:[%s8255_s15 + $0x6a8] sm:$0xff]  ;;  %v6712_v49 = vcombine.low %v4274_v32, %v4278_v3  ;;  %v6714_v59 = vcombine.low %v4275_v39, %v4279_v40  ;;  %v6761_v3 = vcombine.high %v4322_v26, %v4326_v8  ;;  %v4076_v40 = vld [vmem:[%s8255_s15 + $0x10] sm:$0xff] }
 0xa22   :  { %v6723_v61 = vcombine.high %v4283_v47, %v4287_v48 }
 0xa24   :  { %5704 = vmatpush1.bf16.msra.mxu0 %v6664_v63  ;;  %5786 = vmatpush1.bf16.msra.mxu1 %v6666_v0  ;;  %v4291_v63 = vld [vmem:[%s8255_s15 + $0x6c8] sm:$0xff] }
 0xa25   :  { %5705 = vmatprep.subr.bf16.mxu0 %v6673_v56  ;;  %5787 = vmatprep.subr.bf16.mxu1 %v6675_v1  ;;  %v4295_v0 = vld [vmem:[%s8255_s15 + $0x6e8] sm:$0xff]  ;;  %v6720_v56 = vcombine.low %v4282_v45, %v4286_v46  ;;  %v6722_v1 = vcombine.low %v4283_v47, %v4287_v48 }
 0xa26   :  { %v6731_v5 = vcombine.high %v4291_v63, %v4295_v0 }
 0xa28   :  { %5706 = vmatpush1.bf16.msra.mxu0 %v6672_v57  ;;  %5788 = vmatpush1.bf16.msra.mxu1 %v6674_v9  ;;  %v4299_v57 = vld [vmem:[%s8255_s15 + $0x708] sm:$0xff] }
 0xa29   :  { %5707 = vmatprep.subr.bf16.mxu0 %v6681_v10  ;;  %5789 = vmatprep.subr.bf16.mxu1 %v6683_v58  ;;  %v4303_v9 = vld [vmem:[%s8255_s15 + $0x728] sm:$0xff]  ;;  %v6728_v10 = vcombine.low %v4290_v62, %v4294_v53  ;;  %v6730_v58 = vcombine.low %v4291_v63, %v4295_v0 }
 0xa2a   :  { %v6739_v13 = vcombine.high %v4299_v57, %v4303_v9 }
 0xa2c   :  { %5708 = vmatpush1.bf16.msra.mxu0 %v6680_v2  ;;  %5790 = vmatpush1.bf16.msra.mxu1 %v6682_v34  ;;  %v4307_v2 = vld [vmem:[%s8255_s15 + $0x748] sm:$0xff] }
 0xa2d   :  { %5709 = vmatprep.subr.bf16.mxu0 %v6689_v35  ;;  %5791 = vmatprep.subr.bf16.mxu1 %v6691_v37  ;;  %v4311_v34 = vld [vmem:[%s8255_s15 + $0x768] sm:$0xff]  ;;  %v6736_v35 = vcombine.low %v4298_v6, %v4302_v7  ;;  %v6738_v37 = vcombine.low %v4299_v57, %v4303_v9  ;;  %v4097_v6 = vld [vmem:[%s8255_s15 + $0xb8] sm:$0xff] }
 0xa2e   :  { %v6747_v15 = vcombine.high %v4307_v2, %v4311_v34  ;;  %v6746_v22 = vcombine.low %v4307_v2, %v4311_v34 }
 0xa30   :  { %5710 = vmatpush1.bf16.msra.mxu0 %v6688_v18  ;;  %5792 = vmatpush1.bf16.msra.mxu1 %v6690_v19  ;;  %v4318_v18 = vld [vmem:[%s8255_s15 + $0x7a0] sm:$0xff]  ;;  %v4315_v19 = vld [vmem:[%s8255_s15 + $0x788] sm:$0xff] }
 0xa31   :  { %5711 = vmatprep.subr.bf16.mxu0 %v6697_v20  ;;  %5793 = vmatprep.subr.bf16.mxu1 %v6699_v21  ;;  %v4319_v20 = vld [vmem:[%s8255_s15 + $0x7a8] sm:$0xff]  ;;  %v6744_v21 = vcombine.low %v4306_v14, %v4310_v33  ;;  %v6753_v23 = vcombine.high %v4314_v16, %v4318_v18  ;;  %v4105_v14 = vld [vmem:[%s8255_s15 + $0xf8] sm:$0xff] }
 0xa32   :  { %v6755_v24 = vcombine.high %v4315_v19, %v4319_v20  ;;  %v6754_v32 = vcombine.low %v4315_v19, %v4319_v20  ;;  %v4116_v20 = vld [vmem:[%s8255_s15 + $0x150] sm:$0xff] }
 0xa34   :  { %5712 = vmatpush1.bf16.msra.mxu0 %v6696_v28  ;;  %5794 = vmatpush1.bf16.msra.mxu1 %v6698_v29  ;;  %v4056_v28 = vadd.f32 %v8377_v12, %v3651_v17  ;;  %v4323_v29 = vld [vmem:[%s8255_s15 + $0x7c8] sm:$0xff]  ;;  %v4077_v12 = vld [vmem:[%s8255_s15 + $0x18] sm:$0xff] }
 0xa35   :  { %5713 = vmatprep.subr.bf16.mxu0 %v6705_v30  ;;  %5795 = vmatprep.subr.bf16.mxu1 %v6707_v31  ;;  %v4327_v30 = vld [vmem:[%s8255_s15 + $0x7e8] sm:$0xff]  ;;  %v6752_v31 = vcombine.low %v4314_v16, %v4318_v18 }
 0xa36   :  { %v6763_v39 = vcombine.high %v4323_v29, %v4327_v30  ;;  %vm4064_vm5 = vcmp.ge.f32.partialorder %v4056_v28, 0.0  ;;  %v6762_v45 = vcombine.low %v4323_v29, %v4327_v30  ;;  %v4124_v29 = vld [vmem:[%s8255_s15 + $0x190] sm:$0xff] }
 0xa37   :  { %v4128_v30 = vld [vmem:[%s8255_s15 + $0x1b0] sm:$0xff] }
 0xa38   :  { %5714 = vmatpush1.bf16.msra.mxu0 %v6704_v41  ;;  %5796 = vmatpush1.bf16.msra.mxu1 %v6706_v42  ;;  %v4068_v41 = vmul.f32 0.2, %v4056_v28  ;;  %v4080_v42 = vld [vmem:[%s8255_s15 + $0x30] sm:$0xff] }
 0xa39   :  { %5715 = vmatprep.subr.bf16.mxu0 %v6713_v43  ;;  %5797 = vmatprep.subr.bf16.mxu1 %v6715_v44  ;;  %v4081_v43 = vld [vmem:[%s8255_s15 + $0x38] sm:$0xff]  ;;  %v6760_v44 = vcombine.low %v4322_v26, %v4326_v8  ;;  %v6517_v46 = vcombine.high %v4076_v40, %v4080_v42  ;;  %v6516_v62 = vcombine.low %v4076_v40, %v4080_v42  ;;  %v4132_v42 = vld [vmem:[%s8255_s15 + $0x1d0] sm:$0xff] }
 0xa3a   :  { %v6519_v47 = vcombine.high %v4077_v12, %v4081_v43  ;;  %v4072_v48 = vsel %vm4064_vm5, %v4056_v28, %v4068_v41  ;;  %v6518_v63 = vcombine.low %v4077_v12, %v4081_v43  ;;  %v6565_v40 = vcombine.high %v4124_v29, %v4128_v30  ;;  %v4136_v12 = vld [vmem:[%s8255_s15 + $0x1f0] sm:$0xff]  ;;  %v4133_v43 = vld [vmem:[%s8255_s15 + $0x1d8] sm:$0xff] }
 0xa3b   :  { %v8462_v53 = vpack.c.bf16 %v4072_v48, %v4072_v48 }
 0xa3c   :  { %5716 = vmatpush1.bf16.msra.mxu0 %v6712_v49  ;;  %5798 = vmatpush1.bf16.msra.mxu1 %v6714_v59  ;;  %v4084_v49 = vld [vmem:[%s8255_s15 + $0x50] sm:$0xff] }
 0xa3d   :  { %5717 = vmatprep.subr.bf16.mxu0 %v6721_v60  ;;  %5799 = vmatprep.subr.bf16.mxu1 %v6723_v61  ;;  %v4088_v59 = vld [vmem:[%s8255_s15 + $0x70] sm:$0xff]  ;;  %v4085_v60 = vld [vmem:[%s8255_s15 + $0x58] sm:$0xff] }
 0xa3e   :  { %v4089_v61 = vld [vmem:[%s8255_s15 + $0x78] sm:$0xff]  ;;  %v6525_v0 = vcombine.high %v4084_v49, %v4088_v59  ;;  %v6524_v7 = vcombine.low %v4084_v49, %v4088_v59  ;;  %v4140_v49 = vld [vmem:[%s8255_s15 + $0x210] sm:$0xff] }
 0xa3f   :  { %v6526_v57 = vcombine.low %v4085_v60, %v4089_v61  ;;  %v4144_v59 = vld [vmem:[%s8255_s15 + $0x230] sm:$0xff] }
 0xa40   :  { %5718 = vmatpush1.bf16.msra.mxu0 %v6720_v56  ;;  %5800 = vmatpush1.bf16.msra.mxu1 %v6722_v1  ;;  %v6527_v56 = vcombine.high %v4085_v60, %v4089_v61  ;;  %v4092_v1 = vld [vmem:[%s8255_s15 + $0x90] sm:$0xff]  ;;  %v4141_v60 = vld [vmem:[%s8255_s15 + $0x218] sm:$0xff] }
 0xa41   :  { %5719 = vmatprep.subr.bf16.mxu0 %v6729_v4  ;;  %5801 = vmatprep.subr.bf16.mxu1 %v6731_v5  ;;  %v4096_v4 = vld [vmem:[%s8255_s15 + $0xb0] sm:$0xff]  ;;  %v4093_v5 = vld [vmem:[%s8255_s15 + $0x98] sm:$0xff] }
 0xa42   :  { %v6533_v9 = vcombine.high %v4092_v1, %v4096_v4  ;;  %v6532_v33 = vcombine.low %v4092_v1, %v4096_v4  ;;  %v6534_v2 = vcombine.low %v4093_v5, %v4097_v6  ;;  %v4145_v61 = vld [vmem:[%s8255_s15 + $0x238] sm:$0xff]  ;;  %v4148_v1 = vld [vmem:[%s8255_s15 + $0x250] sm:$0xff] }
 0xa43   :  { %v4152_v4 = vld [vmem:[%s8255_s15 + $0x270] sm:$0xff] }
 0xa44   :  { %5720 = vmatpush1.bf16.msra.mxu0 %v6728_v10  ;;  %5802 = vmatpush1.bf16.msra.mxu1 %v6730_v58  ;;  %v6535_v10 = vcombine.high %v4093_v5, %v4097_v6  ;;  %v4100_v58 = vld [vmem:[%s8255_s15 + $0xd0] sm:$0xff]  ;;  %v4149_v5 = vld [vmem:[%s8255_s15 + $0x258] sm:$0xff] }
 0xa45   :  { %5721 = vmatprep.subr.bf16.mxu0 %v6737_v11  ;;  %5803 = vmatprep.subr.bf16.mxu1 %v6739_v13  ;;  %v4104_v11 = vld [vmem:[%s8255_s15 + $0xf0] sm:$0xff]  ;;  %v4101_v13 = vld [vmem:[%s8255_s15 + $0xd8] sm:$0xff] }
 0xa46   :  { %v6543_v34 = vcombine.high %v4101_v13, %v4105_v14  ;;  %v6540_v16 = vcombine.low %v4100_v58, %v4104_v11  ;;  %v6542_v17 = vcombine.low %v4101_v13, %v4105_v14  ;;  %v4153_v6 = vld [vmem:[%s8255_s15 + $0x278] sm:$0xff] }
 0xa47   :  { %v4157_v13 = vld [vmem:[%s8255_s15 + $0x298] sm:$0xff] }
 0xa48   :  { %5722 = vmatpush1.bf16.msra.mxu0 %v6736_v35  ;;  %5804 = vmatpush1.bf16.msra.mxu1 %v6738_v37  ;;  %v4108_v35 = vld [vmem:[%s8255_s15 + $0x110] sm:$0xff]  ;;  %v4161_v14 = vld [vmem:[%s8255_s15 + $0x2b8] sm:$0xff] }
 0xa49   :  { %5723 = vmatprep.subr.bf16.mxu0 %v6745_v38  ;;  %5805 = vmatprep.subr.bf16.mxu1 %v6747_v15  ;;  %v4112_v37 = vld [vmem:[%s8255_s15 + $0x130] sm:$0xff]  ;;  %v4109_v38 = vld [vmem:[%s8255_s15 + $0x118] sm:$0xff] }
 0xa4a   :  { %v4113_v15 = vld [vmem:[%s8255_s15 + $0x138] sm:$0xff]  ;;  %v6549_v18 = vcombine.high %v4108_v35, %v4112_v37 }
 0xa4b   :  { %v6551_v19 = vcombine.high %v4109_v38, %v4113_v15  ;;  %v6550_v26 = vcombine.low %v4109_v38, %v4113_v15  ;;  %v4165_v38 = vld [vmem:[%s8255_s15 + $0x2d8] sm:$0xff] }
 0xa4c   :  { %5724 = vmatpush1.bf16.msra.mxu0 %v6744_v21  ;;  %5806 = vmatpush1.bf16.msra.mxu1 %v6746_v22  ;;  %v4120_v21 = vld [vmem:[%s8255_s15 + $0x170] sm:$0xff]  ;;  %v4117_v22 = vld [vmem:[%s8255_s15 + $0x158] sm:$0xff] }
 0xa4d   :  { %5725 = vmatprep.subr.bf16.mxu0 %v6753_v23  ;;  %5807 = vmatprep.subr.bf16.mxu1 %v6755_v24  ;;  %v4121_v23 = vld [vmem:[%s8255_s15 + $0x178] sm:$0xff]  ;;  %v6548_v24 = vcombine.low %v4108_v35, %v4112_v37  ;;  %v6557_v28 = vcombine.high %v4116_v20, %v4120_v21  ;;  %v4164_v35 = vld [vmem:[%s8255_s15 + $0x2d0] sm:$0xff] }
 0xa4e   :  { %v6559_v8 = vcombine.high %v4117_v22, %v4121_v23  ;;  %v4168_v37 = vld [vmem:[%s8255_s15 + $0x2f0] sm:$0xff]  ;;  %v4169_v15 = vld [vmem:[%s8255_s15 + $0x2f8] sm:$0xff] }
 0xa50   :  { %5726 = vmatpush1.bf16.msra.mxu0 %v6752_v31  ;;  %5808 = vmatpush1.bf16.msra.mxu1 %v6754_v32  ;;  %v4125_v31 = vld [vmem:[%s8255_s15 + $0x198] sm:$0xff] }
 0xa51   :  { %5727 = vmatprep.subr.bf16.mxu0 %v6761_v3  ;;  %5809 = vmatprep.subr.bf16.mxu1 %v6763_v39  ;;  %v4129_v32 = vld [vmem:[%s8255_s15 + $0x1b8] sm:$0xff]  ;;  %v6556_v3 = vcombine.low %v4116_v20, %v4120_v21  ;;  %v6558_v39 = vcombine.low %v4117_v22, %v4121_v23  ;;  %v4172_v20 = vld [vmem:[%s8255_s15 + $0x310] sm:$0xff] }
 0xa52   :  { %v6567_v41 = vcombine.high %v4125_v31, %v4129_v32  ;;  %v4176_v21 = vld [vmem:[%s8255_s15 + $0x330] sm:$0xff]  ;;  %v4173_v22 = vld [vmem:[%s8255_s15 + $0x318] sm:$0xff] }
 0xa53   :  { %v4177_v23 = vld [vmem:[%s8255_s15 + $0x338] sm:$0xff] }
 0xa54   :  { %5728 = vmatpush1.bf16.msra.mxu0 %v6760_v44  ;;  %5810 = vmatpush1.bf16.msra.mxu1 %v6762_v45  ;;  %v4137_v44 = vld [vmem:[%s8255_s15 + $0x1f8] sm:$0xff]  ;;  %v6564_v45 = vcombine.low %v4124_v29, %v4128_v30  ;;  %v4180_v29 = vld [vmem:[%s8255_s15 + $0x350] sm:$0xff] }
 0xa55   :  { %5820 = vmatprep.subr.bf16.mxu0 %v6517_v46  ;;  %5902 = vmatprep.subr.bf16.mxu1 %v6519_v47  ;;  %v6566_v46 = vcombine.low %v4125_v31, %v4129_v32  ;;  %v6573_v47 = vcombine.high %v4132_v42, %v4136_v12  ;;  %v6575_v48 = vcombine.high %v4133_v43, %v4137_v44  ;;  %v4184_v30 = vld [vmem:[%s8255_s15 + $0x370] sm:$0xff]  ;;  %v4181_v31 = vld [vmem:[%s8255_s15 + $0x358] sm:$0xff] }
 0xa56   :  { %v4185_v32 = vld [vmem:[%s8255_s15 + $0x378] sm:$0xff] }
 0xa57   :  { %5730 = vmatmul.mubr.bf16.vlgmr.msra.gmra.mrb[12].mxu0 %v8462_v53  ;;  %5812 = vmatmul.mubr.bf16.vlgmr.msra.gmra.mrb[32].mxu1 %v8462_v53 }
 0xa58   :  { %5821 = vmatpush1.bf16.msra.mxu0 %v6516_v62  ;;  %5852 = vmatprep.mubr.bf16.mxu0 %v8383_v25  ;;  %v6572_v62 = vcombine.low %v4132_v42, %v4136_v12  ;;  %v4188_v42 = vld [vmem:[%s8255_s15 + $0x390] sm:$0xff] }
 0xa59   :  { %5903 = vmatpush1.bf16.msra.mxu1 %v6518_v63  ;;  %5934 = vmatprep.mubr.bf16.mxu1 %v8383_v25  ;;  %v6541_v25 = vcombine.high %v4100_v58, %v4104_v11  ;;  %v6574_v63 = vcombine.low %v4133_v43, %v4137_v44  ;;  %v4156_v58 = vld [vmem:[%s8255_s15 + $0x290] sm:$0xff]  ;;  %v4189_v43 = vld [vmem:[%s8255_s15 + $0x398] sm:$0xff] }
 0xa5a   :  { %5822 = vmatprep.subr.bf16.mxu0 %v6525_v0  ;;  %5904 = vmatprep.subr.bf16.mxu1 %v6527_v56  ;;  %v6581_v0 = vcombine.high %v4140_v49, %v4144_v59  ;;  %v6583_v56 = vcombine.high %v4141_v60, %v4145_v61  ;;  %v4160_v11 = vld [vmem:[%s8255_s15 + $0x2b0] sm:$0xff]  ;;  %v4193_v44 = vld [vmem:[%s8255_s15 + $0x3b8] sm:$0xff] }
 0xa5b   :  { %v4192_v12 = vld [vmem:[%s8255_s15 + $0x3b0] sm:$0xff] }
 0xa5c   :  { %5823 = vmatpush1.bf16.msra.mxu0 %v6524_v7  ;;  %v6580_v7 = vcombine.low %v4140_v49, %v4144_v59  ;;  %v4196_v49 = vld [vmem:[%s8255_s15 + $0x3d0] sm:$0xff] }
 0xa5d   :  { %5905 = vmatpush1.bf16.msra.mxu1 %v6526_v57  ;;  %5824 = vmatprep.subr.bf16.mxu0 %v6533_v9  ;;  %v6582_v57 = vcombine.low %v4141_v60, %v4145_v61  ;;  %v6589_v9 = vcombine.high %v4148_v1, %v4152_v4  ;;  %v4200_v59 = vld [vmem:[%s8255_s15 + $0x3f0] sm:$0xff]  ;;  %v4197_v60 = vld [vmem:[%s8255_s15 + $0x3d8] sm:$0xff] }
 0xa5e   :  { %5906 = vmatprep.subr.bf16.mxu1 %v6535_v10  ;;  %v6591_v10 = vcombine.high %v4149_v5, %v4153_v6  ;;  %v4201_v61 = vld [vmem:[%s8255_s15 + $0x3f8] sm:$0xff] }
 0xa60   :  { %5825 = vmatpush1.bf16.msra.mxu0 %v6532_v33  ;;  %v6588_v33 = vcombine.low %v4148_v1, %v4152_v4  ;;  %v4204_v1 = vld [vmem:[%s8255_s15 + $0x410] sm:$0xff] }
 0xa61   :  { %5907 = vmatpush1.bf16.msra.mxu1 %v6534_v2  ;;  %5826 = vmatprep.subr.bf16.mxu0 %v6541_v25  ;;  %v6590_v2 = vcombine.low %v4149_v5, %v4153_v6  ;;  %v6597_v25 = vcombine.high %v4156_v58, %v4160_v11  ;;  %v4208_v4 = vld [vmem:[%s8255_s15 + $0x430] sm:$0xff]  ;;  %v4205_v5 = vld [vmem:[%s8255_s15 + $0x418] sm:$0xff] }
 0xa62   :  { %5908 = vmatprep.subr.bf16.mxu1 %v6543_v34  ;;  %v6599_v34 = vcombine.high %v4157_v13, %v4161_v14  ;;  %v4209_v6 = vld [vmem:[%s8255_s15 + $0x438] sm:$0xff] }
 0xa64   :  { %5827 = vmatpush1.bf16.msra.mxu0 %v6540_v16  ;;  %v6596_v16 = vcombine.low %v4156_v58, %v4160_v11  ;;  %v4212_v58 = vld [vmem:[%s8255_s15 + $0x450] sm:$0xff] }
 0xa65   :  { %5909 = vmatpush1.bf16.msra.mxu1 %v6542_v17  ;;  %5828 = vmatprep.subr.bf16.mxu0 %v6549_v18  ;;  %v6598_v17 = vcombine.low %v4157_v13, %v4161_v14  ;;  %v6605_v18 = vcombine.high %v4164_v35, %v4168_v37  ;;  %v4216_v11 = vld [vmem:[%s8255_s15 + $0x470] sm:$0xff]  ;;  %v6644_v13 = vcombine.low %v4204_v1, %v4208_v4  ;;  %v4213_v14 = vld [vmem:[%s8255_s15 + $0x458] sm:$0xff] }
 0xa66   :  { %5910 = vmatprep.subr.bf16.mxu1 %v6551_v19  ;;  %v6607_v19 = vcombine.high %v4165_v38, %v4169_v15 }
 0xa68   :  { %5829 = vmatpush1.bf16.msra.mxu0 %v6548_v24  ;;  %v6604_v24 = vcombine.low %v4164_v35, %v4168_v37  ;;  %v4224_v35 = vld [vmem:[%s8255_s15 + $0x4b0] sm:$0xff] }
 0xa69   :  { %5911 = vmatpush1.bf16.msra.mxu1 %v6550_v26  ;;  %5830 = vmatprep.subr.bf16.mxu0 %v6557_v28  ;;  %v6606_v26 = vcombine.low %v4165_v38, %v4169_v15  ;;  %v6613_v28 = vcombine.high %v4172_v20, %v4176_v21  ;;  %v4221_v38 = vld [vmem:[%s8255_s15 + $0x498] sm:$0xff] }
 0xa6a   :  { %5912 = vmatprep.subr.bf16.mxu1 %v6559_v8  ;;  %v6615_v8 = vcombine.high %v4173_v22, %v4177_v23  ;;  %v4225_v15 = vld [vmem:[%s8255_s15 + $0x4b8] sm:$0xff] }
 0xa6c   :  { %5831 = vmatpush1.bf16.msra.mxu0 %v6556_v3  ;;  %v6612_v3 = vcombine.low %v4172_v20, %v4176_v21  ;;  %v4228_v20 = vld [vmem:[%s8255_s15 + $0x4d0] sm:$0xff] }
 0xa6d   :  { %5913 = vmatpush1.bf16.msra.mxu1 %v6558_v39  ;;  %5832 = vmatprep.subr.bf16.mxu0 %v6565_v40  ;;  %v6614_v39 = vcombine.low %v4173_v22, %v4177_v23  ;;  %v6621_v40 = vcombine.high %v4180_v29, %v4184_v30  ;;  %v4232_v21 = vld [vmem:[%s8255_s15 + $0x4f0] sm:$0xff]  ;;  %v4229_v22 = vld [vmem:[%s8255_s15 + $0x4d8] sm:$0xff] }
 0xa6e   :  { %5914 = vmatprep.subr.bf16.mxu1 %v6567_v41  ;;  %v6623_v41 = vcombine.high %v4181_v31, %v4185_v32 }
 0xa70   :  { %5833 = vmatpush1.bf16.msra.mxu0 %v6564_v45  ;;  %v6620_v45 = vcombine.low %v4180_v29, %v4184_v30  ;;  %v4237_v29 = vld [vmem:[%s8255_s15 + $0x518] sm:$0xff] }
 0xa71   :  { %5915 = vmatpush1.bf16.msra.mxu1 %v6566_v46  ;;  %5834 = vmatprep.subr.bf16.mxu0 %v6573_v47  ;;  %v6622_v46 = vcombine.low %v4181_v31, %v4185_v32  ;;  %v6629_v47 = vcombine.high %v4188_v42, %v4192_v12  ;;  %v4241_v30 = vld [vmem:[%s8255_s15 + $0x538] sm:$0xff]  ;;  %v6668_v31 = vcombine.low %v4228_v20, %v4232_v21 }
 0xa72   :  { %5916 = vmatprep.subr.bf16.mxu1 %v6575_v48  ;;  %v6631_v48 = vcombine.high %v4189_v43, %v4193_v44 }
 0xa74   :  { %5835 = vmatpush1.bf16.msra.mxu0 %v6572_v62  ;;  %v6628_v62 = vcombine.low %v4188_v42, %v4192_v12  ;;  %v4245_v42 = vld [vmem:[%s8255_s15 + $0x558] sm:$0xff] }
 0xa75   :  { %5917 = vmatpush1.bf16.msra.mxu1 %v6574_v63  ;;  %5836 = vmatprep.subr.bf16.mxu0 %v6581_v0  ;;  %v6630_v63 = vcombine.low %v4189_v43, %v4193_v44  ;;  %v6637_v0 = vcombine.high %v4196_v49, %v4200_v59  ;;  %v4249_v12 = vld [vmem:[%s8255_s15 + $0x578] sm:$0xff]  ;;  %v6678_v44 = vcombine.low %v4237_v29, %v4241_v30 }
 0xa76   :  { %5918 = vmatprep.subr.bf16.mxu1 %v6583_v56  ;;  %v6639_v56 = vcombine.high %v4197_v60, %v4201_v61 }
 0xa78   :  { %5837 = vmatpush1.bf16.msra.mxu0 %v6580_v7  ;;  %v6636_v7 = vcombine.low %v4196_v49, %v4200_v59  ;;  %v4253_v49 = vld [vmem:[%s8255_s15 + $0x598] sm:$0xff] }
 0xa79   :  { %5919 = vmatpush1.bf16.msra.mxu1 %v6582_v57  ;;  %5838 = vmatprep.subr.bf16.mxu0 %v6589_v9  ;;  %v6638_v57 = vcombine.low %v4197_v60, %v4201_v61  ;;  %v6645_v9 = vcombine.high %v4204_v1, %v4208_v4  ;;  %v4257_v59 = vld [vmem:[%s8255_s15 + $0x5b8] sm:$0xff]  ;;  %v6686_v61 = vcombine.low %v4245_v42, %v4249_v12 }
 0xa7a   :  { %5920 = vmatprep.subr.bf16.mxu1 %v6591_v10  ;;  %v6647_v10 = vcombine.high %v4205_v5, %v4209_v6  ;;  %v4261_v1 = vld [vmem:[%s8255_s15 + $0x5d8] sm:$0xff] }
 0xa7b   :  { %v4265_v4 = vld [vmem:[%s8255_s15 + $0x5f8] sm:$0xff] }
 0xa7c   :  { %5839 = vmatpush1.bf16.msra.mxu0 %v6588_v33  ;;  %v4217_v33 = vld [vmem:[%s8255_s15 + $0x478] sm:$0xff] }
 0xa7d   :  { %5921 = vmatpush1.bf16.msra.mxu1 %v6590_v2  ;;  %5840 = vmatprep.subr.bf16.mxu0 %v6597_v25  ;;  %v6646_v2 = vcombine.low %v4205_v5, %v4209_v6  ;;  %v6653_v25 = vcombine.high %v4212_v58, %v4216_v11  ;;  %v6655_v37 = vcombine.high %v4213_v14, %v4217_v33 }
 0xa7e   :  { %5922 = vmatprep.subr.bf16.mxu1 %v6599_v34  ;;  %v4220_v34 = vld [vmem:[%s8255_s15 + $0x490] sm:$0xff]  ;;  %v6694_v6 = vcombine.low %v4253_v49, %v4257_v59 }
 0xa7f   :  { %v6660_v23 = vcombine.low %v4220_v34, %v4224_v35 }
 0xa80   :  { %5841 = vmatpush1.bf16.msra.mxu0 %v6596_v16  ;;  %v6652_v16 = vcombine.low %v4212_v58, %v4216_v11  ;;  %v4269_v58 = vld [vmem:[%s8255_s15 + $0x618] sm:$0xff] }
 0xa81   :  { %5923 = vmatpush1.bf16.msra.mxu1 %v6598_v17  ;;  %5842 = vmatprep.subr.bf16.mxu0 %v6605_v18  ;;  %v6654_v17 = vcombine.low %v4213_v14, %v4217_v33  ;;  %v6661_v18 = vcombine.high %v4220_v34, %v4224_v35  ;;  %v4273_v11 = vld [vmem:[%s8255_s15 + $0x638] sm:$0xff]  ;;  %v6702_v14 = vcombine.low %v4261_v1, %v4265_v4  ;;  %v4280_v34 = vld [vmem:[%s8255_s15 + $0x670] sm:$0xff] }
 0xa82   :  { %5924 = vmatprep.subr.bf16.mxu1 %v6607_v19  ;;  %v6663_v19 = vcombine.high %v4221_v38, %v4225_v15  ;;  %v4277_v35 = vld [vmem:[%s8255_s15 + $0x658] sm:$0xff] }
 0xa84   :  { %5843 = vmatpush1.bf16.msra.mxu0 %v6604_v24  ;;  %v6662_v24 = vcombine.low %v4221_v38, %v4225_v15  ;;  %v6710_v15 = vcombine.low %v4269_v58, %v4273_v11 }
 0xa85   :  { %5925 = vmatpush1.bf16.msra.mxu1 %v6606_v26  ;;  %5844 = vmatprep.subr.bf16.mxu0 %v6613_v28  ;;  %v6669_v26 = vcombine.high %v4228_v20, %v4232_v21  ;;  %v4236_v28 = vld [vmem:[%s8255_s15 + $0x510] sm:$0xff]  ;;  %v4285_v20 = vld [vmem:[%s8255_s15 + $0x698] sm:$0xff] }
 0xa86   :  { %5926 = vmatprep.subr.bf16.mxu1 %v6615_v8  ;;  %v4240_v8 = vld [vmem:[%s8255_s15 + $0x530] sm:$0xff]  ;;  %v4289_v21 = vld [vmem:[%s8255_s15 + $0x6b8] sm:$0xff] }
 0xa87   :  { %v6676_v43 = vcombine.low %v4236_v28, %v4240_v8 }
 0xa88   :  { %5845 = vmatpush1.bf16.msra.mxu0 %v6612_v3  ;;  %v6677_v3 = vcombine.high %v4236_v28, %v4240_v8  ;;  %v4293_v28 = vld [vmem:[%s8255_s15 + $0x6d8] sm:$0xff] }
 0xa89   :  { %5927 = vmatpush1.bf16.msra.mxu1 %v6614_v39  ;;  %5846 = vmatprep.subr.bf16.mxu0 %v6621_v40  ;;  %v6679_v39 = vcombine.high %v4237_v29, %v4241_v30  ;;  %v4244_v40 = vld [vmem:[%s8255_s15 + $0x550] sm:$0xff]  ;;  %v4297_v8 = vld [vmem:[%s8255_s15 + $0x6f8] sm:$0xff]  ;;  %v6726_v30 = vcombine.low %v4285_v20, %v4289_v21 }
 0xa8a   :  { %5928 = vmatprep.subr.bf16.mxu1 %v6623_v41  ;;  %v4248_v41 = vld [vmem:[%s8255_s15 + $0x570] sm:$0xff] }
 0xa8b   :  { %v6684_v60 = vcombine.low %v4244_v40, %v4248_v41 }
 0xa8c   :  { %5847 = vmatpush1.bf16.msra.mxu0 %v6620_v45  ;;  %v6685_v45 = vcombine.high %v4244_v40, %v4248_v41  ;;  %v4301_v40 = vld [vmem:[%s8255_s15 + $0x718] sm:$0xff] }
 0xa8d   :  { %5929 = vmatpush1.bf16.msra.mxu1 %v6622_v46  ;;  %5848 = vmatprep.subr.bf16.mxu0 %v6629_v47  ;;  %v6687_v46 = vcombine.high %v4245_v42, %v4249_v12  ;;  %v4252_v47 = vld [vmem:[%s8255_s15 + $0x590] sm:$0xff]  ;;  %v4305_v41 = vld [vmem:[%s8255_s15 + $0x738] sm:$0xff]  ;;  %v6734_v12 = vcombine.low %v4293_v28, %v4297_v8 }
 0xa8e   :  { %5930 = vmatprep.subr.bf16.mxu1 %v6631_v48  ;;  %v4256_v48 = vld [vmem:[%s8255_s15 + $0x5b0] sm:$0xff] }
 0xa8f   :  { %v6692_v5 = vcombine.low %v4252_v47, %v4256_v48 }
 0xa90   :  { %5849 = vmatpush1.bf16.msra.mxu0 %v6628_v62  ;;  %v6693_v62 = vcombine.high %v4252_v47, %v4256_v48  ;;  %v4309_v47 = vld [vmem:[%s8255_s15 + $0x758] sm:$0xff] }
 0xa91   :  { %5931 = vmatpush1.bf16.msra.mxu1 %v6630_v63  ;;  %5850 = vmatprep.subr.bf16.mxu0 %v6637_v0  ;;  %v6695_v63 = vcombine.high %v4253_v49, %v4257_v59  ;;  %v4260_v0 = vld [vmem:[%s8255_s15 + $0x5d0] sm:$0xff]  ;;  %v4313_v48 = vld [vmem:[%s8255_s15 + $0x778] sm:$0xff]  ;;  %v6742_v59 = vcombine.low %v4301_v40, %v4305_v41 }
 0xa92   :  { %5932 = vmatprep.subr.bf16.mxu1 %v6639_v56  ;;  %v4264_v56 = vld [vmem:[%s8255_s15 + $0x5f0] sm:$0xff] }
 0xa94   :  { %5851 = vmatpush1.bf16.msra.mxu0 %v6636_v7  ;;  %v6701_v7 = vcombine.high %v4260_v0, %v4264_v56 }
 0xa95   :  { %5933 = vmatpush1.bf16.msra.mxu1 %v6638_v57  ;;  %5861 = vmatprep.subr.bf16.mxu0 %v6645_v9  ;;  %v6703_v57 = vcombine.high %v4261_v1, %v4265_v4  ;;  %v4268_v9 = vld [vmem:[%s8255_s15 + $0x610] sm:$0xff]  ;;  %v6750_v4 = vcombine.low %v4309_v47, %v4313_v48 }
 0xa96   :  { %5943 = vmatprep.subr.bf16.mxu1 %v6647_v10  ;;  %v4272_v10 = vld [vmem:[%s8255_s15 + $0x630] sm:$0xff] }
 0xa97   :  { %5853 = vmatmul.mubr.bf16.vlgmr.msra.gmra.mrb[16].mxu0 %v8385_v27  ;;  %v6709_v33 = vcombine.high %v4268_v9, %v4272_v10  ;;  %v6708_v38 = vcombine.low %v4268_v9, %v4272_v10  ;;  %v4325_v9 = vld [vmem:[%s8255_s15 + $0x7d8] sm:$0xff] }
 0xa98   :  { %5935 = vmatmul.mubr.bf16.vlgmr.msra.gmra.mrb[36].mxu1 %v8385_v27  ;;  %5862 = vmatpush1.bf16.msra.mxu0 %v6644_v13  ;;  %v4233_v27 = vld [vmem:[%s8255_s15 + $0x4f8] sm:$0xff]  ;;  %v6700_v13 = vcombine.low %v4260_v0, %v4264_v56 }
 0xa99   :  { %5893 = vmatprep.mubr.bf16.mxu0 %v8393_v36  ;;  %5944 = vmatpush1.bf16.msra.mxu1 %v6646_v2  ;;  %v6670_v32 = vcombine.low %v4229_v22, %v4233_v27  ;;  %v6711_v2 = vcombine.high %v4269_v58, %v4273_v11  ;;  %v4317_v0 = vld [vmem:[%s8255_s15 + $0x798] sm:$0xff] }
 0xa9a   :  { %5975 = vmatprep.mubr.bf16.mxu1 %v8393_v36  ;;  %5863 = vmatprep.subr.bf16.mxu0 %v6653_v25  ;;  %v6671_v36 = vcombine.high %v4229_v22, %v4233_v27  ;;  %v4276_v25 = vld [vmem:[%s8255_s15 + $0x650] sm:$0xff]  ;;  %v4321_v56 = vld [vmem:[%s8255_s15 + $0x7b8] sm:$0xff] }
 0xa9b   :  { %5945 = vmatprep.subr.bf16.mxu1 %v6655_v37  ;;  %v4281_v37 = vld [vmem:[%s8255_s15 + $0x678] sm:$0xff]  ;;  %v6716_v22 = vcombine.low %v4276_v25, %v4280_v34  ;;  %v6758_v11 = vcombine.low %v4317_v0, %v4321_v56 }
 0xa9c   :  { %5864 = vmatpush1.bf16.msra.mxu0 %v6652_v16  ;;  %v6717_v16 = vcombine.high %v4276_v25, %v4280_v34  ;;  %v6718_v27 = vcombine.low %v4277_v35, %v4281_v37  ;;  %v4329_v10 = vld [vmem:[%s8255_s15 + $0x7f8] sm:$0xff]  ;;  %v4330_v25 = vld [vmem:[%s6065_s5] sm:$0xff] }
 0xa9d   :  { %5946 = vmatpush1.bf16.msra.mxu1 %v6654_v17  ;;  %5865 = vmatprep.subr.bf16.mxu0 %v6661_v18  ;;  %v6719_v17 = vcombine.high %v4277_v35, %v4281_v37  ;;  %v4284_v18 = vld [vmem:[%s8255_s15 + $0x690] sm:$0xff]  ;;  %v4339_v34 = vrot.slane %v4330_v25, %v7996_v51  ;;  %v4347_v35 = vrot.slane %v4330_v25, %v7999_v52 }
 0xa9e   :  { %5947 = vmatprep.subr.bf16.mxu1 %v6663_v19  ;;  %v4288_v19 = vld [vmem:[%s8255_s15 + $0x6b0] sm:$0xff]  ;;  %v4343_v37 = vrot.slane %v4330_v25, %v8002_v54 }
 0xa9f   :  { %v6724_v29 = vcombine.low %v4284_v18, %v4288_v19 }
 0xaa0   :  { %5866 = vmatpush1.bf16.msra.mxu0 %v6660_v23  ;;  %v6725_v23 = vcombine.high %v4284_v18, %v4288_v19 }
 0xaa1   :  { %5948 = vmatpush1.bf16.msra.mxu1 %v6662_v24  ;;  %5867 = vmatprep.subr.bf16.mxu0 %v6669_v26  ;;  %v6727_v24 = vcombine.high %v4285_v20, %v4289_v21  ;;  %v4292_v26 = vld [vmem:[%s8255_s15 + $0x6d0] sm:$0xff] }
 0xaa2   :  { %5949 = vmatprep.subr.bf16.mxu1 %v6671_v36  ;;  %v4296_v36 = vld [vmem:[%s8255_s15 + $0x6f0] sm:$0xff] }
 0xaa3   :  { %v6732_v42 = vcombine.low %v4292_v26, %v4296_v36 }
 0xaa4   :  { %5868 = vmatpush1.bf16.msra.mxu0 %v6668_v31  ;;  %v6733_v31 = vcombine.high %v4292_v26, %v4296_v36 }
 0xaa5   :  { %5950 = vmatpush1.bf16.msra.mxu1 %v6670_v32  ;;  %5869 = vmatprep.subr.bf16.mxu0 %v6677_v3  ;;  %v6735_v32 = vcombine.high %v4293_v28, %v4297_v8  ;;  %v4300_v3 = vld [vmem:[%s8255_s15 + $0x710] sm:$0xff] }
 0xaa6   :  { %5951 = vmatprep.subr.bf16.mxu1 %v6679_v39  ;;  %v4304_v39 = vld [vmem:[%s8255_s15 + $0x730] sm:$0xff] }
 0xaa7   :  { %v6740_v49 = vcombine.low %v4300_v3, %v4304_v39 }
 0xaa8   :  { %5870 = vmatpush1.bf16.msra.mxu0 %v6676_v43  ;;  %v6741_v43 = vcombine.high %v4300_v3, %v4304_v39 }
 0xaa9   :  { %5952 = vmatpush1.bf16.msra.mxu1 %v6678_v44  ;;  %5871 = vmatprep.subr.bf16.mxu0 %v6685_v45  ;;  %v6743_v44 = vcombine.high %v4301_v40, %v4305_v41  ;;  %v4308_v45 = vld [vmem:[%s8255_s15 + $0x750] sm:$0xff] }
 0xaaa   :  { %5953 = vmatprep.subr.bf16.mxu1 %v6687_v46  ;;  %v4312_v46 = vld [vmem:[%s8255_s15 + $0x770] sm:$0xff] }
 0xaab   :  { %v6748_v1 = vcombine.low %v4308_v45, %v4312_v46 }
 0xaac   :  { %5872 = vmatpush1.bf16.msra.mxu0 %v6684_v60  ;;  %v6749_v60 = vcombine.high %v4308_v45, %v4312_v46  ;;  %v4354_v45 = vsub.s32 4, %v7993_v50  ;;  %v4362_v46 = vsub.s32 6, %v7993_v50 }
 0xaad   :  { %5954 = vmatpush1.bf16.msra.mxu1 %v6686_v61  ;;  %5873 = vmatprep.subr.bf16.mxu0 %v6693_v62  ;;  %v6751_v61 = vcombine.high %v4309_v47, %v4313_v48  ;;  %v4316_v62 = vld [vmem:[%s8255_s15 + $0x790] sm:$0xff]  ;;  %v4358_v47 = vsub.s32 5, %v7993_v50  ;;  %v4366_v48 = vsub.s32 7, %v7993_v50 }
 0xaae   :  { %5955 = vmatprep.subr.bf16.mxu1 %v6695_v63  ;;  %v4320_v63 = vld [vmem:[%s8255_s15 + $0x7b0] sm:$0xff] }
 0xaaf   :  { %v6756_v58 = vcombine.low %v4316_v62, %v4320_v63 }
 0xab0   :  { %5874 = vmatpush1.bf16.msra.mxu0 %v6692_v5  ;;  %v6757_v5 = vcombine.high %v4316_v62, %v4320_v63 }
 0xab1   :  { %5956 = vmatpush1.bf16.msra.mxu1 %v6694_v6  ;;  %5875 = vmatprep.subr.bf16.mxu0 %v6701_v7  ;;  %v6759_v6 = vcombine.high %v4317_v0, %v4321_v56  ;;  %v4324_v7 = vld [vmem:[%s8255_s15 + $0x7d0] sm:$0xff] }
 0xab2   :  { %5957 = vmatprep.subr.bf16.mxu1 %v6703_v57  ;;  %v4328_v57 = vld [vmem:[%s8255_s15 + $0x7f0] sm:$0xff] }
 0xab4   :  { %5876 = vmatpush1.bf16.msra.mxu0 %v6700_v13  ;;  %v6765_v13 = vcombine.high %v4324_v7, %v4328_v57 }
 0xab5   :  { %5958 = vmatpush1.bf16.msra.mxu1 %v6702_v14  ;;  %5877 = vmatprep.subr.bf16.mxu0 %v6709_v33  ;;  %v6767_v14 = vcombine.high %v4325_v9, %v4329_v10  ;;  %v6764_v33 = vcombine.low %v4324_v7, %v4328_v57 }
 0xab6   :  { %5959 = vmatprep.subr.bf16.mxu1 %v6711_v2  ;;  %v6766_v2 = vcombine.low %v4325_v9, %v4329_v10 }
 0xab8   :  { %5878 = vmatpush1.bf16.msra.mxu0 %v6708_v38  ;;  %v4351_v38 = vrot.slane %v4330_v25, %v8005_v55 }
 0xab9   :  { %5960 = vmatpush1.bf16.msra.mxu1 %v6710_v15  ;;  %5879 = vmatprep.subr.bf16.mxu0 %v6717_v16 }
 0xaba   :  { %5961 = vmatprep.subr.bf16.mxu1 %v6719_v17 }
 0xabc   :  { %5880 = vmatpush1.bf16.msra.mxu0 %v6716_v22 }
 0xabd   :  { %5962 = vmatpush1.bf16.msra.mxu1 %v6718_v27  ;;  %5881 = vmatprep.subr.bf16.mxu0 %v6725_v23 }
 0xabe   :  { %5963 = vmatprep.subr.bf16.mxu1 %v6727_v24 }
 0xac0   :  { %5882 = vmatpush1.bf16.msra.mxu0 %v6724_v29 }
 0xac1   :  { %5964 = vmatpush1.bf16.msra.mxu1 %v6726_v30  ;;  %5883 = vmatprep.subr.bf16.mxu0 %v6733_v31 }
 0xac2   :  { %5965 = vmatprep.subr.bf16.mxu1 %v6735_v32 }
 0xac4   :  { %5884 = vmatpush1.bf16.msra.mxu0 %v6732_v42 }
 0xac5   :  { %5966 = vmatpush1.bf16.msra.mxu1 %v6734_v12  ;;  %5885 = vmatprep.subr.bf16.mxu0 %v6741_v43 }
 0xac6   :  { %5967 = vmatprep.subr.bf16.mxu1 %v6743_v44 }
 0xac8   :  { %5886 = vmatpush1.bf16.msra.mxu0 %v6740_v49  ;;  %v4355_v49 = vrot.slane %v4330_v25, %v4354_v45 }
 0xac9   :  { %5968 = vmatpush1.bf16.msra.mxu1 %v6742_v59  ;;  %5887 = vmatprep.subr.bf16.mxu0 %v6749_v60  ;;  %v4363_v59 = vrot.slane %v4330_v25, %v4362_v46  ;;  %v4359_v60 = vrot.slane %v4330_v25, %v4358_v47 }
 0xaca   :  { %5969 = vmatprep.subr.bf16.mxu1 %v6751_v61  ;;  %v4367_v61 = vrot.slane %v4330_v25, %v4366_v48 }
 0xacc   :  { %5888 = vmatpush1.bf16.msra.mxu0 %v6748_v1 }
 0xacd   :  { %5970 = vmatpush1.bf16.msra.mxu1 %v6750_v4  ;;  %5889 = vmatprep.subr.bf16.mxu0 %v6757_v5 }
 0xace   :  { %5971 = vmatprep.subr.bf16.mxu1 %v6759_v6 }
 0xad0   :  { %5890 = vmatpush1.bf16.msra.mxu0 %v6756_v58 }
 0xad1   :  { %5972 = vmatpush1.bf16.msra.mxu1 %v6758_v11  ;;  %5891 = vmatprep.subr.bf16.mxu0 %v6765_v13 }
 0xad2   :  { %5973 = vmatprep.subr.bf16.mxu1 %v6767_v14 }
 0xad4   :  { %5892 = vmatpush1.bf16.msra.mxu0 %v6764_v33 }
 0xad5   :  { %5974 = vmatpush1.bf16.msra.mxu1 %v6766_v2 }
 0xad7   :  { %5894 = vmatmul.mubr.bf16.vlgmr.msra.gmra.mrb[16].mxu0 %v8462_v53 }
 0xad8   :  { %5976 = vmatmul.mubr.bf16.vlgmr.msra.gmra.mrb[36].mxu1 %v8462_v53 }
 0xb2a   :  { %v5731_v15 = vpop.f32.mrb[12].mxu0  ;;  %v5813_v16 = vpop.f32.mrb[32].mxu1 }
 0xb2b   :  { %v6867_v17 = vadd.f32 %v5731_v15, %v4339_v34  ;;  %v6869_v18 = vadd.f32 %v5813_v16, %v4347_v35  ;;  %v5733_v19 = vpop.f32.mrb[13].mxu0  ;;  %v5815_v53 = vpop.f32.mrb[33].mxu1 }
 0xb2c   :  { %v6868_v20 = vadd.f32 %v5733_v19, %v4343_v37  ;;  %v6870_v21 = vadd.f32 %v5815_v53, %v4351_v38  ;;  %v5735_v22 = vpop.f32.mrb[14].mxu0  ;;  %v5817_v27 = vpop.f32.mrb[34].mxu1 }
 0xb2d   :  { %v5984_v23 = vsub.f32 0.0, %v6867_v17  ;;  %v5986_v24 = vsub.f32 0.0, %v6869_v18  ;;  %v5736_v26 = vpop.f32.mrb[15].mxu0  ;;  %v5818_v51 = vpop.f32.mrb[35].mxu1 }
 0xb2e   :  { %v5985_v36 = vsub.f32 0.0, %v6868_v20  ;;  %v5987_v52 = vsub.f32 0.0, %v6870_v21 }
 0xb2f   :  { %v5992_v28 = vmul.f32 1.442695, %v5984_v23  ;;  %v5996_v54 = vmul.f32 1.442695, %v5986_v24 }
 0xb30   :  { %v5994_v8 = vmul.f32 1.442695, %v5985_v36  ;;  %v5998_v55 = vmul.f32 1.442695, %v5987_v52 }
 0xb31   :  { %7606 = vpow2.f32 %v5992_v28 }
 0xb32   :  { %7608 = vpow2.f32 %v5996_v54 }
 0xb33   :  { %7610 = vpow2.f32 %v5994_v8 }
 0xb34   :  { %7612 = vpow2.f32 %v5998_v55 }
 0xb3b   :  { %v7607_v29 = vpop.eup %7606 }
 0xb3c   :  { %v7609_v30 = vpop.eup %7608  ;;  %v6008_v31 = vadd.f32 1.0, %v7607_v29 }
 0xb3d   :  { %v7611_v32 = vpop.eup %7610  ;;  %v6010_v3 = vadd.f32 1.0, %v7609_v30 }
 0xb3e   :  { %v7613_v39 = vpop.eup %7612  ;;  %7614 = vrcp.f32 %v6008_v31  ;;  %v6009_v40 = vadd.f32 1.0, %v7611_v32 }
 0xb3f   :  { %7616 = vrcp.f32 %v6010_v3  ;;  %v6011_v41 = vadd.f32 1.0, %v7613_v39 }
 0xb40   :  { %7618 = vrcp.f32 %v6009_v40 }
 0xb41   :  { %7620 = vrcp.f32 %v6011_v41 }
 0xb48   :  { %v7615_v42 = vpop.eup %7614 }
 0xb49   :  { %v7617_v12 = vpop.eup %7616  ;;  %6024 = vst [vmem:[%s8604_s9] sm:$0xff] %v7615_v42 }
 0xb4a   :  { %v7619_v43 = vpop.eup %7618  ;;  %6026 = vst [vmem:[%s8604_s9 + $0x10] sm:$0xff] %v7617_v12 }
 0xb4b   :  { %v7621_v44 = vpop.eup %7620  ;;  %6025 = vst [vmem:[%s8604_s9 + $0x8] sm:$0xff] %v7619_v43 }
 0xb4c   :  { %6027 = vst [vmem:[%s8604_s9 + $0x18] sm:$0xff] %v7621_v44 }
 0xbaa   :  { %v5895_v62 = vpop.f32.mrb[16].mxu0 }
 0xbab   :  { %v6871_v63 = vadd.f32 %v5895_v62, %v4355_v49  ;;  %v5977_v0 = vpop.f32.mrb[36].mxu1  ;;  %v5897_v56 = vpop.f32.mrb[17].mxu0 }
 0xbac   :  { %v6873_v1 = vadd.f32 %v5977_v0, %v4363_v59  ;;  %v6872_v4 = vadd.f32 %v5897_v56, %v4359_v60  ;;  %v5979_v5 = vpop.f32.mrb[37].mxu1  ;;  %v5899_v6 = vpop.f32.mrb[18].mxu0 }
 0xbad   :  { %v5988_v7 = vsub.f32 0.0, %v6871_v63  ;;  %v6874_v57 = vadd.f32 %v5979_v5, %v4367_v61  ;;  %v5981_v9 = vpop.f32.mrb[38].mxu1  ;;  %v5900_v10 = vpop.f32.mrb[19].mxu0 }
 0xbae   :  { %v5990_v58 = vsub.f32 0.0, %v6873_v1  ;;  %v5989_v11 = vsub.f32 0.0, %v6872_v4  ;;  %v5982_v13 = vpop.f32.mrb[39].mxu1 }
 0xbaf   :  { %v6000_v50 = vmul.f32 1.442695, %v5988_v7  ;;  %v5991_v14 = vsub.f32 0.0, %v6874_v57 }
 0xbb0   :  { %v6004_v33 = vmul.f32 1.442695, %v5990_v58  ;;  %v6002_v2 = vmul.f32 1.442695, %v5989_v11 }
 0xbb1   :  { %7622 = vpow2.f32 %v6000_v50  ;;  %v6006_v25 = vmul.f32 1.442695, %v5991_v14 }
 0xbb2   :  { %7624 = vpow2.f32 %v6004_v33 }
 0xbb3   :  { %7626 = vpow2.f32 %v6002_v2 }
 0xbb4   :  { %7628 = vpow2.f32 %v6006_v25 }
 0xbbb   :  { %v7623_v34 = vpop.eup %7622 }
 0xbbc   :  { %v7625_v35 = vpop.eup %7624  ;;  %v6012_v37 = vadd.f32 1.0, %v7623_v34 }
 0xbbd   :  { %v7627_v38 = vpop.eup %7626  ;;  %v6014_v15 = vadd.f32 1.0, %v7625_v35 }
 0xbbe   :  { %v7629_v16 = vpop.eup %7628  ;;  %7630 = vrcp.f32 %v6012_v37  ;;  %v6013_v17 = vadd.f32 1.0, %v7627_v38 }
 0xbbf   :  { %7632 = vrcp.f32 %v6014_v15  ;;  %v6015_v18 = vadd.f32 1.0, %v7629_v16 }
 0xbc0   :  { %7634 = vrcp.f32 %v6013_v17 }
 0xbc1   :  { %7636 = vrcp.f32 %v6015_v18 }
 0xbc8   :  { %v7631_v19 = vpop.eup %7630 }
 0xbc9   :  { %v7633_v53 = vpop.eup %7632  ;;  %6028 = vst [vmem:[%s8604_s9 + $0x20] sm:$0xff] %v7631_v19 }
 0xbca   :  { %v7635_v20 = vpop.eup %7634  ;;  %6030 = vst [vmem:[%s8604_s9 + $0x30] sm:$0xff] %v7633_v53 }
 0xbcb   :  { %v7637_v21 = vpop.eup %7636  ;;  %6029 = vst [vmem:[%s8604_s9 + $0x28] sm:$0xff] %v7635_v20 }
 0xbcc   :  { %6031 = vst [vmem:[%s8604_s9 + $0x38] sm:$0xff] %v7637_v21 }

</bundles_post_ra>
